<compile_context>
chip_gen: v6e
topology: v6e:2x2x1
jax: 0.10.0
libtpu: 0.0.40
codegen_flags: <defaults>
</compile_context>

<pallas_src>
import functools

import jax
import jax.numpy as jnp
from jax.experimental import pallas as pl
from jax.experimental.pallas import tpu as pltpu


_LANE = 128
_SUBLANE = 8


# ---------------------------------------------------------------------------
# helpers
# ---------------------------------------------------------------------------

def _round_up(n, m):
    return ((n + m - 1) // m) * m


def _pad_to(a, shape):
    pads = [(0, t - s) for s, t in zip(a.shape, shape)]
    if all(p == (0, 0) for p in pads):
        return a
    return jnp.pad(a, pads)


def _vmem_capacity_bytes():
    """Per-core VMEM capacity; conservative (v7x) fallback if the query fails."""
    try:
        info = pltpu.get_tpu_info()
        cap = getattr(info, "vmem_capacity_bytes", None)
        if cap:
            return int(cap)
    except Exception:
        pass
    return 64 << 20


def _const_spec(shape, single_buffer):
    """BlockSpec for an operand whose block never changes across the grid."""
    ndim = len(shape)
    index_map = lambda *args: (0,) * ndim
    if single_buffer:
        # Constant-index operand: no need to double-buffer it -> halves its VMEM footprint.
        return pl.BlockSpec(shape, index_map, pipeline_mode=pl.Buffered(1))
    return pl.BlockSpec(shape, index_map)


def _ln_relu(y, gamma, beta, d_real, use_layer_norm, eps):
    """f32 (bias-included) matmul output -> LayerNorm (masked to d_real cols) -> ReLU.

    Padded output columns of `y` are exactly zero (zero-padded W columns + zero-padded
    bias), so the pre-mean sum needs no mask; only the post-mean centering does.
    """
    d_pad = y.shape[-1]
    if use_layer_norm:
        mean = jnp.sum(y, axis=-1, keepdims=True) * (1.0 / d_real)
        c = y - mean
        if d_pad != d_real:
            col = jax.lax.broadcasted_iota(jnp.int32, y.shape, y.ndim - 1)
            c = jnp.where(col < d_real, c, 0.0)
        var = jnp.sum(c * c, axis=-1, keepdims=True) * (1.0 / d_real)
        y = c * jax.lax.rsqrt(var + eps)
        # padded gamma/beta are zero, so padded columns come out exactly 0.
        y = y * gamma + beta
    return jnp.maximum(y, 0.0)


# ---------------------------------------------------------------------------
# VMEM footprint estimates (per build variant, no double counting)
# ---------------------------------------------------------------------------

def _path_a_vmem_estimate(tile_b, dims_pad, w_bytes, vec_bytes,
                          itemsize_c, itemsize_o, single_buffer):
    mult = 1 if single_buffer else 2
    return (2 * tile_b * dims_pad[0] * itemsize_c          # x (double-buffered)
            + mult * (w_bytes + vec_bytes)                  # resident params
            + 2 * tile_b * dims_pad[-1] * itemsize_o        # out (double-buffered)
            + 6 * tile_b * max(dims_pad) * 4                # live f32 temporaries
            + (2 << 20))                                    # headroom


def _path_b_vmem_estimate(tile_b, tk, d_out_pad, x_itemsize, w_itemsize,
                          itemsize_o, single_buffer):
    mult = 1 if single_buffer else 2
    return (2 * tile_b * tk * x_itemsize                    # x K-slice (double-buffered)
            + 2 * tk * d_out_pad * w_itemsize               # W K-slice (double-buffered)
            + 2 * tile_b * d_out_pad * itemsize_o           # out (double-buffered)
            + 5 * tile_b * d_out_pad * 4                    # acc scratch + finalize temps
            + mult * 3 * d_out_pad * 4                      # bias/gamma/beta
            + (2 << 20))


def _lane_divisors_desc(d):
    """Multiples of _LANE that divide d, descending (d is a multiple of _LANE)."""
    m = d // _LANE
    return [q * _LANE for q in range(m, 0, -1) if m % q == 0]


def _pick_tk(d_in_pad, tk_req, tile_b, d_out_pad, x_itemsize, w_itemsize,
             itemsize_o, budget):
    """Largest lane-multiple divisor of d_in_pad that is <= tk_req and fits VMEM."""
    tk_req = max(_LANE, min(tk_req, d_in_pad))
    divs = _lane_divisors_desc(d_in_pad)
    cands = [d for d in divs if d <= tk_req] or [divs[-1]]
    for cand in cands:
        if _path_b_vmem_estimate(tile_b, cand, d_out_pad, x_itemsize, w_itemsize,
                                 itemsize_o, True) <= budget:
            return cand
    return cands[-1]


# ---------------------------------------------------------------------------
# Path A: whole-MLP fusion (all weights resident in VMEM, one pallas_call)
# ---------------------------------------------------------------------------

def _fused_mlp_kernel(*refs, n_layers, out_dims, use_layer_norm, eps, compute_dtype):
    x_ref = refs[0]
    o_ref = refs[1 + 4 * n_layers]
    h = x_ref[...].astype(compute_dtype)
    for li in range(n_layers):
        w_ref, b_ref, g_ref, be_ref = refs[1 + 4 * li: 5 + 4 * li]
        y = jnp.dot(h, w_ref[...], preferred_element_type=jnp.float32)
        y = y + b_ref[...]
        y = _ln_relu(y, g_ref[...], be_ref[...], out_dims[li], use_layer_norm, eps)
        h = y.astype(compute_dtype) if li + 1 < n_layers else y
    o_ref[...] = h.astype(o_ref.dtype)


def _fused_mlp_full(x_p, padded, dims, dims_pad, tile_b, use_layer_norm,
                    out_dtype, compute_dtype, vmem_budget, eps=1e-5):
    b_pad = x_p.shape[0]
    n_layers = len(padded)
    flat = []
    for p in padded:
        flat.extend(p)

    kernel = functools.partial(
        _fused_mlp_kernel, n_layers=n_layers, out_dims=tuple(dims[1:]),
        use_layer_norm=use_layer_norm, eps=eps, compute_dtype=compute_dtype)

    itemsize_c = jnp.dtype(compute_dtype).itemsize
    itemsize_o = jnp.dtype(out_dtype).itemsize
    w_bytes = sum(w.size * w.dtype.itemsize for (w, _, _, _) in padded)
    vec_bytes = sum(3 * dims_pad[li + 1] * 4 for li in range(n_layers))

    flops = sum(2 * b_pad * dims_pad[li] * dims_pad[li + 1] for li in range(n_layers))
    transcendentals = b_pad * n_layers if use_layer_norm else 0
    bytes_accessed = (x_p.size * x_p.dtype.itemsize
                      + sum(a.size * a.dtype.itemsize for a in flat)
                      + b_pad * dims_pad[-1] * itemsize_o)

    def build(single_buffer):
        est = _path_a_vmem_estimate(tile_b, dims_pad, w_bytes, vec_bytes,
                                    itemsize_c, itemsize_o, single_buffer)
        vmem = int(min(max(est, 16 << 20), vmem_budget))
        in_specs = [pl.BlockSpec((tile_b, dims_pad[0]), lambda i: (i, 0))]
        for li in range(n_layers):
            di, do = dims_pad[li], dims_pad[li + 1]
            in_specs += [_const_spec((di, do), single_buffer),
                         _const_spec((1, do), single_buffer),
                         _const_spec((1, do), single_buffer),
                         _const_spec((1, do), single_buffer)]
        return pl.pallas_call(
            kernel,
            out_shape=jax.ShapeDtypeStruct((b_pad, dims_pad[-1]), out_dtype),
            grid_spec=pltpu.PrefetchScalarGridSpec(
                num_scalar_prefetch=0,
                grid=(b_pad // tile_b,),
                in_specs=in_specs,
                out_specs=pl.BlockSpec((tile_b, dims_pad[-1]), lambda i: (i, 0)),
            ),
            compiler_params=pltpu.CompilerParams(
                dimension_semantics=("parallel",),
                vmem_limit_bytes=vmem),
            cost_estimate=pl.CostEstimate(flops=flops, transcendentals=transcendentals,
                                          bytes_accessed=bytes_accessed),
        )(x_p, *flat)

    try:
        return build(True)
    except Exception:
        # Fallback if single-buffering via pl.Buffered(1) is rejected by this jax build.
        return build(False)


# ---------------------------------------------------------------------------
# Path B: per-layer fused kernel with K-tiled f32 accumulator (for big weights)
# ---------------------------------------------------------------------------

def _layer_kernel(x_ref, w_ref, b_ref, g_ref, be_ref, o_ref, acc_ref,
                  *, use_layer_norm, eps, d_out_real):
    k = pl.program_id(1)

    @pl.when(k == 0)
    def _():
        # Bias-initialize the accumulator (removes one VPU add from the finalize).
        acc_ref[...] = jnp.zeros_like(acc_ref) + b_ref[...]

    acc_ref[...] += jnp.dot(x_ref[...], w_ref[...], preferred_element_type=jnp.float32)

    @pl.when(k == pl.num_programs(1) - 1)
    def _():
        y = _ln_relu(acc_ref[...], g_ref[...], be_ref[...], d_out_real,
                     use_layer_norm, eps)
        o_ref[...] = y.astype(o_ref.dtype)


def _fused_mlp_layer(x_p, w_p, b_p, g_p, be_p, *, d_out_real, tile_b, tk,
                     use_layer_norm, out_dtype, vmem_budget, eps=1e-5):
    b_pad, d_in_pad = x_p.shape
    d_out_pad = w_p.shape[1]
    itemsize_o = jnp.dtype(out_dtype).itemsize

    tk = _pick_tk(d_in_pad, tk, tile_b, d_out_pad,
                  x_p.dtype.itemsize, w_p.dtype.itemsize, itemsize_o, vmem_budget)
    n_k = d_in_pad // tk
    n_b = b_pad // tile_b

    kernel = functools.partial(_layer_kernel, use_layer_norm=use_layer_norm,
                               eps=eps, d_out_real=d_out_real)

    flops = 2 * b_pad * d_in_pad * d_out_pad
    transcendentals = b_pad if use_layer_norm else 0
    # The weight K-slices are re-streamed once per batch tile.
    bytes_accessed = (x_p.size * x_p.dtype.itemsize
                      + n_b * w_p.size * w_p.dtype.itemsize
                      + 3 * d_out_pad * 4
                      + b_pad * d_out_pad * itemsize_o)

    def build(single_buffer):
        est = _path_b_vmem_estimate(tile_b, tk, d_out_pad, x_p.dtype.itemsize,
                                    w_p.dtype.itemsize, itemsize_o, single_buffer)
        vmem = int(min(max(est, 16 << 20), vmem_budget))
        return pl.pallas_call(
            kernel,
            out_shape=jax.ShapeDtypeStruct((b_pad, d_out_pad), out_dtype),
            grid_spec=pltpu.PrefetchScalarGridSpec(
                num_scalar_prefetch=0,
                grid=(n_b, n_k),
                in_specs=[
                    pl.BlockSpec((tile_b, tk), lambda i, k: (i, k)),      # x K-slice
                    pl.BlockSpec((tk, d_out_pad), lambda i, k: (k, 0)),   # weight K-slice
                    _const_spec((1, d_out_pad), single_buffer),           # bias
                    _const_spec((1, d_out_pad), single_buffer),           # gamma
                    _const_spec((1, d_out_pad), single_buffer),           # beta
                ],
                out_specs=pl.BlockSpec((tile_b, d_out_pad), lambda i, k: (i, 0)),
                scratch_shapes=[pltpu.VMEM((tile_b, d_out_pad), jnp.float32)],
            ),
            compiler_params=pltpu.CompilerParams(
                dimension_semantics=("parallel", "arbitrary"),
                vmem_limit_bytes=vmem),
            cost_estimate=pl.CostEstimate(flops=flops, transcendentals=transcendentals,
                                          bytes_accessed=bytes_accessed),
        )(x_p, w_p, b_p, g_p, be_p)

    try:
        return build(True)
    except Exception:
        return build(False)


# ---------------------------------------------------------------------------
# public wrapper
# ---------------------------------------------------------------------------

def init_mlp_params(key, cfg):
    """Deterministic parameter init matching the torch module's shapes (f32 master copy)."""
    hidden_dims = cfg['hidden_dims']
    in_dim = cfg.get('input_dim', hidden_dims[0])
    params = []
    for h_dim in hidden_dims:
        key, kw, kb = jax.random.split(key, 3)
        bound = 1.0 / jnp.sqrt(in_dim)
        w = jax.random.uniform(kw, (in_dim, h_dim), jnp.float32, -bound, bound)
        b = jax.random.uniform(kb, (1, h_dim), jnp.float32, -bound, bound)
        gamma = jnp.ones((1, h_dim), jnp.float32)   # nn.LayerNorm default init
        beta = jnp.zeros((1, h_dim), jnp.float32)
        params.append((w, b, gamma, beta))
        in_dim = h_dim
    return params


def mlp_forward(x, params, cfg, *, force_per_layer=False, tile_b=None, tk=None,
                compute_dtype=jnp.bfloat16):
    """Forward pass of MLP: per layer Linear -> [LayerNorm] -> ReLU -> [Dropout(eval)=id]."""
    use_layer_norm = cfg['use_layer_norm']
    B, d_in = x.shape
    out_dtype = x.dtype

    dims = [d_in] + [w.shape[1] for (w, _, _, _) in params]
    dims_pad = [_round_up(d, _LANE) for d in dims]
    n_layers = len(params)

    # --- generation-aware budgets -------------------------------------------------
    capacity = _vmem_capacity_bytes()
    vmem_budget = int(0.85 * capacity)                 # never request physical VMEM
    small_vmem = capacity <= (72 << 20)                # v7x-class (64 MiB / TC, 2 TCs)
    full_fusion_weight_bytes = (16 << 20) if small_vmem else (48 << 20)

    itemsize_c = jnp.dtype(compute_dtype).itemsize
    itemsize_o = jnp.dtype(out_dtype).itemsize
    w_bytes = sum(dims_pad[li] * dims_pad[li + 1] * itemsize_c for li in range(n_layers))
    vec_bytes = sum(3 * dims_pad[li + 1] * 4 for li in range(n_layers))

    # --- batch tile ----------------------------------------------------------------
    if tile_b is None:
        tile_b = 256 if small_vmem else 512
    tile_b = min(tile_b, _round_up(B, 16))
    if small_vmem and B >= 16:
        # v7x has 2 TensorCores: guarantee >=2 steps on the "parallel" batch axis.
        tile_b = min(tile_b, max(_SUBLANE, _round_up((B + 1) // 2, _SUBLANE)))
    tile_b = max(_SUBLANE, (tile_b // _SUBLANE) * _SUBLANE)

    # --- path selection + tile_b fit check ------------------------------------------
    use_path_a = (not force_per_layer) and w_bytes <= full_fusion_weight_bytes
    if use_path_a:
        while tile_b > 32 and _path_a_vmem_estimate(
                tile_b, dims_pad, w_bytes, vec_bytes, itemsize_c, itemsize_o,
                True) > vmem_budget:
            tile_b = max(32, tile_b // 2)
        if _path_a_vmem_estimate(tile_b, dims_pad, w_bytes, vec_bytes, itemsize_c,
                                 itemsize_o, True) > vmem_budget:
            use_path_a = False
    if not use_path_a:
        widest = max(dims_pad[1:])
        while tile_b > 32 and _path_b_vmem_estimate(
                tile_b, _LANE, widest, itemsize_c, itemsize_c, 4, True) > vmem_budget:
            tile_b = max(32, tile_b // 2)

    if tk is None:
        tk = 512 if small_vmem else 1024

    b_pad = _round_up(B, tile_b)

    # Pad + cast operands (zero-padding is exact for matmul; LN stats are masked in-kernel).
    x_p = _pad_to(x, (b_pad, dims_pad[0])).astype(compute_dtype)
    padded = []
    for li, (w, b, g, be) in enumerate(params):
        di, do = dims_pad[li], dims_pad[li + 1]
        padded.append((
            _pad_to(w, (di, do)).astype(compute_dtype),
            _pad_to(b.reshape(1, -1), (1, do)).astype(jnp.float32),
            _pad_to(g.reshape(1, -1), (1, do)).astype(jnp.float32),
            _pad_to(be.reshape(1, -1), (1, do)).astype(jnp.float32),
        ))

    if use_path_a:
        out_p = _fused_mlp_full(x_p, padded, dims, dims_pad, tile_b,
                                use_layer_norm, out_dtype, compute_dtype, vmem_budget)
    else:
        h = x_p
        for li, (w, b, g, be) in enumerate(padded):
            last = li == n_layers - 1
            h = _fused_mlp_layer(h, w, b, g, be,
                                 d_out_real=dims[li + 1], tile_b=tile_b, tk=tk,
                                 use_layer_norm=use_layer_norm,
                                 out_dtype=out_dtype if last else compute_dtype,
                                 vmem_budget=vmem_budget)
        out_p = h

    return out_p[:B, :dims[-1]]


# ---------------------------------------------------------------------------
# reference (matches the kernel's bf16 matmul operand rounding)
# ---------------------------------------------------------------------------

def reference_forward(x, params, cfg, compute_dtype=jnp.bfloat16, eps=1e-5):
    use_ln = cfg['use_layer_norm']
    h = x.astype(compute_dtype).astype(jnp.float32)
    n = len(params)
    for li, (w, b, g, be) in enumerate(params):
        y = h @ w.astype(compute_dtype).astype(jnp.float32) + b.reshape(1, -1)
        if use_ln:
            mean = jnp.mean(y, axis=-1, keepdims=True)
            var = jnp.mean((y - mean) ** 2, axis=-1, keepdims=True)
            y = (y - mean) * jax.lax.rsqrt(var + eps) * g.reshape(1, -1) + be.reshape(1, -1)
        y = jnp.maximum(y, 0.0)
        h = y if li == n - 1 else y.astype(compute_dtype).astype(jnp.float32)
    return h


if __name__ == "__main__":
    key = jax.random.PRNGKey(0)

    # ---- lane-aligned config (exercises whole-MLP fusion + per-layer K-tiled path) ----
    cfg = {
        'hidden_dims': [256, 128],
        'input_dim': 128,
        'use_dropout': True,
        'dropout_rate': 0.1,
        'use_layer_norm': True,
    }
    key, kx, kp = jax.random.split(key, 3)
    B = 256
    x = jax.random.normal(kx, (B, cfg['input_dim']), jnp.float32)
    params = init_mlp_params(kp, cfg)

    out_full = mlp_forward(x, params, cfg)                                   # fused whole-MLP path
    out_layer = mlp_forward(x, params, cfg, force_per_layer=True, tk=128)    # K-tiled per-layer path
    out_full, out_layer = jax.block_until_ready((out_full, out_layer))

    ref = reference_forward(x, params, cfg)
    assert out_full.shape == (B, cfg['hidden_dims'][-1])
    assert out_layer.shape == (B, cfg['hidden_dims'][-1])
    assert float(jnp.max(jnp.abs(out_full - ref))) < 1e-2
    assert float(jnp.max(jnp.abs(out_layer - ref))) < 1e-2

    # ---- unaligned config (exercises feature/batch padding + masked LayerNorm stats) ----
    cfg2 = {
        'hidden_dims': [96, 48],
        'input_dim': 40,
        'use_dropout': True,
        'dropout_rate': 0.1,
        'use_layer_norm': True,
    }
    key, kx2, kp2 = jax.random.split(key, 3)
    B2 = 50
    x2 = jax.random.normal(kx2, (B2, cfg2['input_dim']), jnp.float32)
    params2 = init_mlp_params(kp2, cfg2)

    out2_full = mlp_forward(x2, params2, cfg2)
    out2_layer = mlp_forward(x2, params2, cfg2, force_per_layer=True, tk=128)
    out2_full, out2_layer = jax.block_until_ready((out2_full, out2_layer))

    ref2 = reference_forward(x2, params2, cfg2)
    assert out2_full.shape == (B2, cfg2['hidden_dims'][-1])
    assert float(jnp.max(jnp.abs(out2_full - ref2))) < 1e-2
    assert float(jnp.max(jnp.abs(out2_layer - ref2))) < 1e-2

    print("KERNEL_OK")
</pallas_src>

<mosaic_0001>
module attributes {stable_mosaic.version = 11 : i64} {
  func.func @_fused_mlp_kernel(%arg0: i32, %arg1: memref<128x128xbf16, #tpu.memory_space<vmem>>, %arg2: memref<128x256xbf16, #tpu.memory_space<vmem>>, %arg3: memref<1x256xf32, #tpu.memory_space<vmem>>, %arg4: memref<1x256xf32, #tpu.memory_space<vmem>>, %arg5: memref<1x256xf32, #tpu.memory_space<vmem>>, %arg6: memref<256x128xbf16, #tpu.memory_space<vmem>>, %arg7: memref<1x128xf32, #tpu.memory_space<vmem>>, %arg8: memref<1x128xf32, #tpu.memory_space<vmem>>, %arg9: memref<1x128xf32, #tpu.memory_space<vmem>>, %arg10: memref<128x128xf32, #tpu.memory_space<vmem>>) attributes {dimension_semantics = [#tpu.dimension_semantics<parallel>], iteration_bounds = array<i64: 2>, scalar_prefetch = 0 : i64, scratch_operands = 0 : i64, tpu.core_type = #tpu.core_type<tc>, window_params = [{transform_indices = @transform_0, window_bounds = array<i64: 128, 128>}, {pipeline_mode = #tpu.pipeline_mode<synchronous>, transform_indices = @transform_1, window_bounds = array<i64: 128, 256>}, {pipeline_mode = #tpu.pipeline_mode<synchronous>, transform_indices = @transform_2, window_bounds = array<i64: 1, 256>}, {pipeline_mode = #tpu.pipeline_mode<synchronous>, transform_indices = @transform_3, window_bounds = array<i64: 1, 256>}, {pipeline_mode = #tpu.pipeline_mode<synchronous>, transform_indices = @transform_4, window_bounds = array<i64: 1, 256>}, {pipeline_mode = #tpu.pipeline_mode<synchronous>, transform_indices = @transform_5, window_bounds = array<i64: 256, 128>}, {pipeline_mode = #tpu.pipeline_mode<synchronous>, transform_indices = @transform_6, window_bounds = array<i64: 1, 128>}, {pipeline_mode = #tpu.pipeline_mode<synchronous>, transform_indices = @transform_7, window_bounds = array<i64: 1, 128>}, {pipeline_mode = #tpu.pipeline_mode<synchronous>, transform_indices = @transform_8, window_bounds = array<i64: 1, 128>}, {transform_indices = @transform_9, window_bounds = array<i64: 128, 128>}]} {
    %c0 = arith.constant 0 : index
    %c0_0 = arith.constant 0 : index
    %0 = vector.load %arg1[%c0, %c0_0] : memref<128x128xbf16, #tpu.memory_space<vmem>>, vector<128x128xbf16>
    %c0_1 = arith.constant 0 : index
    %c0_2 = arith.constant 0 : index
    %1 = vector.load %arg2[%c0_1, %c0_2] : memref<128x256xbf16, #tpu.memory_space<vmem>>, vector<128x256xbf16>
    %cst = arith.constant dense<0.000000e+00> : vector<128x256xf32>
    %2 = tpu.matmul %0, %1, %cst {dimension_numbers = #tpu.dot_dimension_numbers<[1], [0], [0], [1], [0, 0, 1, 1], [], []>} : vector<128x128xbf16>, vector<128x256xbf16>, vector<128x256xf32> -> vector<128x256xf32>
    %c0_3 = arith.constant 0 : index
    %c0_4 = arith.constant 0 : index
    %3 = vector.load %arg3[%c0_3, %c0_4] : memref<1x256xf32, #tpu.memory_space<vmem>>, vector<1x256xf32>
    %4 = vector.broadcast %3 : vector<1x256xf32> to vector<128x256xf32>
    %5 = arith.addf %2, %4 : vector<128x256xf32>
    %c0_5 = arith.constant 0 : index
    %c0_6 = arith.constant 0 : index
    %6 = vector.load %arg4[%c0_5, %c0_6] : memref<1x256xf32, #tpu.memory_space<vmem>>, vector<1x256xf32>
    %c0_7 = arith.constant 0 : index
    %c0_8 = arith.constant 0 : index
    %7 = vector.load %arg5[%c0_7, %c0_8] : memref<1x256xf32, #tpu.memory_space<vmem>>, vector<1x256xf32>
    %cst_9 = arith.constant dense<0.000000e+00> : vector<128xf32>
    %8 = vector.multi_reduction <add>, %5, %cst_9 [1] : vector<128x256xf32> to vector<128xf32>
    %9 = vector.shape_cast %8 : vector<128xf32> to vector<128x1xf32>
    %cst_10 = arith.constant 3.906250e-03 : f32
    %10 = vector.broadcast %cst_10 : f32 to vector<128x1xf32>
    %11 = arith.mulf %9, %10 : vector<128x1xf32>
    %12 = vector.broadcast %11 : vector<128x1xf32> to vector<128x256xf32>
    %13 = arith.subf %5, %12 : vector<128x256xf32>
    %14 = arith.mulf %13, %13 : vector<128x256xf32>
    %cst_11 = arith.constant dense<0.000000e+00> : vector<128xf32>
    %15 = vector.multi_reduction <add>, %14, %cst_11 [1] : vector<128x256xf32> to vector<128xf32>
    %16 = vector.shape_cast %15 : vector<128xf32> to vector<128x1xf32>
    %cst_12 = arith.constant 3.906250e-03 : f32
    %17 = vector.broadcast %cst_12 : f32 to vector<128x1xf32>
    %18 = arith.mulf %16, %17 : vector<128x1xf32>
    %cst_13 = arith.constant 9.99999974E-6 : f32
    %19 = vector.broadcast %cst_13 : f32 to vector<128x1xf32>
    %20 = arith.addf %18, %19 : vector<128x1xf32>
    %21 = math.rsqrt %20 : vector<128x1xf32>
    %22 = vector.broadcast %21 : vector<128x1xf32> to vector<128x256xf32>
    %23 = arith.mulf %13, %22 : vector<128x256xf32>
    %24 = vector.broadcast %6 : vector<1x256xf32> to vector<128x256xf32>
    %25 = arith.mulf %23, %24 : vector<128x256xf32>
    %26 = vector.broadcast %7 : vector<1x256xf32> to vector<128x256xf32>
    %27 = arith.addf %25, %26 : vector<128x256xf32>
    %cst_14 = arith.constant 0.000000e+00 : f32
    %28 = vector.broadcast %cst_14 : f32 to vector<128x256xf32>
    %29 = arith.maximumf %27, %28 : vector<128x256xf32>
    %30 = arith.truncf %29 : vector<128x256xf32> to vector<128x256xbf16>
    %c0_15 = arith.constant 0 : index
    %c0_16 = arith.constant 0 : index
    %31 = vector.load %arg6[%c0_15, %c0_16] : memref<256x128xbf16, #tpu.memory_space<vmem>>, vector<256x128xbf16>
    %cst_17 = arith.constant dense<0.000000e+00> : vector<128x128xf32>
    %32 = tpu.matmul %30, %31, %cst_17 {dimension_numbers = #tpu.dot_dimension_numbers<[1], [0], [0], [1], [0, 0, 1, 1], [], []>} : vector<128x256xbf16>, vector<256x128xbf16>, vector<128x128xf32> -> vector<128x128xf32>
    %c0_18 = arith.constant 0 : index
    %c0_19 = arith.constant 0 : index
    %33 = vector.load %arg7[%c0_18, %c0_19] : memref<1x128xf32, #tpu.memory_space<vmem>>, vector<1x128xf32>
    %34 = vector.broadcast %33 : vector<1x128xf32> to vector<128x128xf32>
    %35 = arith.addf %32, %34 : vector<128x128xf32>
    %c0_20 = arith.constant 0 : index
    %c0_21 = arith.constant 0 : index
    %36 = vector.load %arg8[%c0_20, %c0_21] : memref<1x128xf32, #tpu.memory_space<vmem>>, vector<1x128xf32>
    %c0_22 = arith.constant 0 : index
    %c0_23 = arith.constant 0 : index
    %37 = vector.load %arg9[%c0_22, %c0_23] : memref<1x128xf32, #tpu.memory_space<vmem>>, vector<1x128xf32>
    %cst_24 = arith.constant dense<0.000000e+00> : vector<128xf32>
    %38 = vector.multi_reduction <add>, %35, %cst_24 [1] : vector<128x128xf32> to vector<128xf32>
    %39 = vector.shape_cast %38 : vector<128xf32> to vector<128x1xf32>
    %cst_25 = arith.constant 7.812500e-03 : f32
    %40 = vector.broadcast %cst_25 : f32 to vector<128x1xf32>
    %41 = arith.mulf %39, %40 : vector<128x1xf32>
    %42 = vector.broadcast %41 : vector<128x1xf32> to vector<128x128xf32>
    %43 = arith.subf %35, %42 : vector<128x128xf32>
    %44 = arith.mulf %43, %43 : vector<128x128xf32>
    %cst_26 = arith.constant dense<0.000000e+00> : vector<128xf32>
    %45 = vector.multi_reduction <add>, %44, %cst_26 [1] : vector<128x128xf32> to vector<128xf32>
    %46 = vector.shape_cast %45 : vector<128xf32> to vector<128x1xf32>
    %cst_27 = arith.constant 7.812500e-03 : f32
    %47 = vector.broadcast %cst_27 : f32 to vector<128x1xf32>
    %48 = arith.mulf %46, %47 : vector<128x1xf32>
    %cst_28 = arith.constant 9.99999974E-6 : f32
    %49 = vector.broadcast %cst_28 : f32 to vector<128x1xf32>
    %50 = arith.addf %48, %49 : vector<128x1xf32>
    %51 = math.rsqrt %50 : vector<128x1xf32>
    %52 = vector.broadcast %51 : vector<128x1xf32> to vector<128x128xf32>
    %53 = arith.mulf %43, %52 : vector<128x128xf32>
    %54 = vector.broadcast %36 : vector<1x128xf32> to vector<128x128xf32>
    %55 = arith.mulf %53, %54 : vector<128x128xf32>
    %56 = vector.broadcast %37 : vector<1x128xf32> to vector<128x128xf32>
    %57 = arith.addf %55, %56 : vector<128x128xf32>
    %cst_29 = arith.constant 0.000000e+00 : f32
    %58 = vector.broadcast %cst_29 : f32 to vector<128x128xf32>
    %59 = arith.maximumf %57, %58 : vector<128x128xf32>
    %c0_30 = arith.constant 0 : index
    %c0_31 = arith.constant 0 : index
    %60 = vector.load %arg10[%c0_30, %c0_31] : memref<128x128xf32, #tpu.memory_space<vmem>>, vector<128x128xf32>
    tpu.vector_store %arg10[%c0_30, %c0_31], %59 {strides = array<i32>} : memref<128x128xf32, #tpu.memory_space<vmem>>, vector<128x128xf32>,
    return
  }
  func.func @transform_0(%arg0: i32) -> (i32, i32) {
    %c0_i32 = arith.constant 0 : i32
    %c0_i32_0 = arith.constant 0 : i32
    return %arg0, %c0_i32 : i32, i32
  }
  func.func @transform_1(%arg0: i32) -> (i32, i32) {
    %c0_i32 = arith.constant 0 : i32
    %c0_i32_0 = arith.constant 0 : i32
    %c0_i32_1 = arith.constant 0 : i32
    return %c0_i32, %c0_i32_0 : i32, i32
  }
  func.func @transform_2(%arg0: i32) -> (i32, i32) {
    %c0_i32 = arith.constant 0 : i32
    %c0_i32_0 = arith.constant 0 : i32
    %c0_i32_1 = arith.constant 0 : i32
    return %c0_i32, %c0_i32_0 : i32, i32
  }
  func.func @transform_3(%arg0: i32) -> (i32, i32) {
    %c0_i32 = arith.constant 0 : i32
    %c0_i32_0 = arith.constant 0 : i32
    %c0_i32_1 = arith.constant 0 : i32
    return %c0_i32, %c0_i32_0 : i32, i32
  }
  func.func @transform_4(%arg0: i32) -> (i32, i32) {
    %c0_i32 = arith.constant 0 : i32
    %c0_i32_0 = arith.constant 0 : i32
    %c0_i32_1 = arith.constant 0 : i32
    return %c0_i32, %c0_i32_0 : i32, i32
  }
  func.func @transform_5(%arg0: i32) -> (i32, i32) {
    %c0_i32 = arith.constant 0 : i32
    %c0_i32_0 = arith.constant 0 : i32
    %c0_i32_1 = arith.constant 0 : i32
    return %c0_i32, %c0_i32_0 : i32, i32
  }
  func.func @transform_6(%arg0: i32) -> (i32, i32) {
    %c0_i32 = arith.constant 0 : i32
    %c0_i32_0 = arith.constant 0 : i32
    %c0_i32_1 = arith.constant 0 : i32
    return %c0_i32, %c0_i32_0 : i32, i32
  }
  func.func @transform_7(%arg0: i32) -> (i32, i32) {
    %c0_i32 = arith.constant 0 : i32
    %c0_i32_0 = arith.constant 0 : i32
    %c0_i32_1 = arith.constant 0 : i32
    return %c0_i32, %c0_i32_0 : i32, i32
  }
  func.func @transform_8(%arg0: i32) -> (i32, i32) {
    %c0_i32 = arith.constant 0 : i32
    %c0_i32_0 = arith.constant 0 : i32
    %c0_i32_1 = arith.constant 0 : i32
    return %c0_i32, %c0_i32_0 : i32, i32
  }
  func.func @transform_9(%arg0: i32) -> (i32, i32) {
    %c0_i32 = arith.constant 0 : i32
    %c0_i32_0 = arith.constant 0 : i32
    return %arg0, %c0_i32 : i32, i32
  }
}

module attributes {stable_mosaic.version = 11 : i64} {
  func.func @_fused_mlp_kernel(%arg0: i32, %arg1: memref<128x128xbf16, #tpu.memory_space<vmem>>, %arg2: memref<128x256xbf16, #tpu.memory_space<vmem>>, %arg3: memref<1x256xf32, #tpu.memory_space<vmem>>, %arg4: memref<1x256xf32, #tpu.memory_space<vmem>>, %arg5: memref<1x256xf32, #tpu.memory_space<vmem>>, %arg6: memref<256x128xbf16, #tpu.memory_space<vmem>>, %arg7: memref<1x128xf32, #tpu.memory_space<vmem>>, %arg8: memref<1x128xf32, #tpu.memory_space<vmem>>, %arg9: memref<1x128xf32, #tpu.memory_space<vmem>>, %arg10: memref<128x128xf32, #tpu.memory_space<vmem>>) attributes {dimension_semantics = [#tpu.dimension_semantics<parallel>], iteration_bounds = array<i64: 2>, scalar_prefetch = 0 : i64, scratch_operands = 0 : i64, tpu.core_type = #tpu.core_type<tc>, window_params = [{transform_indices = @transform_0, window_bounds = array<i64: 128, 128>}, {pipeline_mode = #tpu.pipeline_mode<synchronous>, transform_indices = @transform_1, window_bounds = array<i64: 128, 256>}, {pipeline_mode = #tpu.pipeline_mode<synchronous>, transform_indices = @transform_2, window_bounds = array<i64: 1, 256>}, {pipeline_mode = #tpu.pipeline_mode<synchronous>, transform_indices = @transform_3, window_bounds = array<i64: 1, 256>}, {pipeline_mode = #tpu.pipeline_mode<synchronous>, transform_indices = @transform_4, window_bounds = array<i64: 1, 256>}, {pipeline_mode = #tpu.pipeline_mode<synchronous>, transform_indices = @transform_5, window_bounds = array<i64: 256, 128>}, {pipeline_mode = #tpu.pipeline_mode<synchronous>, transform_indices = @transform_6, window_bounds = array<i64: 1, 128>}, {pipeline_mode = #tpu.pipeline_mode<synchronous>, transform_indices = @transform_7, window_bounds = array<i64: 1, 128>}, {pipeline_mode = #tpu.pipeline_mode<synchronous>, transform_indices = @transform_8, window_bounds = array<i64: 1, 128>}, {transform_indices = @transform_9, window_bounds = array<i64: 128, 128>}]} {
    %c0 = arith.constant 0 : index
    %c0_0 = arith.constant 0 : index
    %0 = vector.load %arg1[%c0, %c0_0] : memref<128x128xbf16, #tpu.memory_space<vmem>>, vector<128x128xbf16>
    %c0_1 = arith.constant 0 : index
    %c0_2 = arith.constant 0 : index
    %1 = vector.load %arg2[%c0_1, %c0_2] : memref<128x256xbf16, #tpu.memory_space<vmem>>, vector<128x256xbf16>
    %cst = arith.constant dense<0.000000e+00> : vector<128x256xf32>
    %2 = tpu.matmul %0, %1, %cst {dimension_numbers = #tpu.dot_dimension_numbers<[1], [0], [0], [1], [0, 0, 1, 1], [], []>} : vector<128x128xbf16>, vector<128x256xbf16>, vector<128x256xf32> -> vector<128x256xf32>
    %c0_3 = arith.constant 0 : index
    %c0_4 = arith.constant 0 : index
    %3 = vector.load %arg3[%c0_3, %c0_4] : memref<1x256xf32, #tpu.memory_space<vmem>>, vector<1x256xf32>
    %4 = vector.broadcast %3 : vector<1x256xf32> to vector<128x256xf32>
    %5 = arith.addf %2, %4 : vector<128x256xf32>
    %c0_5 = arith.constant 0 : index
    %c0_6 = arith.constant 0 : index
    %6 = vector.load %arg4[%c0_5, %c0_6] : memref<1x256xf32, #tpu.memory_space<vmem>>, vector<1x256xf32>
    %c0_7 = arith.constant 0 : index
    %c0_8 = arith.constant 0 : index
    %7 = vector.load %arg5[%c0_7, %c0_8] : memref<1x256xf32, #tpu.memory_space<vmem>>, vector<1x256xf32>
    %cst_9 = arith.constant dense<0.000000e+00> : vector<128xf32>
    %8 = vector.multi_reduction <add>, %5, %cst_9 [1] : vector<128x256xf32> to vector<128xf32>
    %9 = vector.shape_cast %8 : vector<128xf32> to vector<128x1xf32>
    %cst_10 = arith.constant 3.906250e-03 : f32
    %10 = vector.broadcast %cst_10 : f32 to vector<128x1xf32>
    %11 = arith.mulf %9, %10 : vector<128x1xf32>
    %12 = vector.broadcast %11 : vector<128x1xf32> to vector<128x256xf32>
    %13 = arith.subf %5, %12 : vector<128x256xf32>
    %14 = arith.mulf %13, %13 : vector<128x256xf32>
    %cst_11 = arith.constant dense<0.000000e+00> : vector<128xf32>
    %15 = vector.multi_reduction <add>, %14, %cst_11 [1] : vector<128x256xf32> to vector<128xf32>
    %16 = vector.shape_cast %15 : vector<128xf32> to vector<128x1xf32>
    %cst_12 = arith.constant 3.906250e-03 : f32
    %17 = vector.broadcast %cst_12 : f32 to vector<128x1xf32>
    %18 = arith.mulf %16, %17 : vector<128x1xf32>
    %cst_13 = arith.constant 9.99999974E-6 : f32
    %19 = vector.broadcast %cst_13 : f32 to vector<128x1xf32>
    %20 = arith.addf %18, %19 : vector<128x1xf32>
    %21 = math.rsqrt %20 : vector<128x1xf32>
    %22 = vector.broadcast %21 : vector<128x1xf32> to vector<128x256xf32>
    %23 = arith.mulf %13, %22 : vector<128x256xf32>
    %24 = vector.broadcast %6 : vector<1x256xf32> to vector<128x256xf32>
    %25 = arith.mulf %23, %24 : vector<128x256xf32>
    %26 = vector.broadcast %7 : vector<1x256xf32> to vector<128x256xf32>
    %27 = arith.addf %25, %26 : vector<128x256xf32>
    %cst_14 = arith.constant 0.000000e+00 : f32
    %28 = vector.broadcast %cst_14 : f32 to vector<128x256xf32>
    %29 = arith.maximumf %27, %28 : vector<128x256xf32>
    %30 = arith.truncf %29 : vector<128x256xf32> to vector<128x256xbf16>
    %c0_15 = arith.constant 0 : index
    %c0_16 = arith.constant 0 : index
    %31 = vector.load %arg6[%c0_15, %c0_16] : memref<256x128xbf16, #tpu.memory_space<vmem>>, vector<256x128xbf16>
    %cst_17 = arith.constant dense<0.000000e+00> : vector<128x128xf32>
    %32 = tpu.matmul %30, %31, %cst_17 {dimension_numbers = #tpu.dot_dimension_numbers<[1], [0], [0], [1], [0, 0, 1, 1], [], []>} : vector<128x256xbf16>, vector<256x128xbf16>, vector<128x128xf32> -> vector<128x128xf32>
    %c0_18 = arith.constant 0 : index
    %c0_19 = arith.constant 0 : index
    %33 = vector.load %arg7[%c0_18, %c0_19] : memref<1x128xf32, #tpu.memory_space<vmem>>, vector<1x128xf32>
    %34 = vector.broadcast %33 : vector<1x128xf32> to vector<128x128xf32>
    %35 = arith.addf %32, %34 : vector<128x128xf32>
    %c0_20 = arith.constant 0 : index
    %c0_21 = arith.constant 0 : index
    %36 = vector.load %arg8[%c0_20, %c0_21] : memref<1x128xf32, #tpu.memory_space<vmem>>, vector<1x128xf32>
    %c0_22 = arith.constant 0 : index
    %c0_23 = arith.constant 0 : index
    %37 = vector.load %arg9[%c0_22, %c0_23] : memref<1x128xf32, #tpu.memory_space<vmem>>, vector<1x128xf32>
    %cst_24 = arith.constant dense<0.000000e+00> : vector<128xf32>
    %38 = vector.multi_reduction <add>, %35, %cst_24 [1] : vector<128x128xf32> to vector<128xf32>
    %39 = vector.shape_cast %38 : vector<128xf32> to vector<128x1xf32>
    %cst_25 = arith.constant 7.812500e-03 : f32
    %40 = vector.broadcast %cst_25 : f32 to vector<128x1xf32>
    %41 = arith.mulf %39, %40 : vector<128x1xf32>
    %42 = vector.broadcast %41 : vector<128x1xf32> to vector<128x128xf32>
    %43 = arith.subf %35, %42 : vector<128x128xf32>
    %44 = arith.mulf %43, %43 : vector<128x128xf32>
    %cst_26 = arith.constant dense<0.000000e+00> : vector<128xf32>
    %45 = vector.multi_reduction <add>, %44, %cst_26 [1] : vector<128x128xf32> to vector<128xf32>
    %46 = vector.shape_cast %45 : vector<128xf32> to vector<128x1xf32>
    %cst_27 = arith.constant 7.812500e-03 : f32
    %47 = vector.broadcast %cst_27 : f32 to vector<128x1xf32>
    %48 = arith.mulf %46, %47 : vector<128x1xf32>
    %cst_28 = arith.constant 9.99999974E-6 : f32
    %49 = vector.broadcast %cst_28 : f32 to vector<128x1xf32>
    %50 = arith.addf %48, %49 : vector<128x1xf32>
    %51 = math.rsqrt %50 : vector<128x1xf32>
    %52 = vector.broadcast %51 : vector<128x1xf32> to vector<128x128xf32>
    %53 = arith.mulf %43, %52 : vector<128x128xf32>
    %54 = vector.broadcast %36 : vector<1x128xf32> to vector<128x128xf32>
    %55 = arith.mulf %53, %54 : vector<128x128xf32>
    %56 = vector.broadcast %37 : vector<1x128xf32> to vector<128x128xf32>
    %57 = arith.addf %55, %56 : vector<128x128xf32>
    %cst_29 = arith.constant 0.000000e+00 : f32
    %58 = vector.broadcast %cst_29 : f32 to vector<128x128xf32>
    %59 = arith.maximumf %57, %58 : vector<128x128xf32>
    %c0_30 = arith.constant 0 : index
    %c0_31 = arith.constant 0 : index
    %60 = vector.load %arg10[%c0_30, %c0_31] : memref<128x128xf32, #tpu.memory_space<vmem>>, vector<128x128xf32>
    tpu.vector_store %arg10[%c0_30, %c0_31], %59 {strides = array<i32>} : memref<128x128xf32, #tpu.memory_space<vmem>>, vector<128x128xf32>,
    return
  }
  func.func @transform_0(%arg0: i32) -> (i32, i32) {
    %c0_i32 = arith.constant 0 : i32
    %c0_i32_0 = arith.constant 0 : i32
    return %arg0, %c0_i32 : i32, i32
  }
  func.func @transform_1(%arg0: i32) -> (i32, i32) {
    %c0_i32 = arith.constant 0 : i32
    %c0_i32_0 = arith.constant 0 : i32
    %c0_i32_1 = arith.constant 0 : i32
    return %c0_i32, %c0_i32_0 : i32, i32
  }
  func.func @transform_2(%arg0: i32) -> (i32, i32) {
    %c0_i32 = arith.constant 0 : i32
    %c0_i32_0 = arith.constant 0 : i32
    %c0_i32_1 = arith.constant 0 : i32
    return %c0_i32, %c0_i32_0 : i32, i32
  }
  func.func @transform_3(%arg0: i32) -> (i32, i32) {
    %c0_i32 = arith.constant 0 : i32
    %c0_i32_0 = arith.constant 0 : i32
    %c0_i32_1 = arith.constant 0 : i32
    return %c0_i32, %c0_i32_0 : i32, i32
  }
  func.func @transform_4(%arg0: i32) -> (i32, i32) {
    %c0_i32 = arith.constant 0 : i32
    %c0_i32_0 = arith.constant 0 : i32
    %c0_i32_1 = arith.constant 0 : i32
    return %c0_i32, %c0_i32_0 : i32, i32
  }
  func.func @transform_5(%arg0: i32) -> (i32, i32) {
    %c0_i32 = arith.constant 0 : i32
    %c0_i32_0 = arith.constant 0 : i32
    %c0_i32_1 = arith.constant 0 : i32
    return %c0_i32, %c0_i32_0 : i32, i32
  }
  func.func @transform_6(%arg0: i32) -> (i32, i32) {
    %c0_i32 = arith.constant 0 : i32
    %c0_i32_0 = arith.constant 0 : i32
    %c0_i32_1 = arith.constant 0 : i32
    return %c0_i32, %c0_i32_0 : i32, i32
  }
  func.func @transform_7(%arg0: i32) -> (i32, i32) {
    %c0_i32 = arith.constant 0 : i32
    %c0_i32_0 = arith.constant 0 : i32
    %c0_i32_1 = arith.constant 0 : i32
    return %c0_i32, %c0_i32_0 : i32, i32
  }
  func.func @transform_8(%arg0: i32) -> (i32, i32) {
    %c0_i32 = arith.constant 0 : i32
    %c0_i32_0 = arith.constant 0 : i32
    %c0_i32_1 = arith.constant 0 : i32
    return %c0_i32, %c0_i32_0 : i32, i32
  }
  func.func @transform_9(%arg0: i32) -> (i32, i32) {
    %c0_i32 = arith.constant 0 : i32
    %c0_i32_0 = arith.constant 0 : i32
    return %arg0, %c0_i32 : i32, i32
  }
}

</mosaic_0001>

<bundles_post_ra>
// kernel: tpu_custom_call.1
= control target key start
LH: loop header
LB: loop body
LE: loop exit
PB: predicated region body
PF: predicated region fallthrough
CT: control target
= control target key end

     0   :  { %s3022_s0 = inlined_call_operand.hbm [shape: bf16[256,128], index: 0, kind: input, shape index: {}]   ;;  %s3023_s1 = inlined_call_operand.hbm [shape: bf16[128,256], index: 1, kind: input, shape index: {}]   ;;  %s3024_s2 = inlined_call_operand.vmem [shape: f32[1,256], index: 2, kind: input, shape index: {}]   ;;  %s3025_s3 = inlined_call_operand.vmem [shape: f32[1,256], index: 3, kind: input, shape index: {}]   ;;  %s3026_s4 = inlined_call_operand.vmem [shape: f32[1,256], index: 4, kind: input, shape index: {}]   ;;  %s3027_s5 = inlined_call_operand.hbm [shape: bf16[256,128], index: 5, kind: input, shape index: {}]   ;;  %s3028_s6 = inlined_call_operand.vmem [shape: f32[1,128], index: 6, kind: input, shape index: {}]   ;;  %s3029_s7 = inlined_call_operand.vmem [shape: f32[1,128], index: 7, kind: input, shape index: {}]   ;;  %s3030_s8 = inlined_call_operand.vmem [shape: f32[1,128], index: 8, kind: input, shape index: {}]   ;;  %s3031_s9 = inlined_call_operand.hbm [shape: f32[256,128], index: 9, kind: output, shape index: {}]  }
   0x1   :  { %3038 = sst [smem:[#allocation13_spill]] %s3023_s1 }
   0x2   :  { %3039 = sst [smem:[#allocation14_spill]] %s3027_s5 }
   0x3   :  { %14 = vsyncpa [#allocation3], 0 }
   0x4   :  { %16 = vsyncpa [#allocation3 + $0x1], 0 }
   0x5   :  { %17 = vsyncpa [#allocation6], 0 }
   0x6   :  { %18 = vsyncpa [#allocation4], 0 }
   0x7   :  { %20 = vsyncpa [#allocation4 + $0x1], 0  ;;  %s2176_s30 = smov 0   ;;  %s2178_s10 = smov 0  }
   0x8   :  { %s2180_s11 = smov 0   ;;  %s2182_s12 = smov 0  }
   0x9 LB: > { %s2197_s13 = sadd.s32 4294967295, %s2113_s12   ;;  %s1652_s14 = sadd.s32 4294967294, %s2113_s12   ;;  %s2113_s12 = sphi %s2182_s12, %s3063_s12   ;;  %s2109_s11 = sphi %s2180_s11, %s3062_s11   ;;  %s2105_s10 = sphi %s2178_s10, %s3061_s10   ;;  %s2101_s30 = sphi %s2176_s30, %s3060_s30  }
   0xa   : > { %p46_p0 = scmp.ne.s32.totalorder %s2105_s10, %s2101_s30  ;;  %p3032_p1 = scmp.eq.s32.totalorder %s2197_s13, 0 }
   0xb   : > { %p244_p3 = scmp.eq.s32.totalorder %s1652_s14, 1  ;;  %p1653_p5 = scmp.ge.s32.totalorder %s2113_s12, 1 }
   0xc   : > { %p2206_p4 = por %p3032_p1, %p46_p0  ;;  %p251_p7 = scmp.lt.s32.totalorder %s2113_s12, 3 }
   0xd   : > { %p2211_p6 = por %p244_p3, %p46_p0  ;;  %s2115_s18 = smov [#allocation5]  }
   0xe   : > { %s3040_s15 = scalar_select %p2206_p4, 1, 0 }
   0xf   : > { %s3041_s16 = scalar_select %p2211_p6, 1, 0 }
  0x10   : > { %p2216_p8 = pnand %p1653_p5, %p251_p7  ;;  %s263_s19 = sshll.u32 %s2115_s18, 4  ;;  %s264_s19 = int_to_ptr.vmem [resolvable:$true] %s263_s19 }
  0x11   : > { %s2116_s21 = smov [#allocation7]   ;;  %s1976_s23 = scalar_lea.vmem %s264_s19, 2048 }
  0x12   : > { %s3042_s17 = scalar_select %p2216_p8, 1, 0 }
  0x13   : > { %p1791_p9 = pneg %p2216_p8  ;;  %s285_s22 = sshll.u32 %s2116_s21, 4  ;;  %s286_s22 = int_to_ptr.vmem [resolvable:$true] %s285_s22 }
  0x14   : > { %p1977_p13 = scmp.ne.s32.totalorder %s264_s19, %s1976_s23  ;;  %p1984_p5 = scmp.lt.s32.totalorder %s264_s19, %s264_s19 }
  0x15   : > { %p2225_p11 = pnand %p1791_p9, %p3032_p1  ;;  %p1985_p7 = scmp.lt.s32.totalorder %s1976_s23, %s1976_s23 }
  0x17   : > { %p1967_p12 = pneg %p2225_p11  ;;  %p1986_p10 = por %p1985_p7, %p1984_p5 }
  0x19   : > { %p1979_p0 = pnand %p1977_p13, %p1967_p12 }
  0x1b   : > { %p1980_p3 = pneg %p1979_p0 }
  0x1d   : > { %p1987_p9 = pnand %p1986_p10, %p1980_p3 }
  0x1f   : > { %1990 = shalt.err (!%p1987_p9)
}
  0x20   : > { %s2117_s24 = smov 128   ;;  %s2118_s25 = smov 8  }
  0x21   : > { %s3044_s1 = sld [smem:[#allocation13_spill]]  ;;  %s2002_s28 = scalar_lea.vmem %s286_s22, 2048 }
  0x22   : > { %p2003_p1 = scmp.ne.s32.totalorder %s286_s22, %s2002_s28  ;;  %p2010_p2 = scmp.lt.s32.totalorder %s286_s22, %s286_s22 }
  0x23   : > { %p2011_p6 = scmp.lt.s32.totalorder %s2002_s28, %s2002_s28 }
  0x24   : > { %p2005_p13 = pnand %p2003_p1, %p1967_p12 }
  0x25   : > { %p2012_p5 = por %p2011_p6, %p2010_p2 }
  0x26   : > { %p2006_p0 = pneg %p2005_p13 }
  0x27   : > { %1794 = dma.hbm_to_vmem [thread:$0]  (!%p2225_p11), %s3044_s1, 2048, %s264_s19, [#allocation6], %s2117_s24, %s2117_s24, %s2118_s25  }
  0x28   : > { %p2013_p10 = pnand %p2012_p5, %p2006_p0 }
  0x2a   : > { %2016 = shalt.err (!%p2013_p10)
}
  0x2b   : > { %s3033_s29 = smov 64   ;;  %s3034_s14 = smov 4  }
  0x2c   : > { %s3045_s5 = sld [smem:[#allocation14_spill]]  ;;  %s2251_s21 = sadd.s32 1, %s2113_s12  }
  0x2d   : > { %s30_s23 = ssub.s32 %s2113_s12, %s2251_s21  ;;  %s33_s24 = sadd.s32 1, %s2109_s11 }
  0x2e   : > { %p31_p1 = scmp.eq.s32.totalorder %s30_s23, 0  ;;  %p40_p2 = scmp.ne.s32.totalorder %s2109_s11, %s2105_s10 }
  0x2f   : > { %p41_p6 = scmp.eq.s32.totalorder %s2113_s12, 0  ;;  %p3047_p3 = scmp.eq.s32.totalorder %s2197_s13, 1 }
  0x30   : > { %s2260_s25 = scalar_select %p31_p1, %s2109_s11, %s33_s24  }
  0x31   : > { %p42_p12 = por %p41_p6, %p40_p2  ;;  %p2264_p7 = por %p3047_p3, %p40_p2 }
  0x32   : > { %1797 = dma.hbm_to_vmem [thread:$0]  (!%p2225_p11), %s3045_s5, 2048, %s286_s22, [#allocation6], %s3033_s29, %s3033_s29, %s3034_s14  }
  0x33   : > { %3046 = sst [smem:[#allocation12_spill]] %s2260_s25  ;;  %p1808_p9 = scmp.lt.s32.totalorder %s2113_s12, 2 }
  0x34   : > { %s3048_s20 = scalar_select %p2264_p7, 1, 0 }
  0x35   : > { %s308_s26 = sand.u32 1, %s2109_s11   ;;  %s1713_s22 = sshll.u32 %s2113_s12, 10 }
  0x36   : > { %s1657_s27 = sshll.u32 %s308_s26, 6  ;;  %s2274_s19 = scalar_lea.hbm %s3022_s0, %s1713_s22 }
  0x37   : > { %s312_s23 = scalar_lea.vmem [#allocation2], %s1657_s27  ;;  %p2278_p11 = pnand %p1808_p9, %p42_p12 }
  0x38   : > { %s319_s24 = sshll.u32 %s312_s23, 4  ;;  %s2282_s14 = scalar_lea.sflag [#allocation3], %s308_s26  ;;  %s2276_s24 = int_to_ptr.vmem [resolvable:$true] %s319_s24 }
  0x39   : > { %s2017_s1 = scalar_lea.hbm %s2274_s19, 1024  ;;  %p2019_p0 = pneg %p2278_p11 }
  0x3a   : > { %p2018_p13 = scmp.ne.s32.totalorder %s2274_s19, %s2017_s1  ;;  %s2022_s27 = scalar_lea.hbm %s3022_s0, 2048 }
  0x3b   : > { %p2023_p1 = scmp.lt.s32.totalorder %s2274_s19, %s3022_s0  ;;  %p2024_p2 = scmp.lt.s32.totalorder %s2022_s27, %s2017_s1 }
  0x3c   : > { %p2020_p5 = pnand %p2019_p0, %p2018_p13 }
  0x3d   : > { %p2025_p6 = por %p2024_p2, %p2023_p1 }
  0x3e   : > { %p2021_p10 = pneg %p2020_p5 }
  0x40   : > { %p2026_p12 = pnand %p2025_p6, %p2021_p10 }
  0x42   : > { %2029 = shalt.err (!%p2026_p12)
}
  0x43   : > { %s2030_s26 = scalar_lea.vmem %s2276_s24, 1024  ;;  %s2121_s5 = smov [#allocation2]  }
  0x44   : > { %p2031_p3 = scmp.ne.s32.totalorder %s2276_s24, %s2030_s26  ;;  %s2035_s25 = sshll.u32 %s2121_s5, 4  ;;  %s2036_s25 = int_to_ptr.vmem [resolvable:$false] %s2035_s25 }
  0x45   : > { %s2037_s22 = scalar_lea.vmem %s2036_s25, 2048  ;;  %p2038_p5 = scmp.lt.s32.totalorder %s2276_s24, %s2036_s25 }
  0x46   : > { %p2033_p9 = pnand %p2031_p3, %p2019_p0  ;;  %p2039_p7 = scmp.lt.s32.totalorder %s2037_s22, %s2030_s26 }
  0x48   : > { %p2034_p13 = pneg %p2033_p9  ;;  %p2040_p4 = por %p2039_p7, %p2038_p5 }
  0x4a   : > { %p2041_p8 = pnand %p2040_p4, %p2034_p13 }
  0x4c   : > { %2044 = shalt.err (!%p2041_p8)
}
  0x4d   : > { %s3050_s1 = smov 4   ;;  %s3051_s28 = smov 64  }
  0x4e   : > { %1801 = dma.hbm_to_vmem [thread:$0]  (!%p2278_p11), %s2274_s19, 1024, %s2276_s24, %s2282_s14, %s3051_s28, %s3051_s28, %s3050_s1  }
  0x4f   : > { %p3052_p0 = scmp.ne.s32.totalorder %s3042_s17, 0 }
  0x50   : > { %s2309_s5 = sand.u32 (!%p3052_p0), 1, %s2105_s10   ;;  %p3053_p4 = scmp.ne.s32.totalorder (!%p3052_p0), %s3040_s15, 0 }
  0x51   : > { %331 = sbr.rel (%p3052_p0) target bundleno = 1220 (0x4c4), region = 56  ;;  %s1661_s25 = sshll.u32 (!%p3052_p0), %s2309_s5, 6 }
  0x52   : > { %s334_s27 = scalar_lea.sflag (!%p3052_p0), [#allocation3], %s2309_s5  ;;  %s2313_s18 = scalar_lea.vmem (!%p3052_p0), [#allocation2], %s1661_s25 }
  0x56   : > { %2088 = dma.done.wait (%p3053_p4), %s334_s27, 1024  }
  0x57   : > { %2090 = vsyncadd (%p3053_p4), %s334_s27, 4294966272  ;;  %p3054_p8 = scmp.eq.s32.totalorder %s2197_s13, 0 }
  0x59   : > { %2092 = dma.done.wait (%p3054_p8), [#allocation6], 4096   ;;  %p3055_p7 = pmov %p3054_p8 }
  0x5a   : > { %v2122_v0 = vmov 0   ;;  %v1853_v1 = vld [vmem:[#allocation5 + $0x74] ss:$8 sps:$4 sm:$0xff]   ;;  %v1855_v2 = vld [vmem:[#allocation5 + $0x70] ss:$8 sps:$4 sm:$0xff]   ;;  %v1877_v17 = vld [vmem:[%s2313_s18] sm:$0xff]   ;;  %v417_v25 = vlaneseq }
  0x5b   : > { %2094 = vsyncadd (%p3055_p7), [#allocation6], 4294963200  ;;  %587 = vmatprep.mubr.bf16.mxu0 %v2122_v0  ;;  %555 = vmatprep.subr.bf16.mxu0 %v1853_v1  ;;  %v1856_v3 = vld [vmem:[#allocation5 + $0x64] ss:$8 sps:$4 sm:$0xff]   ;;  %v1858_v4 = vld [vmem:[#allocation5 + $0x60] ss:$8 sps:$4 sm:$0xff]  }
  0x5c   : > { %556 = vmatpush1.bf16.msra.mxu0 %v1855_v2  ;;  %v1859_v5 = vld [vmem:[#allocation5 + $0x54] ss:$8 sps:$4 sm:$0xff]   ;;  %v1861_v6 = vld [vmem:[#allocation5 + $0x50] ss:$8 sps:$4 sm:$0xff]   ;;  %v1862_v7 = vld [vmem:[#allocation5 + $0x44] ss:$8 sps:$4 sm:$0xff]  }
  0x5d   : > { %557 = vmatprep.subr.bf16.mxu0 %v1856_v3  ;;  %v1864_v8 = vld [vmem:[#allocation5 + $0x40] ss:$8 sps:$4 sm:$0xff]   ;;  %v1865_v9 = vld [vmem:[#allocation5 + $0x34] ss:$8 sps:$4 sm:$0xff]   ;;  %v1867_v10 = vld [vmem:[#allocation5 + $0x30] ss:$8 sps:$4 sm:$0xff]  }
  0x5e   : > { %v1868_v11 = vld [vmem:[#allocation5 + $0x24] ss:$8 sps:$4 sm:$0xff]   ;;  %v1870_v12 = vld [vmem:[#allocation5 + $0x20] ss:$8 sps:$4 sm:$0xff]   ;;  %v1871_v13 = vld [vmem:[#allocation5 + $0x14] ss:$8 sps:$4 sm:$0xff]  }
  0x5f   : > { %v1873_v14 = vld [vmem:[#allocation5 + $0x10] ss:$8 sps:$4 sm:$0xff]   ;;  %v1874_v15 = vld [vmem:[#allocation5 + $0x4] ss:$8 sps:$4 sm:$0xff]   ;;  %v1876_v16 = vld [vmem:[#allocation5] ss:$8 sps:$4 sm:$0xff]  }
  0x60   : > { %558 = vmatpush1.bf16.msra.mxu0 %v1858_v4  ;;  %v1878_v18 = vld [vmem:[%s2313_s18 + $0x8] sm:$0xff]   ;;  %v1879_v19 = vld [vmem:[%s2313_s18 + $0x10] sm:$0xff]   ;;  %v1880_v20 = vld [vmem:[%s2313_s18 + $0x18] sm:$0xff]   ;;  %v418_v26 = vshrl.u32 %v417_v25, 7  ;;  %s1664_s27 = sshll.u32 %s2309_s5, 7  ;;  %s1714_s15 = sshll.u32 %s2197_s13, 11 }
  0x61   : > { %559 = vmatprep.subr.bf16.mxu0 %v1859_v5  ;;  %v1881_v21 = vld [vmem:[%s2313_s18 + $0x20] sm:$0xff]   ;;  %v1882_v22 = vld [vmem:[%s2313_s18 + $0x28] sm:$0xff]   ;;  %v1883_v23 = vld [vmem:[%s2313_s18 + $0x30] sm:$0xff]   ;;  %s2976_s19 = scalar_lea.hbm %s3031_s9, %s1714_s15  ;;  %s1547_s24 = scalar_lea.sflag [#allocation4], %s2309_s5 }
  0x62   : > { %v1884_v24 = vld [vmem:[%s2313_s18 + $0x38] sm:$0xff]   ;;  %v2331_v27 = vsub.s32 0, %v418_v26  ;;  %v2333_v28 = vsub.s32 1, %v418_v26  ;;  %v415_v29 = vld [vmem:[%s3024_s2] sm:$0x3]  ;;  %s2911_s18 = scalar_lea.vmem [#allocation8], %s1664_s27 }
  0x63   : > { %s1560_s17 = sshll.u32 %s2911_s18, 4  ;;  %p3056_p10 = scmp.ne.s32.totalorder %s3048_s20, 0  ;;  %s2978_s17 = int_to_ptr.vmem [resolvable:$true] %s1560_s17 }
  0x64   : > { %560 = vmatpush1.bf16.msra.mxu0 %v1861_v6  ;;  %v2339_v30 = vrot.slane %v415_v29, %v2331_v27  ;;  %v2342_v31 = vrot.slane %v415_v29, %v2333_v28  ;;  %s2045_s23 = scalar_lea.vmem %s2978_s17, 2048  ;;  %s2123_s13 = smov [#allocation8]  }
  0x65   : > { %561 = vmatprep.subr.bf16.mxu0 %v1862_v7  ;;  %p2046_p11 = scmp.ne.s32.totalorder %s2978_s17, %s2045_s23  ;;  %s2049_s26 = sshll.u32 %s2123_s13, 4  ;;  %s2050_s26 = int_to_ptr.vmem [resolvable:$false] %s2049_s26 }
  0x66   : > { %s2051_s22 = scalar_lea.vmem %s2050_s26, 4096  ;;  %p2052_p6 = scmp.lt.s32.totalorder %s2978_s17, %s2050_s26 }
  0x67   : > { %p2047_p1 = pnand %p2046_p11, %p3056_p10  ;;  %p2053_p12 = scmp.lt.s32.totalorder %s2051_s22, %s2045_s23 }
  0x68   : > { %562 = vmatpush1.bf16.msra.mxu0 %v1864_v8 }
  0x69   : > { %563 = vmatprep.subr.bf16.mxu0 %v1865_v9  ;;  %p2048_p2 = pneg %p2047_p1  ;;  %p2054_p3 = por %p2053_p12, %p2052_p6 }
  0x6b   : > { %p2055_p9 = pnand %p2054_p3, %p2048_p2 }
  0x6c   : > { %564 = vmatpush1.bf16.msra.mxu0 %v1867_v10 }
  0x6d   : > { %565 = vmatprep.subr.bf16.mxu0 %v1868_v11 }
  0x70   : > { %566 = vmatpush1.bf16.msra.mxu0 %v1870_v12 }
  0x71   : > { %567 = vmatprep.subr.bf16.mxu0 %v1871_v13 }
  0x74   : > { %568 = vmatpush1.bf16.msra.mxu0 %v1873_v14 }
  0x75   : > { %569 = vmatprep.subr.bf16.mxu0 %v1874_v15 }
  0x78   : > { %570 = vmatpush1.bf16.msra.mxu0 %v1876_v16 }
  0x7b   : > { %588 = vmatmul.mubr.bf16.vlgmr.msra.gmra.mxu0 %v1877_v17 }
  0x7c   : > { %597 = vmatprep.mubr.bf16.mxu0 %v2122_v0 }
  0x83   : > { %598 = vmatmul.mubr.bf16.gmra.mxu0 %v1878_v18 }
  0x84   : > { %607 = vmatprep.mubr.bf16.mxu0 %v2122_v0 }
  0x8b   : > { %608 = vmatmul.mubr.bf16.gmra.mxu0 %v1879_v19 }
  0x8c   : > { %617 = vmatprep.mubr.bf16.mxu0 %v2122_v0 }
  0x93   : > { %618 = vmatmul.mubr.bf16.gmra.mxu0 %v1880_v20 }
  0x94   : > { %627 = vmatprep.mubr.bf16.mxu0 %v2122_v0 }
  0x9b   : > { %628 = vmatmul.mubr.bf16.gmra.mxu0 %v1881_v21 }
  0x9c   : > { %637 = vmatprep.mubr.bf16.mxu0 %v2122_v0 }
  0xa3   : > { %638 = vmatmul.mubr.bf16.gmra.mxu0 %v1882_v22 }
  0xa4   : > { %647 = vmatprep.mubr.bf16.mxu0 %v2122_v0 }
  0xab   : > { %648 = vmatmul.mubr.bf16.gmra.mxu0 %v1883_v23 }
  0xac   : > { %657 = vmatprep.mubr.bf16.mxu0 %v2122_v0 }
  0xb3   : > { %658 = vmatmul.mubr.bf16.gmra.mxu0 %v1884_v24 }
 0x13b   : > { %v589_v32 = vpop.f32.mrf.mxu0 }
 0x13c   : > { %v2345_v34 = vadd.f32 %v589_v32, %v2339_v30 }
 0x13d   : > { %v591_v33 = vpop.f32.mrf.mxu0 }
 0x13e   : > { %v2348_v35 = vadd.f32 %v591_v33, %v2342_v31 }
 0x13f   : > { %v593_v36 = vpop.f32.mrf.mxu0 }
 0x140   : > { %v670_v37 = vadd.f32 %v2348_v35, %v2345_v34  ;;  %v2353_v39 = vadd.f32 %v593_v36, %v2339_v30 }
 0x141   : > { %v595_v38 = vpop.f32.mrf.mxu0 }
 0x142   : > { %v2356_v40 = vadd.f32 %v595_v38, %v2342_v31  ;;  %671 = vadd.xlane.f32.xlu0 %v670_v37 }
 0x143   : > { %v599_v41 = vpop.f32.mrf.mxu0 }
 0x144   : > { %v673_v42 = vadd.f32 %v2356_v40, %v2353_v39  ;;  %v2361_v44 = vadd.f32 %v599_v41, %v2339_v30 }
 0x145   : > { %v601_v43 = vpop.f32.mrf.mxu0 }
 0x146   : > { %v2364_v45 = vadd.f32 %v601_v43, %v2342_v31  ;;  %674 = vadd.xlane.f32.xlu0 %v673_v42 }
 0x147   : > { %v603_v46 = vpop.f32.mrf.mxu0 }
 0x148   : > { %v676_v47 = vadd.f32 %v2364_v45, %v2361_v44  ;;  %v2369_v49 = vadd.f32 %v603_v46, %v2339_v30 }
 0x149   : > { %v605_v48 = vpop.f32.mrf.mxu0 }
 0x14a   : > { %v2372_v50 = vadd.f32 %v605_v48, %v2342_v31  ;;  %677 = vadd.xlane.f32.xlu1 %v676_v47 }
 0x14b   : > { %v609_v51 = vpop.f32.mrf.mxu0 }
 0x14c   : > { %v679_v52 = vadd.f32 %v2372_v50, %v2369_v49  ;;  %v2377_v54 = vadd.f32 %v609_v51, %v2339_v30 }
 0x14d   : > { %v611_v53 = vpop.f32.mrf.mxu0 }
 0x14e   : > { %v2380_v55 = vadd.f32 %v611_v53, %v2342_v31  ;;  %680 = vadd.xlane.f32.xlu1 %v679_v52 }
 0x14f   : > { %v613_v56 = vpop.f32.mrf.mxu0 }
 0x150   : > { %v682_v57 = vadd.f32 %v2380_v55, %v2377_v54  ;;  %v2385_v59 = vadd.f32 %v613_v56, %v2339_v30 }
 0x151   : > { %v615_v58 = vpop.f32.mrf.mxu0 }
 0x152   : > { %v2388_v60 = vadd.f32 %v615_v58, %v2342_v31  ;;  %683 = vadd.xlane.f32.xlu0 %v682_v57 }
 0x153   : > { %v619_v61 = vpop.f32.mrf.mxu0 }
 0x154   : > { %v685_v62 = vadd.f32 %v2388_v60, %v2385_v59  ;;  %v2393_v0 = vadd.f32 %v619_v61, %v2339_v30 }
 0x155   : > { %v621_v63 = vpop.f32.mrf.mxu0 }
 0x156   : > { %v2396_v1 = vadd.f32 %v621_v63, %v2342_v31  ;;  %686 = vadd.xlane.f32.xlu1 %v685_v62 }
 0x157   : > { %v623_v2 = vpop.f32.mrf.mxu0 }
 0x158   : > { %v688_v3 = vadd.f32 %v2396_v1, %v2393_v0  ;;  %v2401_v5 = vadd.f32 %v623_v2, %v2339_v30 }
 0x159   : > { %v625_v4 = vpop.f32.mrf.mxu0 }
 0x15a   : > { %v2404_v6 = vadd.f32 %v625_v4, %v2342_v31  ;;  %689 = vadd.xlane.f32.xlu0 %v688_v3 }
 0x15b   : > { %v629_v7 = vpop.f32.mrf.mxu0 }
 0x15c   : > { %v691_v8 = vadd.f32 %v2404_v6, %v2401_v5  ;;  %v2409_v10 = vadd.f32 %v629_v7, %v2339_v30 }
 0x15d   : > { %v631_v9 = vpop.f32.mrf.mxu0 }
 0x15e   : > { %v2412_v11 = vadd.f32 %v631_v9, %v2342_v31  ;;  %692 = vadd.xlane.f32.xlu1 %v691_v8 }
 0x15f   : > { %v633_v12 = vpop.f32.mrf.mxu0 }
 0x160   : > { %v694_v13 = vadd.f32 %v2412_v11, %v2409_v10  ;;  %v2417_v15 = vadd.f32 %v633_v12, %v2339_v30 }
 0x161   : > { %v635_v14 = vpop.f32.mrf.mxu0 }
 0x162   : > { %v2420_v16 = vadd.f32 %v635_v14, %v2342_v31  ;;  %695 = vadd.xlane.f32.xlu0 %v694_v13 }
 0x163   : > { %v639_v17 = vpop.f32.mrf.mxu0 }
 0x164   : > { %v697_v18 = vadd.f32 %v2420_v16, %v2417_v15  ;;  %v2425_v20 = vadd.f32 %v639_v17, %v2339_v30 }
 0x165   : > { %v641_v19 = vpop.f32.mrf.mxu0 }
 0x166   : > { %v2428_v21 = vadd.f32 %v641_v19, %v2342_v31  ;;  %698 = vadd.xlane.f32.xlu1 %v697_v18 }
 0x167   : > { %v643_v22 = vpop.f32.mrf.mxu0 }
 0x168   : > { %v700_v23 = vadd.f32 %v2428_v21, %v2425_v20  ;;  %v2433_v25 = vadd.f32 %v643_v22, %v2339_v30 }
 0x169   : > { %v645_v24 = vpop.f32.mrf.mxu0 }
 0x16a   : > { %v2436_v26 = vadd.f32 %v645_v24, %v2342_v31  ;;  %701 = vadd.xlane.f32.xlu0 %v700_v23 }
 0x16b   : > { %v649_v29 = vpop.f32.mrf.mxu0 }
 0x16c   : > { %v703_v32 = vadd.f32 %v2436_v26, %v2433_v25  ;;  %v2441_v36 = vadd.f32 %v649_v29, %v2339_v30 }
 0x16d   : > { %v651_v33 = vpop.f32.mrf.mxu0 }
 0x16e   : > { %v2444_v37 = vadd.f32 %v651_v33, %v2342_v31  ;;  %704 = vadd.xlane.f32.xlu1 %v703_v32 }
 0x16f   : > { %v653_v38 = vpop.f32.mrf.mxu0 }
 0x170   : > { %v706_v41 = vadd.f32 %v2444_v37, %v2441_v36  ;;  %v2449_v43 = vadd.f32 %v653_v38, %v2339_v30 }
 0x171   : > { %v655_v42 = vpop.f32.mrf.mxu0 }
 0x172   : > { %v2452_v46 = vadd.f32 %v655_v42, %v2342_v31  ;;  %707 = vadd.xlane.f32.xlu0 %v706_v41 }
 0x173   : > { %v659_v47 = vpop.f32.mrf.mxu0 }
 0x174   : > { %v709_v48 = vadd.f32 %v2452_v46, %v2449_v43  ;;  %v2457_v52 = vadd.f32 %v659_v47, %v2339_v30  ;;  %v1885_v47 = vld [vmem:[#allocation7 + $0x78] sm:$0xff]  }
 0x175   : > { %v661_v51 = vpop.f32.mrf.mxu0  ;;  %1715 = vmatprep.subr.bf16.mxu1 %v1885_v47  ;;  %v1893_v47 = vld [vmem:[#allocation7 + $0x58] sm:$0xff]  }
 0x176   : > { %v2460_v53 = vadd.f32 %v661_v51, %v2342_v31  ;;  %710 = vadd.xlane.f32.xlu1 %v709_v48 }
 0x177   : > { %v663_v56 = vpop.f32.mrf.mxu0 }
 0x178   : > { %v712_v57 = vadd.f32 %v2460_v53, %v2457_v52  ;;  %v2465_v61 = vadd.f32 %v663_v56, %v2339_v30 }
 0x179   : > { %v665_v58 = vpop.f32.mrf.mxu0 }
 0x17a   : > { %v2468_v62 = vadd.f32 %v665_v58, %v2342_v31  ;;  %713 = vadd.xlane.f32.xlu0 %v712_v57 }
 0x17c   : > { %v715_v63 = vadd.f32 %v2468_v62, %v2465_v61 }
 0x17e   : > { %716 = vadd.xlane.f32.xlu1 %v715_v63 }
 0x1cb   : > { %v672_v2 = vpop.xlane.xlu0 %671 }
 0x1cc   : > { %v718_v3 = vmul.f32 0.00390625, %v672_v2  ;;  %v1887_v2 = vld [vmem:[#allocation7 + $0x70] sm:$0xff]  }
 0x1ce   : > { %v2473_v4 = vsub.f32 %v2345_v34, %v718_v3  ;;  %v2476_v7 = vsub.f32 %v2348_v35, %v718_v3 }
 0x1cf   : > { %v675_v8 = vpop.xlane.xlu0 %674 }
 0x1d0   : > { %v719_v9 = vmul.f32 0.00390625, %v675_v8  ;;  %v766_v30 = vmul.f32 %v2473_v4, %v2473_v4  ;;  %v767_v31 = vmul.f32 %v2476_v7, %v2476_v7  ;;  %v1888_v8 = vld [vmem:[#allocation7 + $0x30] sm:$0xff]  }
 0x1d2   : > { %v2483_v12 = vsub.f32 %v2353_v39, %v719_v9  ;;  %v2486_v13 = vsub.f32 %v2356_v40, %v719_v9  ;;  %v798_v14 = vadd.f32 %v767_v31, %v766_v30 }
 0x1d3   : > { %v678_v34 = vpop.xlane.xlu1 %677 }
 0x1d4   : > { %v720_v17 = vmul.f32 0.00390625, %v678_v34  ;;  %799 = vadd.xlane.f32.xlu0 %v798_v14  ;;  %v768_v35 = vmul.f32 %v2483_v12, %v2483_v12  ;;  %v769_v18 = vmul.f32 %v2486_v13, %v2486_v13  ;;  %v1889_v34 = vld [vmem:[#allocation7 + $0x68] sm:$0xff]  }
 0x1d6   : > { %v2493_v19 = vsub.f32 %v2361_v44, %v720_v17  ;;  %v2496_v22 = vsub.f32 %v2364_v45, %v720_v17  ;;  %v801_v39 = vadd.f32 %v769_v18, %v768_v35  ;;  %v1890_v35 = vld [vmem:[#allocation7 + $0x28] sm:$0xff]  }
 0x1d7   : > { %v681_v23 = vpop.xlane.xlu1 %680 }
 0x1d8   : > { %v721_v40 = vmul.f32 0.00390625, %v681_v23  ;;  %802 = vadd.xlane.f32.xlu1 %v801_v39  ;;  %v770_v24 = vmul.f32 %v2493_v19, %v2493_v19  ;;  %v771_v29 = vmul.f32 %v2496_v22, %v2496_v22 }
 0x1da   : > { %v2503_v32 = vsub.f32 %v2369_v49, %v721_v40  ;;  %v2506_v33 = vsub.f32 %v2372_v50, %v721_v40  ;;  %v804_v44 = vadd.f32 %v771_v29, %v770_v24  ;;  %v1886_v50 = vld [vmem:[#allocation7 + $0x38] sm:$0xff]   ;;  %v1891_v24 = vld [vmem:[#allocation7 + $0x60] sm:$0xff]  }
 0x1db   : > { %v684_v38 = vpop.xlane.xlu0 %683  ;;  %1716 = vmatpush3.bf16.msra.mxu1 %v1886_v50  ;;  %v1894_v50 = vld [vmem:[#allocation7 + $0x18] sm:$0xff]  }
 0x1dc   : > { %v722_v45 = vmul.f32 0.00390625, %v684_v38  ;;  %805 = vadd.xlane.f32.xlu0 %v804_v44  ;;  %v772_v41 = vmul.f32 %v2503_v32, %v2503_v32  ;;  %v773_v42 = vmul.f32 %v2506_v33, %v2506_v33  ;;  %1717 = vmatprep.subr.bf16.mxu1 %v1887_v2  ;;  %v1892_v44 = vld [vmem:[#allocation7 + $0x20] sm:$0xff]   ;;  %v1895_v2 = vld [vmem:[#allocation7 + $0x50] sm:$0xff]  }
 0x1de   : > { %v2513_v48 = vsub.f32 %v2377_v54, %v722_v45  ;;  %v2516_v49 = vsub.f32 %v2380_v55, %v722_v45  ;;  %v807_v51 = vadd.f32 %v773_v42, %v772_v41 }
 0x1df   : > { %v687_v56 = vpop.xlane.xlu1 %686  ;;  %1718 = vmatpush3.bf16.msra.mxu1 %v1888_v8  ;;  %v1896_v8 = vld [vmem:[#allocation7 + $0x10] sm:$0xff]  }
 0x1e0   : > { %v723_v57 = vmul.f32 0.00390625, %v687_v56  ;;  %808 = vadd.xlane.f32.xlu1 %v807_v51  ;;  %v774_v58 = vmul.f32 %v2513_v48, %v2513_v48  ;;  %v775_v63 = vmul.f32 %v2516_v49, %v2516_v49  ;;  %1719 = vmatprep.subr.bf16.mxu1 %v1889_v34  ;;  %v1897_v34 = vld [vmem:[#allocation7 + $0x48] sm:$0xff]  }
 0x1e2   : > { %v2523_v54 = vsub.f32 %v2385_v59, %v723_v57  ;;  %v2526_v55 = vsub.f32 %v2388_v60, %v723_v57  ;;  %v810_v3 = vadd.f32 %v775_v63, %v774_v58 }
 0x1e3   : > { %v690_v9 = vpop.xlane.xlu0 %689  ;;  %1720 = vmatpush3.bf16.msra.mxu1 %v1890_v35  ;;  %v1898_v35 = vld [vmem:[#allocation7 + $0x8] sm:$0xff]  }
 0x1e4   : > { %v724_v30 = vmul.f32 0.00390625, %v690_v9  ;;  %811 = vadd.xlane.f32.xlu0 %v810_v3  ;;  %v776_v31 = vmul.f32 %v2523_v54, %v2523_v54  ;;  %v777_v14 = vmul.f32 %v2526_v55, %v2526_v55  ;;  %1721 = vmatprep.subr.bf16.mxu1 %v1891_v24  ;;  %v1899_v24 = vld [vmem:[#allocation7 + $0x40] sm:$0xff]  }
 0x1e6   : > { %v2533_v59 = vsub.f32 %v2393_v0, %v724_v30  ;;  %v2536_v60 = vsub.f32 %v2396_v1, %v724_v30  ;;  %v813_v17 = vadd.f32 %v777_v14, %v776_v31 }
 0x1e7   : > { %v693_v18 = vpop.xlane.xlu1 %692  ;;  %1722 = vmatpush3.bf16.msra.mxu1 %v1892_v44  ;;  %v1900_v44 = vld [vmem:[#allocation7] sm:$0xff]  }
 0x1e8   : > { %v725_v39 = vmul.f32 0.00390625, %v693_v18  ;;  %814 = vadd.xlane.f32.xlu1 %v813_v17  ;;  %v778_v23 = vmul.f32 %v2533_v59, %v2533_v59  ;;  %v779_v40 = vmul.f32 %v2536_v60, %v2536_v60  ;;  %1723 = vmatprep.subr.bf16.mxu1 %v1893_v47 }
 0x1ea   : > { %v2543_v0 = vsub.f32 %v2401_v5, %v725_v39  ;;  %v2546_v1 = vsub.f32 %v2404_v6, %v725_v39  ;;  %v816_v29 = vadd.f32 %v779_v40, %v778_v23 }
 0x1eb   : > { %v696_v38 = vpop.xlane.xlu0 %695  ;;  %1724 = vmatpush3.bf16.msra.mxu1 %v1894_v50 }
 0x1ec   : > { %v726_v45 = vmul.f32 0.00390625, %v696_v38  ;;  %817 = vadd.xlane.f32.xlu0 %v816_v29  ;;  %v780_v41 = vmul.f32 %v2543_v0, %v2543_v0  ;;  %v781_v42 = vmul.f32 %v2546_v1, %v2546_v1  ;;  %1725 = vmatprep.subr.bf16.mxu1 %v1895_v2 }
 0x1ee   : > { %v2553_v5 = vsub.f32 %v2409_v10, %v726_v45  ;;  %v2556_v6 = vsub.f32 %v2412_v11, %v726_v45  ;;  %v819_v51 = vadd.f32 %v781_v42, %v780_v41 }
 0x1ef   : > { %v699_v56 = vpop.xlane.xlu1 %698  ;;  %1726 = vmatpush3.bf16.msra.mxu1 %v1896_v8 }
 0x1f0   : > { %v727_v57 = vmul.f32 0.00390625, %v699_v56  ;;  %820 = vadd.xlane.f32.xlu1 %v819_v51  ;;  %v782_v58 = vmul.f32 %v2553_v5, %v2553_v5  ;;  %v783_v63 = vmul.f32 %v2556_v6, %v2556_v6  ;;  %1727 = vmatprep.subr.bf16.mxu1 %v1897_v34 }
 0x1f2   : > { %v2563_v10 = vsub.f32 %v2417_v15, %v727_v57  ;;  %v2566_v11 = vsub.f32 %v2420_v16, %v727_v57  ;;  %v822_v3 = vadd.f32 %v783_v63, %v782_v58 }
 0x1f3   : > { %v702_v9 = vpop.xlane.xlu0 %701  ;;  %1728 = vmatpush3.bf16.msra.mxu1 %v1898_v35 }
 0x1f4   : > { %v728_v30 = vmul.f32 0.00390625, %v702_v9  ;;  %823 = vadd.xlane.f32.xlu0 %v822_v3  ;;  %v784_v31 = vmul.f32 %v2563_v10, %v2563_v10  ;;  %v785_v14 = vmul.f32 %v2566_v11, %v2566_v11  ;;  %1729 = vmatprep.subr.bf16.mxu1 %v1899_v24 }
 0x1f6   : > { %v2573_v15 = vsub.f32 %v2425_v20, %v728_v30  ;;  %v2576_v16 = vsub.f32 %v2428_v21, %v728_v30  ;;  %v825_v17 = vadd.f32 %v785_v14, %v784_v31 }
 0x1f7   : > { %v705_v18 = vpop.xlane.xlu1 %704  ;;  %1730 = vmatpush3.bf16.msra.mxu1 %v1900_v44 }
 0x1f8   : > { %v729_v39 = vmul.f32 0.00390625, %v705_v18  ;;  %826 = vadd.xlane.f32.xlu1 %v825_v17  ;;  %v786_v23 = vmul.f32 %v2573_v15, %v2573_v15  ;;  %v787_v40 = vmul.f32 %v2576_v16, %v2576_v16 }
 0x1fa   : > { %v2583_v20 = vsub.f32 %v2433_v25, %v729_v39  ;;  %v2586_v21 = vsub.f32 %v2436_v26, %v729_v39  ;;  %v828_v29 = vadd.f32 %v787_v40, %v786_v23 }
 0x1fb   : > { %v708_v38 = vpop.xlane.xlu0 %707 }
 0x1fc   : > { %v730_v45 = vmul.f32 0.00390625, %v708_v38  ;;  %829 = vadd.xlane.f32.xlu0 %v828_v29  ;;  %v788_v41 = vmul.f32 %v2583_v20, %v2583_v20  ;;  %v789_v42 = vmul.f32 %v2586_v21, %v2586_v21 }
 0x1fe   : > { %v2593_v47 = vsub.f32 %v2441_v36, %v730_v45  ;;  %v2596_v25 = vsub.f32 %v2444_v37, %v730_v45  ;;  %v831_v26 = vadd.f32 %v789_v42, %v788_v41 }
 0x1ff   : > { %v711_v51 = vpop.xlane.xlu1 %710 }
 0x200   : > { %v731_v50 = vmul.f32 0.00390625, %v711_v51  ;;  %832 = vadd.xlane.f32.xlu1 %v831_v26  ;;  %v790_v56 = vmul.f32 %v2593_v47, %v2593_v47  ;;  %v791_v57 = vmul.f32 %v2596_v25, %v2596_v25  ;;  %v668_v26 = vld [vmem:[%s3025_s3] sm:$0x3] }
 0x202   : > { %v2603_v58 = vsub.f32 %v2449_v43, %v731_v50  ;;  %v2606_v63 = vsub.f32 %v2452_v46, %v731_v50  ;;  %v834_v36 = vadd.f32 %v791_v57, %v790_v56  ;;  %v669_v57 = vld [vmem:[%s3026_s4] sm:$0x3] }
 0x203   : > { %v714_v2 = vpop.xlane.xlu0 %713 }
 0x204   : > { %v732_v37 = vmul.f32 0.00390625, %v714_v2  ;;  %835 = vadd.xlane.f32.xlu0 %v834_v36  ;;  %v792_v3 = vmul.f32 %v2603_v58, %v2603_v58  ;;  %v793_v8 = vmul.f32 %v2606_v63, %v2606_v63  ;;  %v2639_v36 = vrot.slane %v668_v26, %v2333_v28 }
 0x206   : > { %v2613_v9 = vsub.f32 %v2457_v52, %v732_v37  ;;  %v2616_v30 = vsub.f32 %v2460_v53, %v732_v37  ;;  %v837_v43 = vadd.f32 %v793_v8, %v792_v3  ;;  %v2642_v37 = vrot.slane %v668_v26, %v2331_v27 }
 0x207   : > { %v717_v31 = vpop.xlane.xlu1 %716 }
 0x208   : > { %v733_v46 = vmul.f32 0.00390625, %v717_v31  ;;  %838 = vadd.xlane.f32.xlu1 %v837_v43  ;;  %v794_v14 = vmul.f32 %v2613_v9, %v2613_v9  ;;  %v795_v34 = vmul.f32 %v2616_v30, %v2616_v30 }
 0x20a   : > { %v2623_v17 = vsub.f32 %v2465_v61, %v733_v46  ;;  %v2626_v35 = vsub.f32 %v2468_v62, %v733_v46  ;;  %v840_v52 = vadd.f32 %v795_v34, %v794_v14  ;;  %v2647_v46 = vrot.slane %v669_v57, %v2333_v28 }
 0x20c   : > { %841 = vadd.xlane.f32.xlu0 %v840_v52  ;;  %v796_v53 = vmul.f32 %v2623_v17, %v2623_v17  ;;  %v797_v18 = vmul.f32 %v2626_v35, %v2626_v35 }
 0x20e   : > { %v843_v39 = vadd.f32 %v797_v18, %v796_v53  ;;  %v2651_v53 = vrot.slane %v669_v57, %v2331_v27 }
 0x210   : > { %844 = vadd.xlane.f32.xlu1 %v843_v39 }
 0x25d   : > { %v800_v23 = vpop.xlane.xlu0 %799 }
 0x25e   : > { %v846_v40 = vmul.f32 0.00390625, %v800_v23 }
 0x260   : > { %v862_v24 = vadd.f32 1e-05, %v846_v40 }
 0x261   : > { %v803_v29 = vpop.xlane.xlu1 %802 }
 0x262   : > { %1901 = vrsqrt.f32 %v862_v24  ;;  %v847_v61 = vmul.f32 0.00390625, %v803_v29 }
 0x264   : > { %v863_v44 = vadd.f32 1e-05, %v847_v61 }
 0x265   : > { %v806_v38 = vpop.xlane.xlu0 %805 }
 0x266   : > { %1903 = vrsqrt.f32 %v863_v44  ;;  %v848_v62 = vmul.f32 0.00390625, %v806_v38 }
 0x268   : > { %v864_v45 = vadd.f32 1e-05, %v848_v62 }
 0x269   : > { %v809_v41 = vpop.xlane.xlu1 %808 }
 0x26a   : > { %1905 = vrsqrt.f32 %v864_v45  ;;  %v849_v42 = vmul.f32 0.00390625, %v809_v41 }
 0x26c   : > { %v865_v51 = vadd.f32 1e-05, %v849_v42 }
 0x26d   : > { %v812_v50 = vpop.xlane.xlu0 %811 }
 0x26e   : > { %1907 = vrsqrt.f32 %v865_v51  ;;  %v850_v56 = vmul.f32 0.00390625, %v812_v50 }
 0x26f   : > { %v1902_v2 = vpop.eup %1901 }
 0x270   : > { %v866_v3 = vadd.f32 1e-05, %v850_v56  ;;  %v895_v8 = vmul.f32 %v1902_v2, %v2476_v7  ;;  %v894_v43 = vmul.f32 %v1902_v2, %v2473_v4 }
 0x271   : > { %v815_v31 = vpop.xlane.xlu1 %814 }
 0x272   : > { %1909 = vrsqrt.f32 %v866_v3  ;;  %v851_v14 = vmul.f32 0.00390625, %v815_v31  ;;  %v938_v34 = vmul.f32 %v2639_v36, %v895_v8  ;;  %v937_v18 = vmul.f32 %v2642_v37, %v894_v43 }
 0x273   : > { %v1904_v52 = vpop.eup %1903 }
 0x274   : > { %v867_v39 = vadd.f32 1e-05, %v851_v14  ;;  %v897_v23 = vmul.f32 %v1904_v52, %v2486_v13  ;;  %v896_v7 = vmul.f32 %v1904_v52, %v2483_v12  ;;  %v981_v40 = vadd.f32 %v2647_v46, %v938_v34 }
 0x275   : > { %v818_v4 = vpop.xlane.xlu0 %817  ;;  %v980_v27 = vadd.f32 %v2651_v53, %v937_v18 }
 0x276   : > { %1911 = vrsqrt.f32 %v867_v39  ;;  %v852_v28 = vmul.f32 0.00390625, %v818_v4  ;;  %v940_v24 = vmul.f32 %v2639_v36, %v897_v23  ;;  %v939_v61 = vmul.f32 %v2642_v37, %v896_v7 }
 0x277   : > { %v1906_v29 = vpop.eup %1905  ;;  %v1013_v45 = vmax.f32 %v981_v40, 0.0  ;;  %v1012_v56 = vmax.f32 %v980_v27, 0.0 }
 0x278   : > { %v868_v44 = vadd.f32 1e-05, %v852_v28  ;;  %v983_v38 = vadd.f32 %v2647_v46, %v940_v24  ;;  %v899_v62 = vmul.f32 %v1906_v29, %v2496_v22  ;;  %v898_v13 = vmul.f32 %v1906_v29, %v2493_v19 }
 0x279   : > { %v821_v12 = vpop.xlane.xlu1 %820  ;;  %v982_v41 = vadd.f32 %v2651_v53, %v939_v61 }
 0x27a   : > { %1913 = vrsqrt.f32 %v868_v44  ;;  %v853_v42 = vmul.f32 0.00390625, %v821_v12  ;;  %v1015_v26 = vmax.f32 %v983_v38, 0.0  ;;  %v942_v51 = vmul.f32 %v2639_v36, %v899_v62 }
 0x27b   : > { %v1908_v50 = vpop.eup %1907  ;;  %v1014_v57 = vmax.f32 %v982_v41, 0.0  ;;  %v941_v2 = vmul.f32 %v2642_v37, %v898_v13 }
 0x27c   : > { %v869_v3 = vadd.f32 1e-05, %v853_v42  ;;  %v1045_v8 = vpack.c.bf16 %v1015_v26, %v1013_v45  ;;  %v901_v22 = vmul.f32 %v1908_v50, %v2506_v33  ;;  %v985_v31 = vadd.f32 %v2647_v46, %v942_v51 }
 0x27d   : > { %v824_v43 = vpop.xlane.xlu0 %823  ;;  %v1044_v19 = vpack.c.bf16 %v1014_v57, %v1012_v56  ;;  %v900_v14 = vmul.f32 %v1908_v50, %v2503_v32  ;;  %v984_v23 = vadd.f32 %v2651_v53, %v941_v2 }
 0x27e   : > { %1915 = vrsqrt.f32 %v869_v3  ;;  %v854_v34 = vmul.f32 0.00390625, %v824_v43  ;;  %1227 = vmatprep.mubr.bf16.mxu1 %v1045_v8  ;;  %v944_v52 = vmul.f32 %v2639_v36, %v901_v22  ;;  %v1017_v32 = vmax.f32 %v985_v31, 0.0 }
 0x27f   : > { %v1910_v18 = vpop.eup %1909  ;;  %1228 = vmatmul.mubr.bf16.vlgmr.msra.gmra.mxu1 %v1044_v19  ;;  %v943_v39 = vmul.f32 %v2642_v37, %v900_v14  ;;  %v1016_v38 = vmax.f32 %v984_v23, 0.0 }
 0x280   : > { %v870_v7 = vadd.f32 1e-05, %v854_v34  ;;  %v987_v33 = vadd.f32 %v2647_v46, %v944_v52  ;;  %v903_v4 = vmul.f32 %v1910_v18, %v2516_v49  ;;  %v902_v40 = vmul.f32 %v1910_v18, %v2513_v48 }
 0x281   : > { %v827_v28 = vpop.xlane.xlu1 %826  ;;  %v986_v24 = vadd.f32 %v2651_v53, %v943_v39 }
 0x282   : > { %1917 = vrsqrt.f32 %v870_v7  ;;  %v855_v29 = vmul.f32 0.00390625, %v827_v28  ;;  %v1019_v61 = vmax.f32 %v987_v33, 0.0  ;;  %v946_v27 = vmul.f32 %v2639_v36, %v903_v4 }
 0x283   : > { %v1912_v44 = vpop.eup %1911  ;;  %v1018_v62 = vmax.f32 %v986_v24, 0.0  ;;  %v945_v13 = vmul.f32 %v2642_v37, %v902_v40 }
 0x284   : > { %v871_v12 = vadd.f32 1e-05, %v855_v29  ;;  %v1047_v45 = vpack.c.bf16 %v1019_v61, %v1017_v32  ;;  %v905_v49 = vmul.f32 %v1912_v44, %v2526_v55  ;;  %v989_v42 = vadd.f32 %v2647_v46, %v946_v27 }
 0x285   : > { %v830_v41 = vpop.xlane.xlu0 %829  ;;  %v1046_v48 = vpack.c.bf16 %v1018_v62, %v1016_v38  ;;  %v904_v26 = vmul.f32 %v1912_v44, %v2523_v54  ;;  %v988_v2 = vadd.f32 %v2651_v53, %v945_v13 }
 0x286   : > { %1919 = vrsqrt.f32 %v871_v12  ;;  %v856_v51 = vmul.f32 0.00390625, %v830_v41  ;;  %1235 = vmatprep.mubr.bf16.mxu1 %v1047_v45  ;;  %v948_v50 = vmul.f32 %v2639_v36, %v905_v49  ;;  %v1021_v54 = vmax.f32 %v989_v42, 0.0 }
 0x287   : > { %v1914_v56 = vpop.eup %1913  ;;  %1236 = vmatmul.mubr.bf16.gmra.mxu1 %v1046_v48  ;;  %v947_v57 = vmul.f32 %v2642_v37, %v904_v26  ;;  %v1020_v18 = vmax.f32 %v988_v2, 0.0 }
 0x288   : > { %v872_v3 = vadd.f32 1e-05, %v856_v51  ;;  %v991_v55 = vadd.f32 %v2647_v46, %v948_v50  ;;  %v907_v8 = vmul.f32 %v1914_v56, %v2536_v60  ;;  %v906_v22 = vmul.f32 %v1914_v56, %v2533_v59 }
 0x289   : > { %v833_v43 = vpop.xlane.xlu1 %832  ;;  %v990_v19 = vadd.f32 %v2651_v53, %v947_v57 }
 0x28a   : > { %1921 = vrsqrt.f32 %v872_v3  ;;  %v857_v31 = vmul.f32 0.00390625, %v833_v43  ;;  %v1023_v14 = vmax.f32 %v991_v55, 0.0  ;;  %v950_v34 = vmul.f32 %v2639_v36, %v907_v8 }
 0x28b   : > { %v1916_v52 = vpop.eup %1915  ;;  %v1022_v39 = vmax.f32 %v990_v19, 0.0  ;;  %v949_v23 = vmul.f32 %v2642_v37, %v906_v22 }
 0x28c   : > { %v873_v7 = vadd.f32 1e-05, %v857_v31  ;;  %v1049_v33 = vpack.c.bf16 %v1023_v14, %v1021_v54  ;;  %v909_v60 = vmul.f32 %v1916_v52, %v2546_v1  ;;  %v993_v40 = vadd.f32 %v2647_v46, %v950_v34 }
 0x28d   : > { %v836_v4 = vpop.xlane.xlu0 %835  ;;  %v1048_v59 = vpack.c.bf16 %v1022_v39, %v1020_v18  ;;  %v908_v28 = vmul.f32 %v1916_v52, %v2543_v0  ;;  %v992_v27 = vadd.f32 %v2651_v53, %v949_v23 }
 0x28e   : > { %1923 = vrsqrt.f32 %v873_v7  ;;  %v858_v32 = vmul.f32 0.00390625, %v836_v4  ;;  %1243 = vmatprep.mubr.bf16.mxu1 %v1049_v33  ;;  %v952_v24 = vmul.f32 %v2639_v36, %v909_v60  ;;  %v1025_v0 = vmax.f32 %v993_v40, 0.0 }
 0x28f   : > { %v1918_v29 = vpop.eup %1917  ;;  %1244 = vmatmul.mubr.bf16.gmra.mxu1 %v1048_v59  ;;  %v951_v61 = vmul.f32 %v2642_v37, %v908_v28  ;;  %v1024_v42 = vmax.f32 %v992_v27, 0.0 }
 0x290   : > { %v874_v44 = vadd.f32 1e-05, %v858_v32  ;;  %v995_v1 = vadd.f32 %v2647_v46, %v952_v24  ;;  %v911_v38 = vmul.f32 %v1918_v29, %v2556_v6  ;;  %v910_v62 = vmul.f32 %v1918_v29, %v2553_v5 }
 0x291   : > { %v839_v13 = vpop.xlane.xlu1 %838  ;;  %v994_v12 = vadd.f32 %v2651_v53, %v951_v61 }
 0x292   : > { %1925 = vrsqrt.f32 %v874_v44  ;;  %v859_v45 = vmul.f32 0.00390625, %v839_v13  ;;  %v1027_v49 = vmax.f32 %v995_v1, 0.0  ;;  %v954_v41 = vmul.f32 %v2639_v36, %v911_v38 }
 0x293   : > { %v1920_v48 = vpop.eup %1919  ;;  %v1026_v26 = vmax.f32 %v994_v12, 0.0  ;;  %v953_v51 = vmul.f32 %v2642_v37, %v910_v62 }
 0x294   : > { %v875_v50 = vadd.f32 1e-05, %v859_v45  ;;  %v1051_v56 = vpack.c.bf16 %v1027_v49, %v1025_v0  ;;  %v913_v6 = vmul.f32 %v1920_v48, %v2566_v11  ;;  %v997_v2 = vadd.f32 %v2647_v46, %v954_v41 }
 0x295   : > { %v842_v57 = vpop.xlane.xlu0 %841  ;;  %v1050_v5 = vpack.c.bf16 %v1026_v26, %v1024_v42  ;;  %v912_v3 = vmul.f32 %v1920_v48, %v2563_v10  ;;  %v996_v54 = vadd.f32 %v2651_v53, %v953_v51 }
 0x296   : > { %1927 = vrsqrt.f32 %v875_v50  ;;  %v860_v55 = vmul.f32 0.00390625, %v842_v57  ;;  %1251 = vmatprep.mubr.bf16.mxu1 %v1051_v56  ;;  %v956_v8 = vmul.f32 %v2639_v36, %v913_v6  ;;  %v1029_v10 = vmax.f32 %v997_v2, 0.0 }
 0x297   : > { %v1922_v22 = vpop.eup %1921  ;;  %1252 = vmatmul.mubr.bf16.gmra.mxu1 %v1050_v5  ;;  %v955_v43 = vmul.f32 %v2642_v37, %v912_v3  ;;  %v1028_v33 = vmax.f32 %v996_v54, 0.0 }
 0x298   : > { %v876_v19 = vadd.f32 1e-05, %v860_v55  ;;  %v999_v11 = vadd.f32 %v2647_v46, %v956_v8  ;;  %v915_v31 = vmul.f32 %v1922_v22, %v2576_v16  ;;  %v914_v14 = vmul.f32 %v1922_v22, %v2573_v15 }
 0x299   : > { %v845_v34 = vpop.xlane.xlu1 %844  ;;  %v998_v52 = vadd.f32 %v2651_v53, %v955_v43 }
 0x29a   : > { %1929 = vrsqrt.f32 %v876_v19  ;;  %v861_v18 = vmul.f32 0.00390625, %v845_v34  ;;  %v1031_v39 = vmax.f32 %v999_v11, 0.0  ;;  %v958_v23 = vmul.f32 %v2639_v36, %v915_v31 }
 0x29b   : > { %v1924_v7 = vpop.eup %1923  ;;  %v1030_v60 = vmax.f32 %v998_v52, 0.0  ;;  %v957_v4 = vmul.f32 %v2642_v37, %v914_v14 }
 0x29c   : > { %v877_v59 = vadd.f32 1e-05, %v861_v18  ;;  %v1053_v40 = vpack.c.bf16 %v1031_v39, %v1029_v10  ;;  %v917_v16 = vmul.f32 %v1924_v7, %v2586_v21  ;;  %v916_v15 = vmul.f32 %v1924_v7, %v2583_v20 }
 0x29d   : > { %v1052_v28 = vpack.c.bf16 %v1030_v60, %v1028_v33  ;;  %v1001_v24 = vadd.f32 %v2647_v46, %v958_v23  ;;  %v1000_v27 = vadd.f32 %v2651_v53, %v957_v4 }
 0x29e   : > { %1931 = vrsqrt.f32 %v877_v59  ;;  %1259 = vmatprep.mubr.bf16.mxu1 %v1053_v40  ;;  %v960_v32 = vmul.f32 %v2639_v36, %v917_v16  ;;  %v959_v61 = vmul.f32 %v2642_v37, %v916_v15 }
 0x29f   : > { %v1926_v29 = vpop.eup %1925  ;;  %1260 = vmatmul.mubr.bf16.gmra.mxu1 %v1052_v28  ;;  %v1033_v38 = vmax.f32 %v1001_v24, 0.0  ;;  %v1032_v45 = vmax.f32 %v1000_v27, 0.0 }
 0x2a0   : > { %v1003_v44 = vadd.f32 %v2647_v46, %v960_v32  ;;  %v919_v1 = vmul.f32 %v1926_v29, %v2596_v25  ;;  %v918_v21 = vmul.f32 %v1926_v29, %v2593_v47  ;;  %v1002_v20 = vadd.f32 %v2651_v53, %v959_v61 }
 0x2a2   : > { %v1035_v62 = vmax.f32 %v1003_v44, 0.0  ;;  %v962_v13 = vmul.f32 %v2639_v36, %v919_v1  ;;  %v961_v0 = vmul.f32 %v2642_v37, %v918_v21  ;;  %v1034_v49 = vmax.f32 %v1002_v20, 0.0 }
 0x2a3   : > { %v1928_v12 = vpop.eup %1927 }
 0x2a4   : > { %v1055_v41 = vpack.c.bf16 %v1035_v62, %v1033_v38  ;;  %v921_v48 = vmul.f32 %v1928_v12, %v2606_v63  ;;  %v920_v42 = vmul.f32 %v1928_v12, %v2603_v58  ;;  %v1054_v26 = vpack.c.bf16 %v1034_v49, %v1032_v45 }
 0x2a5   : > { %v1005_v25 = vadd.f32 %v2647_v46, %v962_v13  ;;  %v1004_v50 = vadd.f32 %v2651_v53, %v961_v0 }
 0x2a6   : > { %1267 = vmatprep.mubr.bf16.mxu1 %v1055_v41  ;;  %v964_v47 = vmul.f32 %v2639_v36, %v921_v48  ;;  %v963_v51 = vmul.f32 %v2642_v37, %v920_v42 }
 0x2a7   : > { %v1930_v56 = vpop.eup %1929  ;;  %1268 = vmatmul.mubr.bf16.gmra.mxu1 %v1054_v26  ;;  %v1037_v5 = vmax.f32 %v1005_v25, 0.0  ;;  %v1036_v3 = vmax.f32 %v1004_v50, 0.0 }
 0x2a8   : > { %v1007_v6 = vadd.f32 %v2647_v46, %v964_v47  ;;  %v1006_v57 = vadd.f32 %v2651_v53, %v963_v51  ;;  %v923_v63 = vmul.f32 %v1930_v56, %v2616_v30  ;;  %v922_v58 = vmul.f32 %v1930_v56, %v2613_v9 }
 0x2aa   : > { %v1039_v2 = vmax.f32 %v1007_v6, 0.0  ;;  %v1038_v55 = vmax.f32 %v1006_v57, 0.0  ;;  %v966_v8 = vmul.f32 %v2639_v36, %v923_v63  ;;  %v965_v43 = vmul.f32 %v2642_v37, %v922_v58 }
 0x2ab   : > { %v1932_v22 = vpop.eup %1931 }
 0x2ac   : > { %v1057_v54 = vpack.c.bf16 %v1039_v2, %v1037_v5  ;;  %v1056_v19 = vpack.c.bf16 %v1038_v55, %v1036_v3  ;;  %v925_v11 = vmul.f32 %v1932_v22, %v2626_v35  ;;  %v924_v31 = vmul.f32 %v1932_v22, %v2623_v17 }
 0x2ad   : > { %v1009_v9 = vadd.f32 %v2647_v46, %v966_v8  ;;  %v1008_v34 = vadd.f32 %v2651_v53, %v965_v43 }
 0x2ae   : > { %1275 = vmatprep.mubr.bf16.mxu1 %v1057_v54  ;;  %v968_v30 = vmul.f32 %v2639_v36, %v925_v11  ;;  %v967_v14 = vmul.f32 %v2642_v37, %v924_v31  ;;  %v2749_v37 = vld [vmem:[%s3028_s6] ss:$0 sm:$0xff] }
 0x2af   : > { %1276 = vmatmul.mubr.bf16.gmra.mxu1 %v1056_v19  ;;  %v1041_v18 = vmax.f32 %v1009_v9, 0.0  ;;  %v1040_v23 = vmax.f32 %v1008_v34, 0.0 }
 0x2b0   : > { %v1011_v10 = vadd.f32 %v2647_v46, %v968_v30  ;;  %v1010_v52 = vadd.f32 %v2651_v53, %v967_v14 }
 0x2b2   : > { %v1043_v39 = vmax.f32 %v1011_v10, 0.0  ;;  %v1042_v35 = vmax.f32 %v1010_v52, 0.0 }
 0x2b4   : > { %v1059_v7 = vpack.c.bf16 %v1043_v39, %v1041_v18  ;;  %v1058_v17 = vpack.c.bf16 %v1042_v35, %v1040_v23 }
 0x2b6   : > { %1283 = vmatprep.mubr.bf16.mxu1 %v1059_v7 }
 0x2b7   : > { %1284 = vmatmul.mubr.bf16.gmra.mxu1 %v1058_v17 }
 0x33f   : > { %v1731_v36 = vpop.f32.mrf.mxu1 }
 0x341   : > { %v1732_v33 = vpop.f32.mrf.mxu1 }
 0x342   : > { %v1733_v60 = vadd.f32 %v1732_v33, %v1731_v36 }
 0x343   : > { %v1734_v4 = vpop.f32.mrf.mxu1 }
 0x344   : > { %v2752_v46 = vadd.f32 %v1733_v60, %v2749_v37 }
 0x345   : > { %v1735_v53 = vpop.f32.mrf.mxu1 }
 0x346   : > { %v1736_v59 = vadd.f32 %v1735_v53, %v1734_v4  ;;  %1294 = vadd.xlane.f32.xlu0 %v2752_v46 }
 0x347   : > { %v1737_v40 = vpop.f32.mrf.mxu1 }
 0x348   : > { %v2756_v16 = vadd.f32 %v1736_v59, %v2749_v37 }
 0x349   : > { %v1738_v28 = vpop.f32.mrf.mxu1 }
 0x34a   : > { %v1739_v15 = vadd.f32 %v1738_v28, %v1737_v40  ;;  %1296 = vadd.xlane.f32.xlu1 %v2756_v16 }
 0x34b   : > { %v1740_v32 = vpop.f32.mrf.mxu1 }
 0x34c   : > { %v2760_v24 = vadd.f32 %v1739_v15, %v2749_v37 }
 0x34d   : > { %v1741_v29 = vpop.f32.mrf.mxu1 }
 0x34e   : > { %v1742_v61 = vadd.f32 %v1741_v29, %v1740_v32  ;;  %1298 = vadd.xlane.f32.xlu0 %v2760_v24 }
 0x34f   : > { %v1743_v27 = vpop.f32.mrf.mxu1 }
 0x350   : > { %v2764_v44 = vadd.f32 %v1742_v61, %v2749_v37 }
 0x351   : > { %v1744_v1 = vpop.f32.mrf.mxu1 }
 0x352   : > { %v1745_v21 = vadd.f32 %v1744_v1, %v1743_v27  ;;  %1300 = vadd.xlane.f32.xlu1 %v2764_v44 }
 0x353   : > { %v1746_v20 = vpop.f32.mrf.mxu1 }
 0x354   : > { %v2768_v38 = vadd.f32 %v1745_v21, %v2749_v37 }
 0x355   : > { %v1747_v62 = vpop.f32.mrf.mxu1 }
 0x356   : > { %v1748_v13 = vadd.f32 %v1747_v62, %v1746_v20  ;;  %1302 = vadd.xlane.f32.xlu0 %v2768_v38 }
 0x357   : > { %v1749_v0 = vpop.f32.mrf.mxu1 }
 0x358   : > { %v2772_v12 = vadd.f32 %v1748_v13, %v2749_v37 }
 0x359   : > { %v1750_v45 = vpop.f32.mrf.mxu1 }
 0x35a   : > { %v1751_v49 = vadd.f32 %v1750_v45, %v1749_v0  ;;  %1304 = vadd.xlane.f32.xlu1 %v2772_v12 }
 0x35b   : > { %v1752_v41 = vpop.f32.mrf.mxu1 }
 0x35c   : > { %v2776_v48 = vadd.f32 %v1751_v49, %v2749_v37 }
 0x35d   : > { %v1753_v42 = vpop.f32.mrf.mxu1 }
 0x35e   : > { %v1754_v26 = vadd.f32 %v1753_v42, %v1752_v41  ;;  %1306 = vadd.xlane.f32.xlu0 %v2776_v48 }
 0x35f   : > { %v1755_v25 = vpop.f32.mrf.mxu1 }
 0x360   : > { %v2780_v47 = vadd.f32 %v1754_v26, %v2749_v37 }
 0x361   : > { %v1756_v51 = vpop.f32.mrf.mxu1 }
 0x362   : > { %v1757_v50 = vadd.f32 %v1756_v51, %v1755_v25  ;;  %1308 = vadd.xlane.f32.xlu1 %v2780_v47 }
 0x363   : > { %v1758_v56 = vpop.f32.mrf.mxu1 }
 0x364   : > { %v2784_v6 = vadd.f32 %v1757_v50, %v2749_v37 }
 0x365   : > { %v1759_v57 = vpop.f32.mrf.mxu1 }
 0x366   : > { %v1760_v63 = vadd.f32 %v1759_v57, %v1758_v56  ;;  %1310 = vadd.xlane.f32.xlu0 %v2784_v6 }
 0x367   : > { %v1761_v58 = vpop.f32.mrf.mxu1 }
 0x368   : > { %v2788_v5 = vadd.f32 %v1760_v63, %v2749_v37 }
 0x369   : > { %v1762_v2 = vpop.f32.mrf.mxu1 }
 0x36a   : > { %v1763_v3 = vadd.f32 %v1762_v2, %v1761_v58  ;;  %1312 = vadd.xlane.f32.xlu1 %v2788_v5 }
 0x36b   : > { %v1764_v55 = vpop.f32.mrf.mxu1 }
 0x36c   : > { %v2792_v8 = vadd.f32 %v1763_v3, %v2749_v37 }
 0x36d   : > { %v1765_v22 = vpop.f32.mrf.mxu1 }
 0x36e   : > { %v1766_v43 = vadd.f32 %v1765_v22, %v1764_v55  ;;  %1314 = vadd.xlane.f32.xlu0 %v2792_v8 }
 0x36f   : > { %v1767_v54 = vpop.f32.mrf.mxu1 }
 0x370   : > { %v2796_v19 = vadd.f32 %v1766_v43, %v2749_v37 }
 0x371   : > { %v1768_v11 = vpop.f32.mrf.mxu1 }
 0x372   : > { %v1769_v31 = vadd.f32 %v1768_v11, %v1767_v54  ;;  %1316 = vadd.xlane.f32.xlu1 %v2796_v19 }
 0x373   : > { %v1770_v30 = vpop.f32.mrf.mxu1 }
 0x374   : > { %v2800_v9 = vadd.f32 %v1769_v31, %v2749_v37 }
 0x375   : > { %v1771_v14 = vpop.f32.mrf.mxu1 }
 0x376   : > { %v1772_v34 = vadd.f32 %v1771_v14, %v1770_v30  ;;  %1318 = vadd.xlane.f32.xlu0 %v2800_v9 }
 0x377   : > { %v1773_v10 = vpop.f32.mrf.mxu1 }
 0x378   : > { %v2804_v52 = vadd.f32 %v1772_v34, %v2749_v37 }
 0x379   : > { %v1774_v18 = vpop.f32.mrf.mxu1 }
 0x37a   : > { %v1775_v39 = vadd.f32 %v1774_v18, %v1773_v10  ;;  %1320 = vadd.xlane.f32.xlu1 %v2804_v52 }
 0x37b   : > { %v1776_v23 = vpop.f32.mrf.mxu1 }
 0x37c   : > { %v2808_v35 = vadd.f32 %v1775_v39, %v2749_v37 }
 0x37d   : > { %v1777_v7 = vpop.f32.mrf.mxu1 }
 0x37e   : > { %v1778_v17 = vadd.f32 %v1777_v7, %v1776_v23  ;;  %1322 = vadd.xlane.f32.xlu0 %v2808_v35 }
 0x380   : > { %v2812_v36 = vadd.f32 %v1778_v17, %v2749_v37 }
 0x382   : > { %1324 = vadd.xlane.f32.xlu1 %v2812_v36 }
 0x3cf   : > { %v1295_v33 = vpop.xlane.xlu0 %1294 }
 0x3d0   : > { %v1326_v60 = vmul.f32 0.0078125, %v1295_v33 }
 0x3d2   : > { %v2816_v4 = vsub.f32 %v2752_v46, %v1326_v60 }
 0x3d3   : > { %v1297_v53 = vpop.xlane.xlu1 %1296 }
 0x3d4   : > { %v1327_v59 = vmul.f32 0.0078125, %v1297_v53  ;;  %v1358_v40 = vmul.f32 %v2816_v4, %v2816_v4 }
 0x3d6   : > { %v2821_v28 = vsub.f32 %v2756_v16, %v1327_v59  ;;  %1374 = vadd.xlane.f32.xlu0 %v1358_v40 }
 0x3d7   : > { %v1299_v15 = vpop.xlane.xlu0 %1298 }
 0x3d8   : > { %v1328_v32 = vmul.f32 0.0078125, %v1299_v15  ;;  %v1359_v37 = vmul.f32 %v2821_v28, %v2821_v28 }
 0x3da   : > { %v2826_v29 = vsub.f32 %v2760_v24, %v1328_v32  ;;  %1376 = vadd.xlane.f32.xlu1 %v1359_v37 }
 0x3db   : > { %v1301_v46 = vpop.xlane.xlu1 %1300 }
 0x3dc   : > { %v1329_v61 = vmul.f32 0.0078125, %v1301_v46  ;;  %v1360_v27 = vmul.f32 %v2826_v29, %v2826_v29 }
 0x3de   : > { %v2831_v1 = vsub.f32 %v2764_v44, %v1329_v61  ;;  %1378 = vadd.xlane.f32.xlu0 %v1360_v27 }
 0x3df   : > { %v1303_v16 = vpop.xlane.xlu0 %1302 }
 0x3e0   : > { %v1330_v21 = vmul.f32 0.0078125, %v1303_v16  ;;  %v1361_v20 = vmul.f32 %v2831_v1, %v2831_v1 }
 0x3e2   : > { %v2836_v62 = vsub.f32 %v2768_v38, %v1330_v21  ;;  %1380 = vadd.xlane.f32.xlu1 %v1361_v20 }
 0x3e3   : > { %v1305_v24 = vpop.xlane.xlu1 %1304 }
 0x3e4   : > { %v1331_v13 = vmul.f32 0.0078125, %v1305_v24  ;;  %v1362_v0 = vmul.f32 %v2836_v62, %v2836_v62 }
 0x3e6   : > { %v2841_v45 = vsub.f32 %v2772_v12, %v1331_v13  ;;  %1382 = vadd.xlane.f32.xlu0 %v1362_v0  ;;  %v2898_v13 = vld [vmem:[%s3029_s7] ss:$0 sm:$0xff] }
 0x3e7   : > { %v1307_v44 = vpop.xlane.xlu0 %1306 }
 0x3e8   : > { %v1332_v49 = vmul.f32 0.0078125, %v1307_v44  ;;  %v1363_v41 = vmul.f32 %v2841_v45, %v2841_v45 }
 0x3ea   : > { %v2846_v42 = vsub.f32 %v2776_v48, %v1332_v49  ;;  %1384 = vadd.xlane.f32.xlu1 %v1363_v41  ;;  %v2904_v49 = vld [vmem:[%s3030_s8] ss:$0 sm:$0xff] }
 0x3eb   : > { %v1309_v38 = vpop.xlane.xlu1 %1308 }
 0x3ec   : > { %v1333_v26 = vmul.f32 0.0078125, %v1309_v38  ;;  %v1364_v25 = vmul.f32 %v2846_v42, %v2846_v42 }
 0x3ee   : > { %v2851_v51 = vsub.f32 %v2780_v47, %v1333_v26  ;;  %1386 = vadd.xlane.f32.xlu0 %v1364_v25 }
 0x3ef   : > { %v1311_v12 = vpop.xlane.xlu0 %1310 }
 0x3f0   : > { %v1334_v50 = vmul.f32 0.0078125, %v1311_v12  ;;  %v1365_v56 = vmul.f32 %v2851_v51, %v2851_v51 }
 0x3f2   : > { %v2856_v57 = vsub.f32 %v2784_v6, %v1334_v50  ;;  %1388 = vadd.xlane.f32.xlu1 %v1365_v56 }
 0x3f3   : > { %v1313_v48 = vpop.xlane.xlu1 %1312 }
 0x3f4   : > { %v1335_v63 = vmul.f32 0.0078125, %v1313_v48  ;;  %v1366_v58 = vmul.f32 %v2856_v57, %v2856_v57 }
 0x3f6   : > { %v2861_v2 = vsub.f32 %v2788_v5, %v1335_v63  ;;  %1390 = vadd.xlane.f32.xlu0 %v1366_v58 }
 0x3f7   : > { %v1315_v47 = vpop.xlane.xlu0 %1314 }
 0x3f8   : > { %v1336_v3 = vmul.f32 0.0078125, %v1315_v47  ;;  %v1367_v55 = vmul.f32 %v2861_v2, %v2861_v2 }
 0x3fa   : > { %v2866_v22 = vsub.f32 %v2792_v8, %v1336_v3  ;;  %1392 = vadd.xlane.f32.xlu1 %v1367_v55 }
 0x3fb   : > { %v1317_v6 = vpop.xlane.xlu1 %1316 }
 0x3fc   : > { %v1337_v43 = vmul.f32 0.0078125, %v1317_v6  ;;  %v1368_v54 = vmul.f32 %v2866_v22, %v2866_v22 }
 0x3fe   : > { %v2871_v11 = vsub.f32 %v2796_v19, %v1337_v43  ;;  %1394 = vadd.xlane.f32.xlu0 %v1368_v54 }
 0x3ff   : > { %v1319_v5 = vpop.xlane.xlu0 %1318 }
 0x400   : > { %v1338_v31 = vmul.f32 0.0078125, %v1319_v5  ;;  %v1369_v30 = vmul.f32 %v2871_v11, %v2871_v11 }
 0x402   : > { %v2876_v14 = vsub.f32 %v2800_v9, %v1338_v31  ;;  %1396 = vadd.xlane.f32.xlu1 %v1369_v30 }
 0x403   : > { %v1321_v8 = vpop.xlane.xlu1 %1320 }
 0x404   : > { %v1339_v34 = vmul.f32 0.0078125, %v1321_v8  ;;  %v1370_v10 = vmul.f32 %v2876_v14, %v2876_v14 }
 0x406   : > { %v2881_v18 = vsub.f32 %v2804_v52, %v1339_v34  ;;  %1398 = vadd.xlane.f32.xlu0 %v1370_v10 }
 0x407   : > { %v1323_v19 = vpop.xlane.xlu0 %1322 }
 0x408   : > { %v1340_v39 = vmul.f32 0.0078125, %v1323_v19  ;;  %v1371_v23 = vmul.f32 %v2881_v18, %v2881_v18 }
 0x40a   : > { %v2886_v7 = vsub.f32 %v2808_v35, %v1340_v39  ;;  %1400 = vadd.xlane.f32.xlu1 %v1371_v23 }
 0x40b   : > { %v1325_v9 = vpop.xlane.xlu1 %1324 }
 0x40c   : > { %v1341_v17 = vmul.f32 0.0078125, %v1325_v9  ;;  %v1372_v33 = vmul.f32 %v2886_v7, %v2886_v7 }
 0x40e   : > { %v2891_v60 = vsub.f32 %v2812_v36, %v1341_v17  ;;  %1402 = vadd.xlane.f32.xlu0 %v1372_v33 }
 0x410   : > { %v1373_v52 = vmul.f32 %v2891_v60, %v2891_v60 }
 0x412   : > { %1404 = vadd.xlane.f32.xlu1 %v1373_v52 }
 0x45f   : > { %v1375_v53 = vpop.xlane.xlu0 %1374 }
 0x460   : > { %v1406_v59 = vmul.f32 0.0078125, %v1375_v53 }
 0x462   : > { %v1422_v40 = vadd.f32 1e-05, %v1406_v59 }
 0x463   : > { %v1377_v15 = vpop.xlane.xlu1 %1376 }
 0x464   : > { %1933 = vrsqrt.f32 %v1422_v40  ;;  %v1407_v35 = vmul.f32 0.0078125, %v1377_v15 }
 0x466   : > { %v1423_v32 = vadd.f32 1e-05, %v1407_v35 }
 0x467   : > { %v1379_v37 = vpop.xlane.xlu0 %1378 }
 0x468   : > { %1935 = vrsqrt.f32 %v1423_v32  ;;  %v1408_v46 = vmul.f32 0.0078125, %v1379_v37 }
 0x46a   : > { %v1424_v61 = vadd.f32 1e-05, %v1408_v46 }
 0x46b   : > { %v1381_v27 = vpop.xlane.xlu1 %1380 }
 0x46c   : > { %1937 = vrsqrt.f32 %v1424_v61  ;;  %v1409_v36 = vmul.f32 0.0078125, %v1381_v27 }
 0x46e   : > { %v1425_v16 = vadd.f32 1e-05, %v1409_v36 }
 0x46f   : > { %v1383_v21 = vpop.xlane.xlu0 %1382 }
 0x470   : > { %1939 = vrsqrt.f32 %v1425_v16  ;;  %v1410_v20 = vmul.f32 0.0078125, %v1383_v21 }
 0x471   : > { %v1934_v24 = vpop.eup %1933 }
 0x472   : > { %v1454_v0 = vmul.f32 %v1934_v24, %v2816_v4  ;;  %v1426_v44 = vadd.f32 1e-05, %v1410_v20 }
 0x473   : > { %v1385_v41 = vpop.xlane.xlu1 %1384 }
 0x474   : > { %v1476_v38 = vmul.f32 %v2898_v13, %v1454_v0  ;;  %1941 = vrsqrt.f32 %v1426_v44  ;;  %v1411_v26 = vmul.f32 0.0078125, %v1385_v41 }
 0x475   : > { %v1936_v25 = vpop.eup %1935 }
 0x476   : > { %v1498_v12 = vadd.f32 %v2904_v49, %v1476_v38  ;;  %v1455_v50 = vmul.f32 %v1936_v25, %v2821_v28  ;;  %v1427_v56 = vadd.f32 1e-05, %v1411_v26 }
 0x477   : > { %v1387_v48 = vpop.xlane.xlu0 %1386 }
 0x478   : > { %v1514_v4 = vmax.f32 %v1498_v12, 0.0  ;;  %v1477_v63 = vmul.f32 %v2898_v13, %v1455_v50  ;;  %1943 = vrsqrt.f32 %v1427_v56  ;;  %v1412_v58 = vmul.f32 0.0078125, %v1387_v48 }
 0x479   : > { %v1938_v47 = vpop.eup %1937 }
 0x47a   : > { %1530 = vst [vmem:[%s2911_s18] sm:$0xff] %v1514_v4  ;;  %v1499_v3 = vadd.f32 %v2904_v49, %v1477_v63  ;;  %v1456_v55 = vmul.f32 %v1938_v47, %v2826_v29  ;;  %v1428_v6 = vadd.f32 1e-05, %v1412_v58 }
 0x47b   : > { %v1389_v43 = vpop.xlane.xlu1 %1388 }
 0x47c   : > { %v1515_v28 = vmax.f32 %v1499_v3, 0.0  ;;  %v1478_v54 = vmul.f32 %v2898_v13, %v1456_v55  ;;  %1945 = vrsqrt.f32 %v1428_v6  ;;  %v1413_v5 = vmul.f32 0.0078125, %v1389_v43 }
 0x47d   : > { %v1940_v31 = vpop.eup %1939 }
 0x47e   : > { %1531 = vst [vmem:[%s2911_s18 + $0x8] sm:$0xff] %v1515_v28  ;;  %v1500_v30 = vadd.f32 %v2904_v49, %v1478_v54  ;;  %v1457_v8 = vmul.f32 %v1940_v31, %v2831_v1  ;;  %v1429_v34 = vadd.f32 1e-05, %v1413_v5 }
 0x47f   : > { %v1391_v10 = vpop.xlane.xlu0 %1390 }
 0x480   : > { %v1516_v19 = vmax.f32 %v1500_v30, 0.0  ;;  %v1479_v29 = vmul.f32 %v2898_v13, %v1457_v8  ;;  %1947 = vrsqrt.f32 %v1429_v34  ;;  %v1414_v39 = vmul.f32 0.0078125, %v1391_v10 }
 0x481   : > { %v1942_v23 = vpop.eup %1941 }
 0x482   : > { %1532 = vst [vmem:[%s2911_s18 + $0x10] sm:$0xff] %v1516_v19  ;;  %v1501_v9 = vadd.f32 %v2904_v49, %v1479_v29  ;;  %v1458_v17 = vmul.f32 %v1942_v23, %v2836_v62  ;;  %v1430_v33 = vadd.f32 1e-05, %v1414_v39 }
 0x483   : > { %v1393_v52 = vpop.xlane.xlu1 %1392 }
 0x484   : > { %v1517_v53 = vmax.f32 %v1501_v9, 0.0  ;;  %v1480_v1 = vmul.f32 %v2898_v13, %v1458_v17  ;;  %1949 = vrsqrt.f32 %v1430_v33  ;;  %v1415_v59 = vmul.f32 0.0078125, %v1393_v52 }
 0x485   : > { %v1944_v40 = vpop.eup %1943 }
 0x486   : > { %1533 = vst [vmem:[%s2911_s18 + $0x18] sm:$0xff] %v1517_v53  ;;  %v1502_v15 = vadd.f32 %v2904_v49, %v1480_v1  ;;  %v1459_v35 = vmul.f32 %v1944_v40, %v2841_v45  ;;  %v1431_v32 = vadd.f32 1e-05, %v1415_v59 }
 0x487   : > { %v1395_v37 = vpop.xlane.xlu0 %1394 }
 0x488   : > { %v1518_v46 = vmax.f32 %v1502_v15, 0.0  ;;  %v1481_v62 = vmul.f32 %v2898_v13, %v1459_v35  ;;  %1951 = vrsqrt.f32 %v1431_v32  ;;  %v1416_v61 = vmul.f32 0.0078125, %v1395_v37 }
 0x489   : > { %v1946_v27 = vpop.eup %1945 }
 0x48a   : > { %1534 = vst [vmem:[%s2911_s18 + $0x20] sm:$0xff] %v1518_v46  ;;  %v1503_v36 = vadd.f32 %v2904_v49, %v1481_v62  ;;  %v1460_v16 = vmul.f32 %v1946_v27, %v2846_v42  ;;  %v1432_v21 = vadd.f32 1e-05, %v1416_v61 }
 0x48b   : > { %v1397_v20 = vpop.xlane.xlu1 %1396 }
 0x48c   : > { %v1519_v24 = vmax.f32 %v1503_v36, 0.0  ;;  %v1482_v45 = vmul.f32 %v2898_v13, %v1460_v16  ;;  %1953 = vrsqrt.f32 %v1432_v21  ;;  %v1417_v0 = vmul.f32 0.0078125, %v1397_v20 }
 0x48d   : > { %v1948_v44 = vpop.eup %1947 }
 0x48e   : > { %1535 = vst [vmem:[%s2911_s18 + $0x28] sm:$0xff] %v1519_v24  ;;  %v1504_v41 = vadd.f32 %v2904_v49, %v1482_v45  ;;  %v1461_v38 = vmul.f32 %v1948_v44, %v2851_v51  ;;  %v1433_v26 = vadd.f32 1e-05, %v1417_v0 }
 0x48f   : > { %v1399_v25 = vpop.xlane.xlu0 %1398 }
 0x490   : > { %v1520_v12 = vmax.f32 %v1504_v41, 0.0  ;;  %v1483_v42 = vmul.f32 %v2898_v13, %v1461_v38  ;;  %1955 = vrsqrt.f32 %v1433_v26  ;;  %v1418_v50 = vmul.f32 0.0078125, %v1399_v25 }
 0x491   : > { %v1950_v56 = vpop.eup %1949 }
 0x492   : > { %1536 = vst [vmem:[%s2911_s18 + $0x30] sm:$0xff] %v1520_v12  ;;  %v1505_v48 = vadd.f32 %v2904_v49, %v1483_v42  ;;  %v1462_v4 = vmul.f32 %v1950_v56, %v2856_v57  ;;  %v1434_v63 = vadd.f32 1e-05, %v1418_v50 }
 0x493   : > { %v1401_v58 = vpop.xlane.xlu1 %1400 }
 0x494   : > { %v1521_v47 = vmax.f32 %v1505_v48, 0.0  ;;  %v1484_v51 = vmul.f32 %v2898_v13, %v1462_v4  ;;  %1957 = vrsqrt.f32 %v1434_v63  ;;  %v1419_v3 = vmul.f32 0.0078125, %v1401_v58 }
 0x495   : > { %v1952_v55 = vpop.eup %1951 }
 0x496   : > { %1537 = vst [vmem:[%s2911_s18 + $0x38] sm:$0xff] %v1521_v47  ;;  %v1506_v6 = vadd.f32 %v2904_v49, %v1484_v51  ;;  %v1463_v43 = vmul.f32 %v1952_v55, %v2861_v2  ;;  %v1435_v28 = vadd.f32 1e-05, %v1419_v3 }
 0x497   : > { %v1403_v54 = vpop.xlane.xlu0 %1402 }
 0x498   : > { %v1522_v5 = vmax.f32 %v1506_v6, 0.0  ;;  %v1485_v57 = vmul.f32 %v2898_v13, %v1463_v43  ;;  %1959 = vrsqrt.f32 %v1435_v28  ;;  %v1420_v31 = vmul.f32 0.0078125, %v1403_v54 }
 0x499   : > { %v1954_v30 = vpop.eup %1953 }
 0x49a   : > { %1538 = vst [vmem:[%s2911_s18 + $0x40] sm:$0xff] %v1522_v5  ;;  %v1507_v8 = vadd.f32 %v2904_v49, %v1485_v57  ;;  %v1464_v34 = vmul.f32 %v1954_v30, %v2866_v22  ;;  %v1436_v10 = vadd.f32 1e-05, %v1420_v31 }
 0x49b   : > { %v1405_v19 = vpop.xlane.xlu1 %1404 }
 0x49c   : > { %v1523_v29 = vmax.f32 %v1507_v8, 0.0  ;;  %v1486_v2 = vmul.f32 %v2898_v13, %v1464_v34  ;;  %1961 = vrsqrt.f32 %v1436_v10  ;;  %v1421_v39 = vmul.f32 0.0078125, %v1405_v19 }
 0x49d   : > { %v1956_v23 = vpop.eup %1955 }
 0x49e   : > { %1539 = vst [vmem:[%s2911_s18 + $0x48] sm:$0xff] %v1523_v29  ;;  %v1508_v9 = vadd.f32 %v2904_v49, %v1486_v2  ;;  %v1465_v17 = vmul.f32 %v1956_v23, %v2871_v11  ;;  %v1437_v33 = vadd.f32 1e-05, %v1421_v39 }
 0x4a0   : > { %v1524_v52 = vmax.f32 %v1508_v9, 0.0  ;;  %v1487_v22 = vmul.f32 %v2898_v13, %v1465_v17  ;;  %1963 = vrsqrt.f32 %v1437_v33 }
 0x4a1   : > { %v1958_v53 = vpop.eup %1957 }
 0x4a2   : > { %1540 = vst [vmem:[%s2911_s18 + $0x50] sm:$0xff] %v1524_v52  ;;  %v1509_v1 = vadd.f32 %v2904_v49, %v1487_v22  ;;  %v1466_v59 = vmul.f32 %v1958_v53, %v2876_v14 }
 0x4a4   : > { %v1525_v40 = vmax.f32 %v1509_v1, 0.0  ;;  %v1488_v15 = vmul.f32 %v2898_v13, %v1466_v59 }
 0x4a5   : > { %v1960_v35 = vpop.eup %1959 }
 0x4a6   : > { %1541 = vst [vmem:[%s2911_s18 + $0x58] sm:$0xff] %v1525_v40  ;;  %v1510_v11 = vadd.f32 %v2904_v49, %v1488_v15  ;;  %v1467_v32 = vmul.f32 %v1960_v35, %v2881_v18 }
 0x4a8   : > { %v1526_v37 = vmax.f32 %v1510_v11, 0.0  ;;  %v1489_v46 = vmul.f32 %v2898_v13, %v1467_v32 }
 0x4a9   : > { %v1962_v62 = vpop.eup %1961 }
 0x4aa   : > { %1542 = vst [vmem:[%s2911_s18 + $0x60] sm:$0xff] %v1526_v37  ;;  %v1511_v14 = vadd.f32 %v2904_v49, %v1489_v46  ;;  %v1468_v61 = vmul.f32 %v1962_v62, %v2886_v7 }
 0x4ac   : > { %v1527_v27 = vmax.f32 %v1511_v14, 0.0  ;;  %v1490_v36 = vmul.f32 %v2898_v13, %v1468_v61 }
 0x4ad   : > { %v1964_v16 = vpop.eup %1963 }
 0x4ae   : > { %1543 = vst [vmem:[%s2911_s18 + $0x68] sm:$0xff] %v1527_v27  ;;  %v1512_v18 = vadd.f32 %v2904_v49, %v1490_v36  ;;  %v1469_v21 = vmul.f32 %v1964_v16, %v2891_v60 }
 0x4b0   : > { %v1528_v20 = vmax.f32 %v1512_v18, 0.0  ;;  %v1491_v24 = vmul.f32 %v2898_v13, %v1469_v21 }
 0x4b2   : > { %1544 = vst [vmem:[%s2911_s18 + $0x70] sm:$0xff] %v1528_v20  ;;  %v1513_v7 = vadd.f32 %v2904_v49, %v1491_v24 }
 0x4b4   : > { %v1529_v45 = vmax.f32 %v1513_v7, 0.0 }
 0x4b6   : > { %1545 = vst [vmem:[%s2911_s18 + $0x78] sm:$0xff] %v1529_v45 }
 0x4b7   : > { %2058 = shalt.err (!%p2055_p9)
}
 0x4b8   : > { %s2059_s1 = scalar_lea.hbm %s2976_s19, 2048  ;;  %s2063_s27 = scalar_lea.hbm %s3031_s9, 4096 }
 0x4b9   : > { %p2060_p13 = scmp.ne.s32.totalorder %s2976_s19, %s2059_s1  ;;  %p2064_p4 = scmp.lt.s32.totalorder %s2976_s19, %s3031_s9 }
 0x4ba   : > { %p2065_p8 = scmp.lt.s32.totalorder %s2063_s27, %s2059_s1 }
 0x4bb   : > { %p2061_p5 = pnand %p2060_p13, %p3056_p10 }
 0x4bc   : > { %p2066_p7 = por %p2065_p8, %p2064_p4 }
 0x4bd   : > { %p2062_p0 = pneg %p2061_p5 }
 0x4bf   : > { %p2067_p11 = pnand %p2066_p7, %p2062_p0 }
 0x4c1   : > { %2070 = shalt.err (!%p2067_p11)
}
 0x4c2   : > { %s2124_s29 = smov 128   ;;  %s2125_s14 = smov 8  }
 0x4c3   : > { %1789 = dma.vmem_to_hbm [thread:$0]  (%p3056_p10), %s2978_s17, 2048, %s2976_s19, %s1547_s24, %s2124_s29, %s2124_s29, %s2125_s14  }
 0x4c4 PF: > { %s1575_s23 = sand.u32 1, %s2101_s30   ;;  %p3057_p1 = scmp.ne.s32.totalorder %s3041_s16, 0 }
 0x4c5   : > { %p3058_p2 = scmp.ge.s32.totalorder %s2113_s12, 2  ;;  %s1576_s13 = scalar_lea.sflag [#allocation4], %s1575_s23 }
 0x4c7   : > { %p1803_p6 = pnand %p3058_p2, %p3057_p1 }
 0x4c9   : > { %p1804_p12 = pneg %p1803_p6 }
 0x4cb   : > { %2096 = dma.done.wait (%p1804_p12), %s1576_s13, 2048  }
 0x4cc   : > { %2098 = vsyncadd (%p1804_p12), %s1576_s13, 4294965248  ;;  %s3059_s26 = sld [smem:[#allocation12_spill]]  ;;  %p23_p3 = scmp.ge.s32.totalorder %s2251_s21, 4  }
 0x4cd   : > { %s3060_s30 = smov %s2105_s10  ;;  %s3061_s10 = smov %s2109_s11 }
 0x4ce   : > { %s3063_s12 = smov %s2251_s21  ;;  %25 = sbr.rel (!%p23_p3) target bundleno = 9 (0x9), region = 109 }
 0x4d2   : > { %s3062_s11 = smov %s3059_s26 }
 0x4d3   :  { %1581 = vsyncpa [#allocation3], 1 }
 0x4d4   :  { %1583 = vsyncpa [#allocation3 + $0x1], 1 }
 0x4d5   :  { %1584 = vsyncpa [#allocation6], 1 }
 0x4d6   :  { %1585 = vsyncpa [#allocation4], 1 }
 0x4d7   :  { %1587 = vsyncpa [#allocation4 + $0x1], 1 }

// kernel: tpu_custom_call.1
= control target key start
LH: loop header
LB: loop body
LE: loop exit
PB: predicated region body
PF: predicated region fallthrough
CT: control target
= control target key end

     0   :  { %s3022_s0 = inlined_call_operand.hbm [shape: bf16[256,128], index: 0, kind: input, shape index: {}]   ;;  %s3023_s1 = inlined_call_operand.hbm [shape: bf16[128,256], index: 1, kind: input, shape index: {}]   ;;  %s3024_s2 = inlined_call_operand.vmem [shape: f32[1,256], index: 2, kind: input, shape index: {}]   ;;  %s3025_s3 = inlined_call_operand.vmem [shape: f32[1,256], index: 3, kind: input, shape index: {}]   ;;  %s3026_s4 = inlined_call_operand.vmem [shape: f32[1,256], index: 4, kind: input, shape index: {}]   ;;  %s3027_s5 = inlined_call_operand.hbm [shape: bf16[256,128], index: 5, kind: input, shape index: {}]   ;;  %s3028_s6 = inlined_call_operand.vmem [shape: f32[1,128], index: 6, kind: input, shape index: {}]   ;;  %s3029_s7 = inlined_call_operand.vmem [shape: f32[1,128], index: 7, kind: input, shape index: {}]   ;;  %s3030_s8 = inlined_call_operand.vmem [shape: f32[1,128], index: 8, kind: input, shape index: {}]   ;;  %s3031_s9 = inlined_call_operand.hbm [shape: f32[256,128], index: 9, kind: output, shape index: {}]  }
   0x1   :  { %3038 = sst [smem:[#allocation13_spill]] %s3023_s1 }
   0x2   :  { %3039 = sst [smem:[#allocation14_spill]] %s3027_s5 }
   0x3   :  { %14 = vsyncpa [#allocation3], 0 }
   0x4   :  { %16 = vsyncpa [#allocation3 + $0x1], 0 }
   0x5   :  { %17 = vsyncpa [#allocation6], 0 }
   0x6   :  { %18 = vsyncpa [#allocation4], 0 }
   0x7   :  { %20 = vsyncpa [#allocation4 + $0x1], 0  ;;  %s2176_s30 = smov 0   ;;  %s2178_s10 = smov 0  }
   0x8   :  { %s2180_s11 = smov 0   ;;  %s2182_s12 = smov 0  }
   0x9 LB: > { %s2197_s13 = sadd.s32 4294967295, %s2113_s12   ;;  %s1652_s14 = sadd.s32 4294967294, %s2113_s12   ;;  %s2113_s12 = sphi %s2182_s12, %s3063_s12   ;;  %s2109_s11 = sphi %s2180_s11, %s3062_s11   ;;  %s2105_s10 = sphi %s2178_s10, %s3061_s10   ;;  %s2101_s30 = sphi %s2176_s30, %s3060_s30  }
   0xa   : > { %p46_p0 = scmp.ne.s32.totalorder %s2105_s10, %s2101_s30  ;;  %p3032_p1 = scmp.eq.s32.totalorder %s2197_s13, 0 }
   0xb   : > { %p244_p3 = scmp.eq.s32.totalorder %s1652_s14, 1  ;;  %p1653_p5 = scmp.ge.s32.totalorder %s2113_s12, 1 }
   0xc   : > { %p2206_p4 = por %p3032_p1, %p46_p0  ;;  %p251_p7 = scmp.lt.s32.totalorder %s2113_s12, 3 }
   0xd   : > { %p2211_p6 = por %p244_p3, %p46_p0  ;;  %s2115_s18 = smov [#allocation5]  }
   0xe   : > { %s3040_s15 = scalar_select %p2206_p4, 1, 0 }
   0xf   : > { %s3041_s16 = scalar_select %p2211_p6, 1, 0 }
  0x10   : > { %p2216_p8 = pnand %p1653_p5, %p251_p7  ;;  %s263_s19 = sshll.u32 %s2115_s18, 4  ;;  %s264_s19 = int_to_ptr.vmem [resolvable:$true] %s263_s19 }
  0x11   : > { %s2116_s21 = smov [#allocation7]   ;;  %s1976_s23 = scalar_lea.vmem %s264_s19, 2048 }
  0x12   : > { %s3042_s17 = scalar_select %p2216_p8, 1, 0 }
  0x13   : > { %p1791_p9 = pneg %p2216_p8  ;;  %s285_s22 = sshll.u32 %s2116_s21, 4  ;;  %s286_s22 = int_to_ptr.vmem [resolvable:$true] %s285_s22 }
  0x14   : > { %p1977_p13 = scmp.ne.s32.totalorder %s264_s19, %s1976_s23  ;;  %p1984_p5 = scmp.lt.s32.totalorder %s264_s19, %s264_s19 }
  0x15   : > { %p2225_p11 = pnand %p1791_p9, %p3032_p1  ;;  %p1985_p7 = scmp.lt.s32.totalorder %s1976_s23, %s1976_s23 }
  0x17   : > { %p1967_p12 = pneg %p2225_p11  ;;  %p1986_p10 = por %p1985_p7, %p1984_p5 }
  0x19   : > { %p1979_p0 = pnand %p1977_p13, %p1967_p12 }
  0x1b   : > { %p1980_p3 = pneg %p1979_p0 }
  0x1d   : > { %p1987_p9 = pnand %p1986_p10, %p1980_p3 }
  0x1f   : > { %1990 = shalt.err (!%p1987_p9)
}
  0x20   : > { %s2117_s24 = smov 128   ;;  %s2118_s25 = smov 8  }
  0x21   : > { %s3044_s1 = sld [smem:[#allocation13_spill]]  ;;  %s2002_s28 = scalar_lea.vmem %s286_s22, 2048 }
  0x22   : > { %p2003_p1 = scmp.ne.s32.totalorder %s286_s22, %s2002_s28  ;;  %p2010_p2 = scmp.lt.s32.totalorder %s286_s22, %s286_s22 }
  0x23   : > { %p2011_p6 = scmp.lt.s32.totalorder %s2002_s28, %s2002_s28 }
  0x24   : > { %p2005_p13 = pnand %p2003_p1, %p1967_p12 }
  0x25   : > { %p2012_p5 = por %p2011_p6, %p2010_p2 }
  0x26   : > { %p2006_p0 = pneg %p2005_p13 }
  0x27   : > { %1794 = dma.hbm_to_vmem [thread:$0]  (!%p2225_p11), %s3044_s1, 2048, %s264_s19, [#allocation6], %s2117_s24, %s2117_s24, %s2118_s25  }
  0x28   : > { %p2013_p10 = pnand %p2012_p5, %p2006_p0 }
  0x2a   : > { %2016 = shalt.err (!%p2013_p10)
}
  0x2b   : > { %s3033_s29 = smov 64   ;;  %s3034_s14 = smov 4  }
  0x2c   : > { %s3045_s5 = sld [smem:[#allocation14_spill]]  ;;  %s2251_s21 = sadd.s32 1, %s2113_s12  }
  0x2d   : > { %s30_s23 = ssub.s32 %s2113_s12, %s2251_s21  ;;  %s33_s24 = sadd.s32 1, %s2109_s11 }
  0x2e   : > { %p31_p1 = scmp.eq.s32.totalorder %s30_s23, 0  ;;  %p40_p2 = scmp.ne.s32.totalorder %s2109_s11, %s2105_s10 }
  0x2f   : > { %p41_p6 = scmp.eq.s32.totalorder %s2113_s12, 0  ;;  %p3047_p3 = scmp.eq.s32.totalorder %s2197_s13, 1 }
  0x30   : > { %s2260_s25 = scalar_select %p31_p1, %s2109_s11, %s33_s24  }
  0x31   : > { %p42_p12 = por %p41_p6, %p40_p2  ;;  %p2264_p7 = por %p3047_p3, %p40_p2 }
  0x32   : > { %1797 = dma.hbm_to_vmem [thread:$0]  (!%p2225_p11), %s3045_s5, 2048, %s286_s22, [#allocation6], %s3033_s29, %s3033_s29, %s3034_s14  }
  0x33   : > { %3046 = sst [smem:[#allocation12_spill]] %s2260_s25  ;;  %p1808_p9 = scmp.lt.s32.totalorder %s2113_s12, 2 }
  0x34   : > { %s3048_s20 = scalar_select %p2264_p7, 1, 0 }
  0x35   : > { %s308_s26 = sand.u32 1, %s2109_s11   ;;  %s1713_s22 = sshll.u32 %s2113_s12, 10 }
  0x36   : > { %s1657_s27 = sshll.u32 %s308_s26, 6  ;;  %s2274_s19 = scalar_lea.hbm %s3022_s0, %s1713_s22 }
  0x37   : > { %s312_s23 = scalar_lea.vmem [#allocation2], %s1657_s27  ;;  %p2278_p11 = pnand %p1808_p9, %p42_p12 }
  0x38   : > { %s319_s24 = sshll.u32 %s312_s23, 4  ;;  %s2282_s14 = scalar_lea.sflag [#allocation3], %s308_s26  ;;  %s2276_s24 = int_to_ptr.vmem [resolvable:$true] %s319_s24 }
  0x39   : > { %s2017_s1 = scalar_lea.hbm %s2274_s19, 1024  ;;  %p2019_p0 = pneg %p2278_p11 }
  0x3a   : > { %p2018_p13 = scmp.ne.s32.totalorder %s2274_s19, %s2017_s1  ;;  %s2022_s27 = scalar_lea.hbm %s3022_s0, 2048 }
  0x3b   : > { %p2023_p1 = scmp.lt.s32.totalorder %s2274_s19, %s3022_s0  ;;  %p2024_p2 = scmp.lt.s32.totalorder %s2022_s27, %s2017_s1 }
  0x3c   : > { %p2020_p5 = pnand %p2019_p0, %p2018_p13 }
  0x3d   : > { %p2025_p6 = por %p2024_p2, %p2023_p1 }
  0x3e   : > { %p2021_p10 = pneg %p2020_p5 }
  0x40   : > { %p2026_p12 = pnand %p2025_p6, %p2021_p10 }
  0x42   : > { %2029 = shalt.err (!%p2026_p12)
}
  0x43   : > { %s2030_s26 = scalar_lea.vmem %s2276_s24, 1024  ;;  %s2121_s5 = smov [#allocation2]  }
  0x44   : > { %p2031_p3 = scmp.ne.s32.totalorder %s2276_s24, %s2030_s26  ;;  %s2035_s25 = sshll.u32 %s2121_s5, 4  ;;  %s2036_s25 = int_to_ptr.vmem [resolvable:$false] %s2035_s25 }
  0x45   : > { %s2037_s22 = scalar_lea.vmem %s2036_s25, 2048  ;;  %p2038_p5 = scmp.lt.s32.totalorder %s2276_s24, %s2036_s25 }
  0x46   : > { %p2033_p9 = pnand %p2031_p3, %p2019_p0  ;;  %p2039_p7 = scmp.lt.s32.totalorder %s2037_s22, %s2030_s26 }
  0x48   : > { %p2034_p13 = pneg %p2033_p9  ;;  %p2040_p4 = por %p2039_p7, %p2038_p5 }
  0x4a   : > { %p2041_p8 = pnand %p2040_p4, %p2034_p13 }
  0x4c   : > { %2044 = shalt.err (!%p2041_p8)
}
  0x4d   : > { %s3050_s1 = smov 4   ;;  %s3051_s28 = smov 64  }
  0x4e   : > { %1801 = dma.hbm_to_vmem [thread:$0]  (!%p2278_p11), %s2274_s19, 1024, %s2276_s24, %s2282_s14, %s3051_s28, %s3051_s28, %s3050_s1  }
  0x4f   : > { %p3052_p0 = scmp.ne.s32.totalorder %s3042_s17, 0 }
  0x50   : > { %s2309_s5 = sand.u32 (!%p3052_p0), 1, %s2105_s10   ;;  %p3053_p4 = scmp.ne.s32.totalorder (!%p3052_p0), %s3040_s15, 0 }
  0x51   : > { %331 = sbr.rel (%p3052_p0) target bundleno = 1220 (0x4c4), region = 56  ;;  %s1661_s25 = sshll.u32 (!%p3052_p0), %s2309_s5, 6 }
  0x52   : > { %s334_s27 = scalar_lea.sflag (!%p3052_p0), [#allocation3], %s2309_s5  ;;  %s2313_s18 = scalar_lea.vmem (!%p3052_p0), [#allocation2], %s1661_s25 }
  0x56   : > { %2088 = dma.done.wait (%p3053_p4), %s334_s27, 1024  }
  0x57   : > { %2090 = vsyncadd (%p3053_p4), %s334_s27, 4294966272  ;;  %p3054_p8 = scmp.eq.s32.totalorder %s2197_s13, 0 }
  0x59   : > { %2092 = dma.done.wait (%p3054_p8), [#allocation6], 4096   ;;  %p3055_p7 = pmov %p3054_p8 }
  0x5a   : > { %v2122_v0 = vmov 0   ;;  %v1853_v1 = vld [vmem:[#allocation5 + $0x74] ss:$8 sps:$4 sm:$0xff]   ;;  %v1855_v2 = vld [vmem:[#allocation5 + $0x70] ss:$8 sps:$4 sm:$0xff]   ;;  %v1877_v17 = vld [vmem:[%s2313_s18] sm:$0xff]   ;;  %v417_v25 = vlaneseq }
  0x5b   : > { %2094 = vsyncadd (%p3055_p7), [#allocation6], 4294963200  ;;  %587 = vmatprep.mubr.bf16.mxu0 %v2122_v0  ;;  %555 = vmatprep.subr.bf16.mxu0 %v1853_v1  ;;  %v1856_v3 = vld [vmem:[#allocation5 + $0x64] ss:$8 sps:$4 sm:$0xff]   ;;  %v1858_v4 = vld [vmem:[#allocation5 + $0x60] ss:$8 sps:$4 sm:$0xff]  }
  0x5c   : > { %556 = vmatpush1.bf16.msra.mxu0 %v1855_v2  ;;  %v1859_v5 = vld [vmem:[#allocation5 + $0x54] ss:$8 sps:$4 sm:$0xff]   ;;  %v1861_v6 = vld [vmem:[#allocation5 + $0x50] ss:$8 sps:$4 sm:$0xff]   ;;  %v1862_v7 = vld [vmem:[#allocation5 + $0x44] ss:$8 sps:$4 sm:$0xff]  }
  0x5d   : > { %557 = vmatprep.subr.bf16.mxu0 %v1856_v3  ;;  %v1864_v8 = vld [vmem:[#allocation5 + $0x40] ss:$8 sps:$4 sm:$0xff]   ;;  %v1865_v9 = vld [vmem:[#allocation5 + $0x34] ss:$8 sps:$4 sm:$0xff]   ;;  %v1867_v10 = vld [vmem:[#allocation5 + $0x30] ss:$8 sps:$4 sm:$0xff]  }
  0x5e   : > { %v1868_v11 = vld [vmem:[#allocation5 + $0x24] ss:$8 sps:$4 sm:$0xff]   ;;  %v1870_v12 = vld [vmem:[#allocation5 + $0x20] ss:$8 sps:$4 sm:$0xff]   ;;  %v1871_v13 = vld [vmem:[#allocation5 + $0x14] ss:$8 sps:$4 sm:$0xff]  }
  0x5f   : > { %v1873_v14 = vld [vmem:[#allocation5 + $0x10] ss:$8 sps:$4 sm:$0xff]   ;;  %v1874_v15 = vld [vmem:[#allocation5 + $0x4] ss:$8 sps:$4 sm:$0xff]   ;;  %v1876_v16 = vld [vmem:[#allocation5] ss:$8 sps:$4 sm:$0xff]  }
  0x60   : > { %558 = vmatpush1.bf16.msra.mxu0 %v1858_v4  ;;  %v1878_v18 = vld [vmem:[%s2313_s18 + $0x8] sm:$0xff]   ;;  %v1879_v19 = vld [vmem:[%s2313_s18 + $0x10] sm:$0xff]   ;;  %v1880_v20 = vld [vmem:[%s2313_s18 + $0x18] sm:$0xff]   ;;  %v418_v26 = vshrl.u32 %v417_v25, 7  ;;  %s1664_s27 = sshll.u32 %s2309_s5, 7  ;;  %s1714_s15 = sshll.u32 %s2197_s13, 11 }
  0x61   : > { %559 = vmatprep.subr.bf16.mxu0 %v1859_v5  ;;  %v1881_v21 = vld [vmem:[%s2313_s18 + $0x20] sm:$0xff]   ;;  %v1882_v22 = vld [vmem:[%s2313_s18 + $0x28] sm:$0xff]   ;;  %v1883_v23 = vld [vmem:[%s2313_s18 + $0x30] sm:$0xff]   ;;  %s2976_s19 = scalar_lea.hbm %s3031_s9, %s1714_s15  ;;  %s1547_s24 = scalar_lea.sflag [#allocation4], %s2309_s5 }
  0x62   : > { %v1884_v24 = vld [vmem:[%s2313_s18 + $0x38] sm:$0xff]   ;;  %v2331_v27 = vsub.s32 0, %v418_v26  ;;  %v2333_v28 = vsub.s32 1, %v418_v26  ;;  %v415_v29 = vld [vmem:[%s3024_s2] sm:$0x3]  ;;  %s2911_s18 = scalar_lea.vmem [#allocation8], %s1664_s27 }
  0x63   : > { %s1560_s17 = sshll.u32 %s2911_s18, 4  ;;  %p3056_p10 = scmp.ne.s32.totalorder %s3048_s20, 0  ;;  %s2978_s17 = int_to_ptr.vmem [resolvable:$true] %s1560_s17 }
  0x64   : > { %560 = vmatpush1.bf16.msra.mxu0 %v1861_v6  ;;  %v2339_v30 = vrot.slane %v415_v29, %v2331_v27  ;;  %v2342_v31 = vrot.slane %v415_v29, %v2333_v28  ;;  %s2045_s23 = scalar_lea.vmem %s2978_s17, 2048  ;;  %s2123_s13 = smov [#allocation8]  }
  0x65   : > { %561 = vmatprep.subr.bf16.mxu0 %v1862_v7  ;;  %p2046_p11 = scmp.ne.s32.totalorder %s2978_s17, %s2045_s23  ;;  %s2049_s26 = sshll.u32 %s2123_s13, 4  ;;  %s2050_s26 = int_to_ptr.vmem [resolvable:$false] %s2049_s26 }
  0x66   : > { %s2051_s22 = scalar_lea.vmem %s2050_s26, 4096  ;;  %p2052_p6 = scmp.lt.s32.totalorder %s2978_s17, %s2050_s26 }
  0x67   : > { %p2047_p1 = pnand %p2046_p11, %p3056_p10  ;;  %p2053_p12 = scmp.lt.s32.totalorder %s2051_s22, %s2045_s23 }
  0x68   : > { %562 = vmatpush1.bf16.msra.mxu0 %v1864_v8 }
  0x69   : > { %563 = vmatprep.subr.bf16.mxu0 %v1865_v9  ;;  %p2048_p2 = pneg %p2047_p1  ;;  %p2054_p3 = por %p2053_p12, %p2052_p6 }
  0x6b   : > { %p2055_p9 = pnand %p2054_p3, %p2048_p2 }
  0x6c   : > { %564 = vmatpush1.bf16.msra.mxu0 %v1867_v10 }
  0x6d   : > { %565 = vmatprep.subr.bf16.mxu0 %v1868_v11 }
  0x70   : > { %566 = vmatpush1.bf16.msra.mxu0 %v1870_v12 }
  0x71   : > { %567 = vmatprep.subr.bf16.mxu0 %v1871_v13 }
  0x74   : > { %568 = vmatpush1.bf16.msra.mxu0 %v1873_v14 }
  0x75   : > { %569 = vmatprep.subr.bf16.mxu0 %v1874_v15 }
  0x78   : > { %570 = vmatpush1.bf16.msra.mxu0 %v1876_v16 }
  0x7b   : > { %588 = vmatmul.mubr.bf16.vlgmr.msra.gmra.mxu0 %v1877_v17 }
  0x7c   : > { %597 = vmatprep.mubr.bf16.mxu0 %v2122_v0 }
  0x83   : > { %598 = vmatmul.mubr.bf16.gmra.mxu0 %v1878_v18 }
  0x84   : > { %607 = vmatprep.mubr.bf16.mxu0 %v2122_v0 }
  0x8b   : > { %608 = vmatmul.mubr.bf16.gmra.mxu0 %v1879_v19 }
  0x8c   : > { %617 = vmatprep.mubr.bf16.mxu0 %v2122_v0 }
  0x93   : > { %618 = vmatmul.mubr.bf16.gmra.mxu0 %v1880_v20 }
  0x94   : > { %627 = vmatprep.mubr.bf16.mxu0 %v2122_v0 }
  0x9b   : > { %628 = vmatmul.mubr.bf16.gmra.mxu0 %v1881_v21 }
  0x9c   : > { %637 = vmatprep.mubr.bf16.mxu0 %v2122_v0 }
  0xa3   : > { %638 = vmatmul.mubr.bf16.gmra.mxu0 %v1882_v22 }
  0xa4   : > { %647 = vmatprep.mubr.bf16.mxu0 %v2122_v0 }
  0xab   : > { %648 = vmatmul.mubr.bf16.gmra.mxu0 %v1883_v23 }
  0xac   : > { %657 = vmatprep.mubr.bf16.mxu0 %v2122_v0 }
  0xb3   : > { %658 = vmatmul.mubr.bf16.gmra.mxu0 %v1884_v24 }
 0x13b   : > { %v589_v32 = vpop.f32.mrf.mxu0 }
 0x13c   : > { %v2345_v34 = vadd.f32 %v589_v32, %v2339_v30 }
 0x13d   : > { %v591_v33 = vpop.f32.mrf.mxu0 }
 0x13e   : > { %v2348_v35 = vadd.f32 %v591_v33, %v2342_v31 }
 0x13f   : > { %v593_v36 = vpop.f32.mrf.mxu0 }
 0x140   : > { %v670_v37 = vadd.f32 %v2348_v35, %v2345_v34  ;;  %v2353_v39 = vadd.f32 %v593_v36, %v2339_v30 }
 0x141   : > { %v595_v38 = vpop.f32.mrf.mxu0 }
 0x142   : > { %v2356_v40 = vadd.f32 %v595_v38, %v2342_v31  ;;  %671 = vadd.xlane.f32.xlu0 %v670_v37 }
 0x143   : > { %v599_v41 = vpop.f32.mrf.mxu0 }
 0x144   : > { %v673_v42 = vadd.f32 %v2356_v40, %v2353_v39  ;;  %v2361_v44 = vadd.f32 %v599_v41, %v2339_v30 }
 0x145   : > { %v601_v43 = vpop.f32.mrf.mxu0 }
 0x146   : > { %v2364_v45 = vadd.f32 %v601_v43, %v2342_v31  ;;  %674 = vadd.xlane.f32.xlu0 %v673_v42 }
 0x147   : > { %v603_v46 = vpop.f32.mrf.mxu0 }
 0x148   : > { %v676_v47 = vadd.f32 %v2364_v45, %v2361_v44  ;;  %v2369_v49 = vadd.f32 %v603_v46, %v2339_v30 }
 0x149   : > { %v605_v48 = vpop.f32.mrf.mxu0 }
 0x14a   : > { %v2372_v50 = vadd.f32 %v605_v48, %v2342_v31  ;;  %677 = vadd.xlane.f32.xlu1 %v676_v47 }
 0x14b   : > { %v609_v51 = vpop.f32.mrf.mxu0 }
 0x14c   : > { %v679_v52 = vadd.f32 %v2372_v50, %v2369_v49  ;;  %v2377_v54 = vadd.f32 %v609_v51, %v2339_v30 }
 0x14d   : > { %v611_v53 = vpop.f32.mrf.mxu0 }
 0x14e   : > { %v2380_v55 = vadd.f32 %v611_v53, %v2342_v31  ;;  %680 = vadd.xlane.f32.xlu1 %v679_v52 }
 0x14f   : > { %v613_v56 = vpop.f32.mrf.mxu0 }
 0x150   : > { %v682_v57 = vadd.f32 %v2380_v55, %v2377_v54  ;;  %v2385_v59 = vadd.f32 %v613_v56, %v2339_v30 }
 0x151   : > { %v615_v58 = vpop.f32.mrf.mxu0 }
 0x152   : > { %v2388_v60 = vadd.f32 %v615_v58, %v2342_v31  ;;  %683 = vadd.xlane.f32.xlu0 %v682_v57 }
 0x153   : > { %v619_v61 = vpop.f32.mrf.mxu0 }
 0x154   : > { %v685_v62 = vadd.f32 %v2388_v60, %v2385_v59  ;;  %v2393_v0 = vadd.f32 %v619_v61, %v2339_v30 }
 0x155   : > { %v621_v63 = vpop.f32.mrf.mxu0 }
 0x156   : > { %v2396_v1 = vadd.f32 %v621_v63, %v2342_v31  ;;  %686 = vadd.xlane.f32.xlu1 %v685_v62 }
 0x157   : > { %v623_v2 = vpop.f32.mrf.mxu0 }
 0x158   : > { %v688_v3 = vadd.f32 %v2396_v1, %v2393_v0  ;;  %v2401_v5 = vadd.f32 %v623_v2, %v2339_v30 }
 0x159   : > { %v625_v4 = vpop.f32.mrf.mxu0 }
 0x15a   : > { %v2404_v6 = vadd.f32 %v625_v4, %v2342_v31  ;;  %689 = vadd.xlane.f32.xlu0 %v688_v3 }
 0x15b   : > { %v629_v7 = vpop.f32.mrf.mxu0 }
 0x15c   : > { %v691_v8 = vadd.f32 %v2404_v6, %v2401_v5  ;;  %v2409_v10 = vadd.f32 %v629_v7, %v2339_v30 }
 0x15d   : > { %v631_v9 = vpop.f32.mrf.mxu0 }
 0x15e   : > { %v2412_v11 = vadd.f32 %v631_v9, %v2342_v31  ;;  %692 = vadd.xlane.f32.xlu1 %v691_v8 }
 0x15f   : > { %v633_v12 = vpop.f32.mrf.mxu0 }
 0x160   : > { %v694_v13 = vadd.f32 %v2412_v11, %v2409_v10  ;;  %v2417_v15 = vadd.f32 %v633_v12, %v2339_v30 }
 0x161   : > { %v635_v14 = vpop.f32.mrf.mxu0 }
 0x162   : > { %v2420_v16 = vadd.f32 %v635_v14, %v2342_v31  ;;  %695 = vadd.xlane.f32.xlu0 %v694_v13 }
 0x163   : > { %v639_v17 = vpop.f32.mrf.mxu0 }
 0x164   : > { %v697_v18 = vadd.f32 %v2420_v16, %v2417_v15  ;;  %v2425_v20 = vadd.f32 %v639_v17, %v2339_v30 }
 0x165   : > { %v641_v19 = vpop.f32.mrf.mxu0 }
 0x166   : > { %v2428_v21 = vadd.f32 %v641_v19, %v2342_v31  ;;  %698 = vadd.xlane.f32.xlu1 %v697_v18 }
 0x167   : > { %v643_v22 = vpop.f32.mrf.mxu0 }
 0x168   : > { %v700_v23 = vadd.f32 %v2428_v21, %v2425_v20  ;;  %v2433_v25 = vadd.f32 %v643_v22, %v2339_v30 }
 0x169   : > { %v645_v24 = vpop.f32.mrf.mxu0 }
 0x16a   : > { %v2436_v26 = vadd.f32 %v645_v24, %v2342_v31  ;;  %701 = vadd.xlane.f32.xlu0 %v700_v23 }
 0x16b   : > { %v649_v29 = vpop.f32.mrf.mxu0 }
 0x16c   : > { %v703_v32 = vadd.f32 %v2436_v26, %v2433_v25  ;;  %v2441_v36 = vadd.f32 %v649_v29, %v2339_v30 }
 0x16d   : > { %v651_v33 = vpop.f32.mrf.mxu0 }
 0x16e   : > { %v2444_v37 = vadd.f32 %v651_v33, %v2342_v31  ;;  %704 = vadd.xlane.f32.xlu1 %v703_v32 }
 0x16f   : > { %v653_v38 = vpop.f32.mrf.mxu0 }
 0x170   : > { %v706_v41 = vadd.f32 %v2444_v37, %v2441_v36  ;;  %v2449_v43 = vadd.f32 %v653_v38, %v2339_v30 }
 0x171   : > { %v655_v42 = vpop.f32.mrf.mxu0 }
 0x172   : > { %v2452_v46 = vadd.f32 %v655_v42, %v2342_v31  ;;  %707 = vadd.xlane.f32.xlu0 %v706_v41 }
 0x173   : > { %v659_v47 = vpop.f32.mrf.mxu0 }
 0x174   : > { %v709_v48 = vadd.f32 %v2452_v46, %v2449_v43  ;;  %v2457_v52 = vadd.f32 %v659_v47, %v2339_v30  ;;  %v1885_v47 = vld [vmem:[#allocation7 + $0x78] sm:$0xff]  }
 0x175   : > { %v661_v51 = vpop.f32.mrf.mxu0  ;;  %1715 = vmatprep.subr.bf16.mxu1 %v1885_v47  ;;  %v1893_v47 = vld [vmem:[#allocation7 + $0x58] sm:$0xff]  }
 0x176   : > { %v2460_v53 = vadd.f32 %v661_v51, %v2342_v31  ;;  %710 = vadd.xlane.f32.xlu1 %v709_v48 }
 0x177   : > { %v663_v56 = vpop.f32.mrf.mxu0 }
 0x178   : > { %v712_v57 = vadd.f32 %v2460_v53, %v2457_v52  ;;  %v2465_v61 = vadd.f32 %v663_v56, %v2339_v30 }
 0x179   : > { %v665_v58 = vpop.f32.mrf.mxu0 }
 0x17a   : > { %v2468_v62 = vadd.f32 %v665_v58, %v2342_v31  ;;  %713 = vadd.xlane.f32.xlu0 %v712_v57 }
 0x17c   : > { %v715_v63 = vadd.f32 %v2468_v62, %v2465_v61 }
 0x17e   : > { %716 = vadd.xlane.f32.xlu1 %v715_v63 }
 0x1cb   : > { %v672_v2 = vpop.xlane.xlu0 %671 }
 0x1cc   : > { %v718_v3 = vmul.f32 0.00390625, %v672_v2  ;;  %v1887_v2 = vld [vmem:[#allocation7 + $0x70] sm:$0xff]  }
 0x1ce   : > { %v2473_v4 = vsub.f32 %v2345_v34, %v718_v3  ;;  %v2476_v7 = vsub.f32 %v2348_v35, %v718_v3 }
 0x1cf   : > { %v675_v8 = vpop.xlane.xlu0 %674 }
 0x1d0   : > { %v719_v9 = vmul.f32 0.00390625, %v675_v8  ;;  %v766_v30 = vmul.f32 %v2473_v4, %v2473_v4  ;;  %v767_v31 = vmul.f32 %v2476_v7, %v2476_v7  ;;  %v1888_v8 = vld [vmem:[#allocation7 + $0x30] sm:$0xff]  }
 0x1d2   : > { %v2483_v12 = vsub.f32 %v2353_v39, %v719_v9  ;;  %v2486_v13 = vsub.f32 %v2356_v40, %v719_v9  ;;  %v798_v14 = vadd.f32 %v767_v31, %v766_v30 }
 0x1d3   : > { %v678_v34 = vpop.xlane.xlu1 %677 }
 0x1d4   : > { %v720_v17 = vmul.f32 0.00390625, %v678_v34  ;;  %799 = vadd.xlane.f32.xlu0 %v798_v14  ;;  %v768_v35 = vmul.f32 %v2483_v12, %v2483_v12  ;;  %v769_v18 = vmul.f32 %v2486_v13, %v2486_v13  ;;  %v1889_v34 = vld [vmem:[#allocation7 + $0x68] sm:$0xff]  }
 0x1d6   : > { %v2493_v19 = vsub.f32 %v2361_v44, %v720_v17  ;;  %v2496_v22 = vsub.f32 %v2364_v45, %v720_v17  ;;  %v801_v39 = vadd.f32 %v769_v18, %v768_v35  ;;  %v1890_v35 = vld [vmem:[#allocation7 + $0x28] sm:$0xff]  }
 0x1d7   : > { %v681_v23 = vpop.xlane.xlu1 %680 }
 0x1d8   : > { %v721_v40 = vmul.f32 0.00390625, %v681_v23  ;;  %802 = vadd.xlane.f32.xlu1 %v801_v39  ;;  %v770_v24 = vmul.f32 %v2493_v19, %v2493_v19  ;;  %v771_v29 = vmul.f32 %v2496_v22, %v2496_v22 }
 0x1da   : > { %v2503_v32 = vsub.f32 %v2369_v49, %v721_v40  ;;  %v2506_v33 = vsub.f32 %v2372_v50, %v721_v40  ;;  %v804_v44 = vadd.f32 %v771_v29, %v770_v24  ;;  %v1886_v50 = vld [vmem:[#allocation7 + $0x38] sm:$0xff]   ;;  %v1891_v24 = vld [vmem:[#allocation7 + $0x60] sm:$0xff]  }
 0x1db   : > { %v684_v38 = vpop.xlane.xlu0 %683  ;;  %1716 = vmatpush3.bf16.msra.mxu1 %v1886_v50  ;;  %v1894_v50 = vld [vmem:[#allocation7 + $0x18] sm:$0xff]  }
 0x1dc   : > { %v722_v45 = vmul.f32 0.00390625, %v684_v38  ;;  %805 = vadd.xlane.f32.xlu0 %v804_v44  ;;  %v772_v41 = vmul.f32 %v2503_v32, %v2503_v32  ;;  %v773_v42 = vmul.f32 %v2506_v33, %v2506_v33  ;;  %1717 = vmatprep.subr.bf16.mxu1 %v1887_v2  ;;  %v1892_v44 = vld [vmem:[#allocation7 + $0x20] sm:$0xff]   ;;  %v1895_v2 = vld [vmem:[#allocation7 + $0x50] sm:$0xff]  }
 0x1de   : > { %v2513_v48 = vsub.f32 %v2377_v54, %v722_v45  ;;  %v2516_v49 = vsub.f32 %v2380_v55, %v722_v45  ;;  %v807_v51 = vadd.f32 %v773_v42, %v772_v41 }
 0x1df   : > { %v687_v56 = vpop.xlane.xlu1 %686  ;;  %1718 = vmatpush3.bf16.msra.mxu1 %v1888_v8  ;;  %v1896_v8 = vld [vmem:[#allocation7 + $0x10] sm:$0xff]  }
 0x1e0   : > { %v723_v57 = vmul.f32 0.00390625, %v687_v56  ;;  %808 = vadd.xlane.f32.xlu1 %v807_v51  ;;  %v774_v58 = vmul.f32 %v2513_v48, %v2513_v48  ;;  %v775_v63 = vmul.f32 %v2516_v49, %v2516_v49  ;;  %1719 = vmatprep.subr.bf16.mxu1 %v1889_v34  ;;  %v1897_v34 = vld [vmem:[#allocation7 + $0x48] sm:$0xff]  }
 0x1e2   : > { %v2523_v54 = vsub.f32 %v2385_v59, %v723_v57  ;;  %v2526_v55 = vsub.f32 %v2388_v60, %v723_v57  ;;  %v810_v3 = vadd.f32 %v775_v63, %v774_v58 }
 0x1e3   : > { %v690_v9 = vpop.xlane.xlu0 %689  ;;  %1720 = vmatpush3.bf16.msra.mxu1 %v1890_v35  ;;  %v1898_v35 = vld [vmem:[#allocation7 + $0x8] sm:$0xff]  }
 0x1e4   : > { %v724_v30 = vmul.f32 0.00390625, %v690_v9  ;;  %811 = vadd.xlane.f32.xlu0 %v810_v3  ;;  %v776_v31 = vmul.f32 %v2523_v54, %v2523_v54  ;;  %v777_v14 = vmul.f32 %v2526_v55, %v2526_v55  ;;  %1721 = vmatprep.subr.bf16.mxu1 %v1891_v24  ;;  %v1899_v24 = vld [vmem:[#allocation7 + $0x40] sm:$0xff]  }
 0x1e6   : > { %v2533_v59 = vsub.f32 %v2393_v0, %v724_v30  ;;  %v2536_v60 = vsub.f32 %v2396_v1, %v724_v30  ;;  %v813_v17 = vadd.f32 %v777_v14, %v776_v31 }
 0x1e7   : > { %v693_v18 = vpop.xlane.xlu1 %692  ;;  %1722 = vmatpush3.bf16.msra.mxu1 %v1892_v44  ;;  %v1900_v44 = vld [vmem:[#allocation7] sm:$0xff]  }
 0x1e8   : > { %v725_v39 = vmul.f32 0.00390625, %v693_v18  ;;  %814 = vadd.xlane.f32.xlu1 %v813_v17  ;;  %v778_v23 = vmul.f32 %v2533_v59, %v2533_v59  ;;  %v779_v40 = vmul.f32 %v2536_v60, %v2536_v60  ;;  %1723 = vmatprep.subr.bf16.mxu1 %v1893_v47 }
 0x1ea   : > { %v2543_v0 = vsub.f32 %v2401_v5, %v725_v39  ;;  %v2546_v1 = vsub.f32 %v2404_v6, %v725_v39  ;;  %v816_v29 = vadd.f32 %v779_v40, %v778_v23 }
 0x1eb   : > { %v696_v38 = vpop.xlane.xlu0 %695  ;;  %1724 = vmatpush3.bf16.msra.mxu1 %v1894_v50 }
 0x1ec   : > { %v726_v45 = vmul.f32 0.00390625, %v696_v38  ;;  %817 = vadd.xlane.f32.xlu0 %v816_v29  ;;  %v780_v41 = vmul.f32 %v2543_v0, %v2543_v0  ;;  %v781_v42 = vmul.f32 %v2546_v1, %v2546_v1  ;;  %1725 = vmatprep.subr.bf16.mxu1 %v1895_v2 }
 0x1ee   : > { %v2553_v5 = vsub.f32 %v2409_v10, %v726_v45  ;;  %v2556_v6 = vsub.f32 %v2412_v11, %v726_v45  ;;  %v819_v51 = vadd.f32 %v781_v42, %v780_v41 }
 0x1ef   : > { %v699_v56 = vpop.xlane.xlu1 %698  ;;  %1726 = vmatpush3.bf16.msra.mxu1 %v1896_v8 }
 0x1f0   : > { %v727_v57 = vmul.f32 0.00390625, %v699_v56  ;;  %820 = vadd.xlane.f32.xlu1 %v819_v51  ;;  %v782_v58 = vmul.f32 %v2553_v5, %v2553_v5  ;;  %v783_v63 = vmul.f32 %v2556_v6, %v2556_v6  ;;  %1727 = vmatprep.subr.bf16.mxu1 %v1897_v34 }
 0x1f2   : > { %v2563_v10 = vsub.f32 %v2417_v15, %v727_v57  ;;  %v2566_v11 = vsub.f32 %v2420_v16, %v727_v57  ;;  %v822_v3 = vadd.f32 %v783_v63, %v782_v58 }
 0x1f3   : > { %v702_v9 = vpop.xlane.xlu0 %701  ;;  %1728 = vmatpush3.bf16.msra.mxu1 %v1898_v35 }
 0x1f4   : > { %v728_v30 = vmul.f32 0.00390625, %v702_v9  ;;  %823 = vadd.xlane.f32.xlu0 %v822_v3  ;;  %v784_v31 = vmul.f32 %v2563_v10, %v2563_v10  ;;  %v785_v14 = vmul.f32 %v2566_v11, %v2566_v11  ;;  %1729 = vmatprep.subr.bf16.mxu1 %v1899_v24 }
 0x1f6   : > { %v2573_v15 = vsub.f32 %v2425_v20, %v728_v30  ;;  %v2576_v16 = vsub.f32 %v2428_v21, %v728_v30  ;;  %v825_v17 = vadd.f32 %v785_v14, %v784_v31 }
 0x1f7   : > { %v705_v18 = vpop.xlane.xlu1 %704  ;;  %1730 = vmatpush3.bf16.msra.mxu1 %v1900_v44 }
 0x1f8   : > { %v729_v39 = vmul.f32 0.00390625, %v705_v18  ;;  %826 = vadd.xlane.f32.xlu1 %v825_v17  ;;  %v786_v23 = vmul.f32 %v2573_v15, %v2573_v15  ;;  %v787_v40 = vmul.f32 %v2576_v16, %v2576_v16 }
 0x1fa   : > { %v2583_v20 = vsub.f32 %v2433_v25, %v729_v39  ;;  %v2586_v21 = vsub.f32 %v2436_v26, %v729_v39  ;;  %v828_v29 = vadd.f32 %v787_v40, %v786_v23 }
 0x1fb   : > { %v708_v38 = vpop.xlane.xlu0 %707 }
 0x1fc   : > { %v730_v45 = vmul.f32 0.00390625, %v708_v38  ;;  %829 = vadd.xlane.f32.xlu0 %v828_v29  ;;  %v788_v41 = vmul.f32 %v2583_v20, %v2583_v20  ;;  %v789_v42 = vmul.f32 %v2586_v21, %v2586_v21 }
 0x1fe   : > { %v2593_v47 = vsub.f32 %v2441_v36, %v730_v45  ;;  %v2596_v25 = vsub.f32 %v2444_v37, %v730_v45  ;;  %v831_v26 = vadd.f32 %v789_v42, %v788_v41 }
 0x1ff   : > { %v711_v51 = vpop.xlane.xlu1 %710 }
 0x200   : > { %v731_v50 = vmul.f32 0.00390625, %v711_v51  ;;  %832 = vadd.xlane.f32.xlu1 %v831_v26  ;;  %v790_v56 = vmul.f32 %v2593_v47, %v2593_v47  ;;  %v791_v57 = vmul.f32 %v2596_v25, %v2596_v25  ;;  %v668_v26 = vld [vmem:[%s3025_s3] sm:$0x3] }
 0x202   : > { %v2603_v58 = vsub.f32 %v2449_v43, %v731_v50  ;;  %v2606_v63 = vsub.f32 %v2452_v46, %v731_v50  ;;  %v834_v36 = vadd.f32 %v791_v57, %v790_v56  ;;  %v669_v57 = vld [vmem:[%s3026_s4] sm:$0x3] }
 0x203   : > { %v714_v2 = vpop.xlane.xlu0 %713 }
 0x204   : > { %v732_v37 = vmul.f32 0.00390625, %v714_v2  ;;  %835 = vadd.xlane.f32.xlu0 %v834_v36  ;;  %v792_v3 = vmul.f32 %v2603_v58, %v2603_v58  ;;  %v793_v8 = vmul.f32 %v2606_v63, %v2606_v63  ;;  %v2639_v36 = vrot.slane %v668_v26, %v2333_v28 }
 0x206   : > { %v2613_v9 = vsub.f32 %v2457_v52, %v732_v37  ;;  %v2616_v30 = vsub.f32 %v2460_v53, %v732_v37  ;;  %v837_v43 = vadd.f32 %v793_v8, %v792_v3  ;;  %v2642_v37 = vrot.slane %v668_v26, %v2331_v27 }
 0x207   : > { %v717_v31 = vpop.xlane.xlu1 %716 }
 0x208   : > { %v733_v46 = vmul.f32 0.00390625, %v717_v31  ;;  %838 = vadd.xlane.f32.xlu1 %v837_v43  ;;  %v794_v14 = vmul.f32 %v2613_v9, %v2613_v9  ;;  %v795_v34 = vmul.f32 %v2616_v30, %v2616_v30 }
 0x20a   : > { %v2623_v17 = vsub.f32 %v2465_v61, %v733_v46  ;;  %v2626_v35 = vsub.f32 %v2468_v62, %v733_v46  ;;  %v840_v52 = vadd.f32 %v795_v34, %v794_v14  ;;  %v2647_v46 = vrot.slane %v669_v57, %v2333_v28 }
 0x20c   : > { %841 = vadd.xlane.f32.xlu0 %v840_v52  ;;  %v796_v53 = vmul.f32 %v2623_v17, %v2623_v17  ;;  %v797_v18 = vmul.f32 %v2626_v35, %v2626_v35 }
 0x20e   : > { %v843_v39 = vadd.f32 %v797_v18, %v796_v53  ;;  %v2651_v53 = vrot.slane %v669_v57, %v2331_v27 }
 0x210   : > { %844 = vadd.xlane.f32.xlu1 %v843_v39 }
 0x25d   : > { %v800_v23 = vpop.xlane.xlu0 %799 }
 0x25e   : > { %v846_v40 = vmul.f32 0.00390625, %v800_v23 }
 0x260   : > { %v862_v24 = vadd.f32 1e-05, %v846_v40 }
 0x261   : > { %v803_v29 = vpop.xlane.xlu1 %802 }
 0x262   : > { %1901 = vrsqrt.f32 %v862_v24  ;;  %v847_v61 = vmul.f32 0.00390625, %v803_v29 }
 0x264   : > { %v863_v44 = vadd.f32 1e-05, %v847_v61 }
 0x265   : > { %v806_v38 = vpop.xlane.xlu0 %805 }
 0x266   : > { %1903 = vrsqrt.f32 %v863_v44  ;;  %v848_v62 = vmul.f32 0.00390625, %v806_v38 }
 0x268   : > { %v864_v45 = vadd.f32 1e-05, %v848_v62 }
 0x269   : > { %v809_v41 = vpop.xlane.xlu1 %808 }
 0x26a   : > { %1905 = vrsqrt.f32 %v864_v45  ;;  %v849_v42 = vmul.f32 0.00390625, %v809_v41 }
 0x26c   : > { %v865_v51 = vadd.f32 1e-05, %v849_v42 }
 0x26d   : > { %v812_v50 = vpop.xlane.xlu0 %811 }
 0x26e   : > { %1907 = vrsqrt.f32 %v865_v51  ;;  %v850_v56 = vmul.f32 0.00390625, %v812_v50 }
 0x26f   : > { %v1902_v2 = vpop.eup %1901 }
 0x270   : > { %v866_v3 = vadd.f32 1e-05, %v850_v56  ;;  %v895_v8 = vmul.f32 %v1902_v2, %v2476_v7  ;;  %v894_v43 = vmul.f32 %v1902_v2, %v2473_v4 }
 0x271   : > { %v815_v31 = vpop.xlane.xlu1 %814 }
 0x272   : > { %1909 = vrsqrt.f32 %v866_v3  ;;  %v851_v14 = vmul.f32 0.00390625, %v815_v31  ;;  %v938_v34 = vmul.f32 %v2639_v36, %v895_v8  ;;  %v937_v18 = vmul.f32 %v2642_v37, %v894_v43 }
 0x273   : > { %v1904_v52 = vpop.eup %1903 }
 0x274   : > { %v867_v39 = vadd.f32 1e-05, %v851_v14  ;;  %v897_v23 = vmul.f32 %v1904_v52, %v2486_v13  ;;  %v896_v7 = vmul.f32 %v1904_v52, %v2483_v12  ;;  %v981_v40 = vadd.f32 %v2647_v46, %v938_v34 }
 0x275   : > { %v818_v4 = vpop.xlane.xlu0 %817  ;;  %v980_v27 = vadd.f32 %v2651_v53, %v937_v18 }
 0x276   : > { %1911 = vrsqrt.f32 %v867_v39  ;;  %v852_v28 = vmul.f32 0.00390625, %v818_v4  ;;  %v940_v24 = vmul.f32 %v2639_v36, %v897_v23  ;;  %v939_v61 = vmul.f32 %v2642_v37, %v896_v7 }
 0x277   : > { %v1906_v29 = vpop.eup %1905  ;;  %v1013_v45 = vmax.f32 %v981_v40, 0.0  ;;  %v1012_v56 = vmax.f32 %v980_v27, 0.0 }
 0x278   : > { %v868_v44 = vadd.f32 1e-05, %v852_v28  ;;  %v983_v38 = vadd.f32 %v2647_v46, %v940_v24  ;;  %v899_v62 = vmul.f32 %v1906_v29, %v2496_v22  ;;  %v898_v13 = vmul.f32 %v1906_v29, %v2493_v19 }
 0x279   : > { %v821_v12 = vpop.xlane.xlu1 %820  ;;  %v982_v41 = vadd.f32 %v2651_v53, %v939_v61 }
 0x27a   : > { %1913 = vrsqrt.f32 %v868_v44  ;;  %v853_v42 = vmul.f32 0.00390625, %v821_v12  ;;  %v1015_v26 = vmax.f32 %v983_v38, 0.0  ;;  %v942_v51 = vmul.f32 %v2639_v36, %v899_v62 }
 0x27b   : > { %v1908_v50 = vpop.eup %1907  ;;  %v1014_v57 = vmax.f32 %v982_v41, 0.0  ;;  %v941_v2 = vmul.f32 %v2642_v37, %v898_v13 }
 0x27c   : > { %v869_v3 = vadd.f32 1e-05, %v853_v42  ;;  %v1045_v8 = vpack.c.bf16 %v1015_v26, %v1013_v45  ;;  %v901_v22 = vmul.f32 %v1908_v50, %v2506_v33  ;;  %v985_v31 = vadd.f32 %v2647_v46, %v942_v51 }
 0x27d   : > { %v824_v43 = vpop.xlane.xlu0 %823  ;;  %v1044_v19 = vpack.c.bf16 %v1014_v57, %v1012_v56  ;;  %v900_v14 = vmul.f32 %v1908_v50, %v2503_v32  ;;  %v984_v23 = vadd.f32 %v2651_v53, %v941_v2 }
 0x27e   : > { %1915 = vrsqrt.f32 %v869_v3  ;;  %v854_v34 = vmul.f32 0.00390625, %v824_v43  ;;  %1227 = vmatprep.mubr.bf16.mxu1 %v1045_v8  ;;  %v944_v52 = vmul.f32 %v2639_v36, %v901_v22  ;;  %v1017_v32 = vmax.f32 %v985_v31, 0.0 }
 0x27f   : > { %v1910_v18 = vpop.eup %1909  ;;  %1228 = vmatmul.mubr.bf16.vlgmr.msra.gmra.mxu1 %v1044_v19  ;;  %v943_v39 = vmul.f32 %v2642_v37, %v900_v14  ;;  %v1016_v38 = vmax.f32 %v984_v23, 0.0 }
 0x280   : > { %v870_v7 = vadd.f32 1e-05, %v854_v34  ;;  %v987_v33 = vadd.f32 %v2647_v46, %v944_v52  ;;  %v903_v4 = vmul.f32 %v1910_v18, %v2516_v49  ;;  %v902_v40 = vmul.f32 %v1910_v18, %v2513_v48 }
 0x281   : > { %v827_v28 = vpop.xlane.xlu1 %826  ;;  %v986_v24 = vadd.f32 %v2651_v53, %v943_v39 }
 0x282   : > { %1917 = vrsqrt.f32 %v870_v7  ;;  %v855_v29 = vmul.f32 0.00390625, %v827_v28  ;;  %v1019_v61 = vmax.f32 %v987_v33, 0.0  ;;  %v946_v27 = vmul.f32 %v2639_v36, %v903_v4 }
 0x283   : > { %v1912_v44 = vpop.eup %1911  ;;  %v1018_v62 = vmax.f32 %v986_v24, 0.0  ;;  %v945_v13 = vmul.f32 %v2642_v37, %v902_v40 }
 0x284   : > { %v871_v12 = vadd.f32 1e-05, %v855_v29  ;;  %v1047_v45 = vpack.c.bf16 %v1019_v61, %v1017_v32  ;;  %v905_v49 = vmul.f32 %v1912_v44, %v2526_v55  ;;  %v989_v42 = vadd.f32 %v2647_v46, %v946_v27 }
 0x285   : > { %v830_v41 = vpop.xlane.xlu0 %829  ;;  %v1046_v48 = vpack.c.bf16 %v1018_v62, %v1016_v38  ;;  %v904_v26 = vmul.f32 %v1912_v44, %v2523_v54  ;;  %v988_v2 = vadd.f32 %v2651_v53, %v945_v13 }
 0x286   : > { %1919 = vrsqrt.f32 %v871_v12  ;;  %v856_v51 = vmul.f32 0.00390625, %v830_v41  ;;  %1235 = vmatprep.mubr.bf16.mxu1 %v1047_v45  ;;  %v948_v50 = vmul.f32 %v2639_v36, %v905_v49  ;;  %v1021_v54 = vmax.f32 %v989_v42, 0.0 }
 0x287   : > { %v1914_v56 = vpop.eup %1913  ;;  %1236 = vmatmul.mubr.bf16.gmra.mxu1 %v1046_v48  ;;  %v947_v57 = vmul.f32 %v2642_v37, %v904_v26  ;;  %v1020_v18 = vmax.f32 %v988_v2, 0.0 }
 0x288   : > { %v872_v3 = vadd.f32 1e-05, %v856_v51  ;;  %v991_v55 = vadd.f32 %v2647_v46, %v948_v50  ;;  %v907_v8 = vmul.f32 %v1914_v56, %v2536_v60  ;;  %v906_v22 = vmul.f32 %v1914_v56, %v2533_v59 }
 0x289   : > { %v833_v43 = vpop.xlane.xlu1 %832  ;;  %v990_v19 = vadd.f32 %v2651_v53, %v947_v57 }
 0x28a   : > { %1921 = vrsqrt.f32 %v872_v3  ;;  %v857_v31 = vmul.f32 0.00390625, %v833_v43  ;;  %v1023_v14 = vmax.f32 %v991_v55, 0.0  ;;  %v950_v34 = vmul.f32 %v2639_v36, %v907_v8 }
 0x28b   : > { %v1916_v52 = vpop.eup %1915  ;;  %v1022_v39 = vmax.f32 %v990_v19, 0.0  ;;  %v949_v23 = vmul.f32 %v2642_v37, %v906_v22 }
 0x28c   : > { %v873_v7 = vadd.f32 1e-05, %v857_v31  ;;  %v1049_v33 = vpack.c.bf16 %v1023_v14, %v1021_v54  ;;  %v909_v60 = vmul.f32 %v1916_v52, %v2546_v1  ;;  %v993_v40 = vadd.f32 %v2647_v46, %v950_v34 }
 0x28d   : > { %v836_v4 = vpop.xlane.xlu0 %835  ;;  %v1048_v59 = vpack.c.bf16 %v1022_v39, %v1020_v18  ;;  %v908_v28 = vmul.f32 %v1916_v52, %v2543_v0  ;;  %v992_v27 = vadd.f32 %v2651_v53, %v949_v23 }
 0x28e   : > { %1923 = vrsqrt.f32 %v873_v7  ;;  %v858_v32 = vmul.f32 0.00390625, %v836_v4  ;;  %1243 = vmatprep.mubr.bf16.mxu1 %v1049_v33  ;;  %v952_v24 = vmul.f32 %v2639_v36, %v909_v60  ;;  %v1025_v0 = vmax.f32 %v993_v40, 0.0 }
 0x28f   : > { %v1918_v29 = vpop.eup %1917  ;;  %1244 = vmatmul.mubr.bf16.gmra.mxu1 %v1048_v59  ;;  %v951_v61 = vmul.f32 %v2642_v37, %v908_v28  ;;  %v1024_v42 = vmax.f32 %v992_v27, 0.0 }
 0x290   : > { %v874_v44 = vadd.f32 1e-05, %v858_v32  ;;  %v995_v1 = vadd.f32 %v2647_v46, %v952_v24  ;;  %v911_v38 = vmul.f32 %v1918_v29, %v2556_v6  ;;  %v910_v62 = vmul.f32 %v1918_v29, %v2553_v5 }
 0x291   : > { %v839_v13 = vpop.xlane.xlu1 %838  ;;  %v994_v12 = vadd.f32 %v2651_v53, %v951_v61 }
 0x292   : > { %1925 = vrsqrt.f32 %v874_v44  ;;  %v859_v45 = vmul.f32 0.00390625, %v839_v13  ;;  %v1027_v49 = vmax.f32 %v995_v1, 0.0  ;;  %v954_v41 = vmul.f32 %v2639_v36, %v911_v38 }
 0x293   : > { %v1920_v48 = vpop.eup %1919  ;;  %v1026_v26 = vmax.f32 %v994_v12, 0.0  ;;  %v953_v51 = vmul.f32 %v2642_v37, %v910_v62 }
 0x294   : > { %v875_v50 = vadd.f32 1e-05, %v859_v45  ;;  %v1051_v56 = vpack.c.bf16 %v1027_v49, %v1025_v0  ;;  %v913_v6 = vmul.f32 %v1920_v48, %v2566_v11  ;;  %v997_v2 = vadd.f32 %v2647_v46, %v954_v41 }
 0x295   : > { %v842_v57 = vpop.xlane.xlu0 %841  ;;  %v1050_v5 = vpack.c.bf16 %v1026_v26, %v1024_v42  ;;  %v912_v3 = vmul.f32 %v1920_v48, %v2563_v10  ;;  %v996_v54 = vadd.f32 %v2651_v53, %v953_v51 }
 0x296   : > { %1927 = vrsqrt.f32 %v875_v50  ;;  %v860_v55 = vmul.f32 0.00390625, %v842_v57  ;;  %1251 = vmatprep.mubr.bf16.mxu1 %v1051_v56  ;;  %v956_v8 = vmul.f32 %v2639_v36, %v913_v6  ;;  %v1029_v10 = vmax.f32 %v997_v2, 0.0 }
 0x297   : > { %v1922_v22 = vpop.eup %1921  ;;  %1252 = vmatmul.mubr.bf16.gmra.mxu1 %v1050_v5  ;;  %v955_v43 = vmul.f32 %v2642_v37, %v912_v3  ;;  %v1028_v33 = vmax.f32 %v996_v54, 0.0 }
 0x298   : > { %v876_v19 = vadd.f32 1e-05, %v860_v55  ;;  %v999_v11 = vadd.f32 %v2647_v46, %v956_v8  ;;  %v915_v31 = vmul.f32 %v1922_v22, %v2576_v16  ;;  %v914_v14 = vmul.f32 %v1922_v22, %v2573_v15 }
 0x299   : > { %v845_v34 = vpop.xlane.xlu1 %844  ;;  %v998_v52 = vadd.f32 %v2651_v53, %v955_v43 }
 0x29a   : > { %1929 = vrsqrt.f32 %v876_v19  ;;  %v861_v18 = vmul.f32 0.00390625, %v845_v34  ;;  %v1031_v39 = vmax.f32 %v999_v11, 0.0  ;;  %v958_v23 = vmul.f32 %v2639_v36, %v915_v31 }
 0x29b   : > { %v1924_v7 = vpop.eup %1923  ;;  %v1030_v60 = vmax.f32 %v998_v52, 0.0  ;;  %v957_v4 = vmul.f32 %v2642_v37, %v914_v14 }
 0x29c   : > { %v877_v59 = vadd.f32 1e-05, %v861_v18  ;;  %v1053_v40 = vpack.c.bf16 %v1031_v39, %v1029_v10  ;;  %v917_v16 = vmul.f32 %v1924_v7, %v2586_v21  ;;  %v916_v15 = vmul.f32 %v1924_v7, %v2583_v20 }
 0x29d   : > { %v1052_v28 = vpack.c.bf16 %v1030_v60, %v1028_v33  ;;  %v1001_v24 = vadd.f32 %v2647_v46, %v958_v23  ;;  %v1000_v27 = vadd.f32 %v2651_v53, %v957_v4 }
 0x29e   : > { %1931 = vrsqrt.f32 %v877_v59  ;;  %1259 = vmatprep.mubr.bf16.mxu1 %v1053_v40  ;;  %v960_v32 = vmul.f32 %v2639_v36, %v917_v16  ;;  %v959_v61 = vmul.f32 %v2642_v37, %v916_v15 }
 0x29f   : > { %v1926_v29 = vpop.eup %1925  ;;  %1260 = vmatmul.mubr.bf16.gmra.mxu1 %v1052_v28  ;;  %v1033_v38 = vmax.f32 %v1001_v24, 0.0  ;;  %v1032_v45 = vmax.f32 %v1000_v27, 0.0 }
 0x2a0   : > { %v1003_v44 = vadd.f32 %v2647_v46, %v960_v32  ;;  %v919_v1 = vmul.f32 %v1926_v29, %v2596_v25  ;;  %v918_v21 = vmul.f32 %v1926_v29, %v2593_v47  ;;  %v1002_v20 = vadd.f32 %v2651_v53, %v959_v61 }
 0x2a2   : > { %v1035_v62 = vmax.f32 %v1003_v44, 0.0  ;;  %v962_v13 = vmul.f32 %v2639_v36, %v919_v1  ;;  %v961_v0 = vmul.f32 %v2642_v37, %v918_v21  ;;  %v1034_v49 = vmax.f32 %v1002_v20, 0.0 }
 0x2a3   : > { %v1928_v12 = vpop.eup %1927 }
 0x2a4   : > { %v1055_v41 = vpack.c.bf16 %v1035_v62, %v1033_v38  ;;  %v921_v48 = vmul.f32 %v1928_v12, %v2606_v63  ;;  %v920_v42 = vmul.f32 %v1928_v12, %v2603_v58  ;;  %v1054_v26 = vpack.c.bf16 %v1034_v49, %v1032_v45 }
 0x2a5   : > { %v1005_v25 = vadd.f32 %v2647_v46, %v962_v13  ;;  %v1004_v50 = vadd.f32 %v2651_v53, %v961_v0 }
 0x2a6   : > { %1267 = vmatprep.mubr.bf16.mxu1 %v1055_v41  ;;  %v964_v47 = vmul.f32 %v2639_v36, %v921_v48  ;;  %v963_v51 = vmul.f32 %v2642_v37, %v920_v42 }
 0x2a7   : > { %v1930_v56 = vpop.eup %1929  ;;  %1268 = vmatmul.mubr.bf16.gmra.mxu1 %v1054_v26  ;;  %v1037_v5 = vmax.f32 %v1005_v25, 0.0  ;;  %v1036_v3 = vmax.f32 %v1004_v50, 0.0 }
 0x2a8   : > { %v1007_v6 = vadd.f32 %v2647_v46, %v964_v47  ;;  %v1006_v57 = vadd.f32 %v2651_v53, %v963_v51  ;;  %v923_v63 = vmul.f32 %v1930_v56, %v2616_v30  ;;  %v922_v58 = vmul.f32 %v1930_v56, %v2613_v9 }
 0x2aa   : > { %v1039_v2 = vmax.f32 %v1007_v6, 0.0  ;;  %v1038_v55 = vmax.f32 %v1006_v57, 0.0  ;;  %v966_v8 = vmul.f32 %v2639_v36, %v923_v63  ;;  %v965_v43 = vmul.f32 %v2642_v37, %v922_v58 }
 0x2ab   : > { %v1932_v22 = vpop.eup %1931 }
 0x2ac   : > { %v1057_v54 = vpack.c.bf16 %v1039_v2, %v1037_v5  ;;  %v1056_v19 = vpack.c.bf16 %v1038_v55, %v1036_v3  ;;  %v925_v11 = vmul.f32 %v1932_v22, %v2626_v35  ;;  %v924_v31 = vmul.f32 %v1932_v22, %v2623_v17 }
 0x2ad   : > { %v1009_v9 = vadd.f32 %v2647_v46, %v966_v8  ;;  %v1008_v34 = vadd.f32 %v2651_v53, %v965_v43 }
 0x2ae   : > { %1275 = vmatprep.mubr.bf16.mxu1 %v1057_v54  ;;  %v968_v30 = vmul.f32 %v2639_v36, %v925_v11  ;;  %v967_v14 = vmul.f32 %v2642_v37, %v924_v31  ;;  %v2749_v37 = vld [vmem:[%s3028_s6] ss:$0 sm:$0xff] }
 0x2af   : > { %1276 = vmatmul.mubr.bf16.gmra.mxu1 %v1056_v19  ;;  %v1041_v18 = vmax.f32 %v1009_v9, 0.0  ;;  %v1040_v23 = vmax.f32 %v1008_v34, 0.0 }
 0x2b0   : > { %v1011_v10 = vadd.f32 %v2647_v46, %v968_v30  ;;  %v1010_v52 = vadd.f32 %v2651_v53, %v967_v14 }
 0x2b2   : > { %v1043_v39 = vmax.f32 %v1011_v10, 0.0  ;;  %v1042_v35 = vmax.f32 %v1010_v52, 0.0 }
 0x2b4   : > { %v1059_v7 = vpack.c.bf16 %v1043_v39, %v1041_v18  ;;  %v1058_v17 = vpack.c.bf16 %v1042_v35, %v1040_v23 }
 0x2b6   : > { %1283 = vmatprep.mubr.bf16.mxu1 %v1059_v7 }
 0x2b7   : > { %1284 = vmatmul.mubr.bf16.gmra.mxu1 %v1058_v17 }
 0x33f   : > { %v1731_v36 = vpop.f32.mrf.mxu1 }
 0x341   : > { %v1732_v33 = vpop.f32.mrf.mxu1 }
 0x342   : > { %v1733_v60 = vadd.f32 %v1732_v33, %v1731_v36 }
 0x343   : > { %v1734_v4 = vpop.f32.mrf.mxu1 }
 0x344   : > { %v2752_v46 = vadd.f32 %v1733_v60, %v2749_v37 }
 0x345   : > { %v1735_v53 = vpop.f32.mrf.mxu1 }
 0x346   : > { %v1736_v59 = vadd.f32 %v1735_v53, %v1734_v4  ;;  %1294 = vadd.xlane.f32.xlu0 %v2752_v46 }
 0x347   : > { %v1737_v40 = vpop.f32.mrf.mxu1 }
 0x348   : > { %v2756_v16 = vadd.f32 %v1736_v59, %v2749_v37 }
 0x349   : > { %v1738_v28 = vpop.f32.mrf.mxu1 }
 0x34a   : > { %v1739_v15 = vadd.f32 %v1738_v28, %v1737_v40  ;;  %1296 = vadd.xlane.f32.xlu1 %v2756_v16 }
 0x34b   : > { %v1740_v32 = vpop.f32.mrf.mxu1 }
 0x34c   : > { %v2760_v24 = vadd.f32 %v1739_v15, %v2749_v37 }
 0x34d   : > { %v1741_v29 = vpop.f32.mrf.mxu1 }
 0x34e   : > { %v1742_v61 = vadd.f32 %v1741_v29, %v1740_v32  ;;  %1298 = vadd.xlane.f32.xlu0 %v2760_v24 }
 0x34f   : > { %v1743_v27 = vpop.f32.mrf.mxu1 }
 0x350   : > { %v2764_v44 = vadd.f32 %v1742_v61, %v2749_v37 }
 0x351   : > { %v1744_v1 = vpop.f32.mrf.mxu1 }
 0x352   : > { %v1745_v21 = vadd.f32 %v1744_v1, %v1743_v27  ;;  %1300 = vadd.xlane.f32.xlu1 %v2764_v44 }
 0x353   : > { %v1746_v20 = vpop.f32.mrf.mxu1 }
 0x354   : > { %v2768_v38 = vadd.f32 %v1745_v21, %v2749_v37 }
 0x355   : > { %v1747_v62 = vpop.f32.mrf.mxu1 }
 0x356   : > { %v1748_v13 = vadd.f32 %v1747_v62, %v1746_v20  ;;  %1302 = vadd.xlane.f32.xlu0 %v2768_v38 }
 0x357   : > { %v1749_v0 = vpop.f32.mrf.mxu1 }
 0x358   : > { %v2772_v12 = vadd.f32 %v1748_v13, %v2749_v37 }
 0x359   : > { %v1750_v45 = vpop.f32.mrf.mxu1 }
 0x35a   : > { %v1751_v49 = vadd.f32 %v1750_v45, %v1749_v0  ;;  %1304 = vadd.xlane.f32.xlu1 %v2772_v12 }
 0x35b   : > { %v1752_v41 = vpop.f32.mrf.mxu1 }
 0x35c   : > { %v2776_v48 = vadd.f32 %v1751_v49, %v2749_v37 }
 0x35d   : > { %v1753_v42 = vpop.f32.mrf.mxu1 }
 0x35e   : > { %v1754_v26 = vadd.f32 %v1753_v42, %v1752_v41  ;;  %1306 = vadd.xlane.f32.xlu0 %v2776_v48 }
 0x35f   : > { %v1755_v25 = vpop.f32.mrf.mxu1 }
 0x360   : > { %v2780_v47 = vadd.f32 %v1754_v26, %v2749_v37 }
 0x361   : > { %v1756_v51 = vpop.f32.mrf.mxu1 }
 0x362   : > { %v1757_v50 = vadd.f32 %v1756_v51, %v1755_v25  ;;  %1308 = vadd.xlane.f32.xlu1 %v2780_v47 }
 0x363   : > { %v1758_v56 = vpop.f32.mrf.mxu1 }
 0x364   : > { %v2784_v6 = vadd.f32 %v1757_v50, %v2749_v37 }
 0x365   : > { %v1759_v57 = vpop.f32.mrf.mxu1 }
 0x366   : > { %v1760_v63 = vadd.f32 %v1759_v57, %v1758_v56  ;;  %1310 = vadd.xlane.f32.xlu0 %v2784_v6 }
 0x367   : > { %v1761_v58 = vpop.f32.mrf.mxu1 }
 0x368   : > { %v2788_v5 = vadd.f32 %v1760_v63, %v2749_v37 }
 0x369   : > { %v1762_v2 = vpop.f32.mrf.mxu1 }
 0x36a   : > { %v1763_v3 = vadd.f32 %v1762_v2, %v1761_v58  ;;  %1312 = vadd.xlane.f32.xlu1 %v2788_v5 }
 0x36b   : > { %v1764_v55 = vpop.f32.mrf.mxu1 }
 0x36c   : > { %v2792_v8 = vadd.f32 %v1763_v3, %v2749_v37 }
 0x36d   : > { %v1765_v22 = vpop.f32.mrf.mxu1 }
 0x36e   : > { %v1766_v43 = vadd.f32 %v1765_v22, %v1764_v55  ;;  %1314 = vadd.xlane.f32.xlu0 %v2792_v8 }
 0x36f   : > { %v1767_v54 = vpop.f32.mrf.mxu1 }
 0x370   : > { %v2796_v19 = vadd.f32 %v1766_v43, %v2749_v37 }
 0x371   : > { %v1768_v11 = vpop.f32.mrf.mxu1 }
 0x372   : > { %v1769_v31 = vadd.f32 %v1768_v11, %v1767_v54  ;;  %1316 = vadd.xlane.f32.xlu1 %v2796_v19 }
 0x373   : > { %v1770_v30 = vpop.f32.mrf.mxu1 }
 0x374   : > { %v2800_v9 = vadd.f32 %v1769_v31, %v2749_v37 }
 0x375   : > { %v1771_v14 = vpop.f32.mrf.mxu1 }
 0x376   : > { %v1772_v34 = vadd.f32 %v1771_v14, %v1770_v30  ;;  %1318 = vadd.xlane.f32.xlu0 %v2800_v9 }
 0x377   : > { %v1773_v10 = vpop.f32.mrf.mxu1 }
 0x378   : > { %v2804_v52 = vadd.f32 %v1772_v34, %v2749_v37 }
 0x379   : > { %v1774_v18 = vpop.f32.mrf.mxu1 }
 0x37a   : > { %v1775_v39 = vadd.f32 %v1774_v18, %v1773_v10  ;;  %1320 = vadd.xlane.f32.xlu1 %v2804_v52 }
 0x37b   : > { %v1776_v23 = vpop.f32.mrf.mxu1 }
 0x37c   : > { %v2808_v35 = vadd.f32 %v1775_v39, %v2749_v37 }
 0x37d   : > { %v1777_v7 = vpop.f32.mrf.mxu1 }
 0x37e   : > { %v1778_v17 = vadd.f32 %v1777_v7, %v1776_v23  ;;  %1322 = vadd.xlane.f32.xlu0 %v2808_v35 }
 0x380   : > { %v2812_v36 = vadd.f32 %v1778_v17, %v2749_v37 }
 0x382   : > { %1324 = vadd.xlane.f32.xlu1 %v2812_v36 }
 0x3cf   : > { %v1295_v33 = vpop.xlane.xlu0 %1294 }
 0x3d0   : > { %v1326_v60 = vmul.f32 0.0078125, %v1295_v33 }
 0x3d2   : > { %v2816_v4 = vsub.f32 %v2752_v46, %v1326_v60 }
 0x3d3   : > { %v1297_v53 = vpop.xlane.xlu1 %1296 }
 0x3d4   : > { %v1327_v59 = vmul.f32 0.0078125, %v1297_v53  ;;  %v1358_v40 = vmul.f32 %v2816_v4, %v2816_v4 }
 0x3d6   : > { %v2821_v28 = vsub.f32 %v2756_v16, %v1327_v59  ;;  %1374 = vadd.xlane.f32.xlu0 %v1358_v40 }
 0x3d7   : > { %v1299_v15 = vpop.xlane.xlu0 %1298 }
 0x3d8   : > { %v1328_v32 = vmul.f32 0.0078125, %v1299_v15  ;;  %v1359_v37 = vmul.f32 %v2821_v28, %v2821_v28 }
 0x3da   : > { %v2826_v29 = vsub.f32 %v2760_v24, %v1328_v32  ;;  %1376 = vadd.xlane.f32.xlu1 %v1359_v37 }
 0x3db   : > { %v1301_v46 = vpop.xlane.xlu1 %1300 }
 0x3dc   : > { %v1329_v61 = vmul.f32 0.0078125, %v1301_v46  ;;  %v1360_v27 = vmul.f32 %v2826_v29, %v2826_v29 }
 0x3de   : > { %v2831_v1 = vsub.f32 %v2764_v44, %v1329_v61  ;;  %1378 = vadd.xlane.f32.xlu0 %v1360_v27 }
 0x3df   : > { %v1303_v16 = vpop.xlane.xlu0 %1302 }
 0x3e0   : > { %v1330_v21 = vmul.f32 0.0078125, %v1303_v16  ;;  %v1361_v20 = vmul.f32 %v2831_v1, %v2831_v1 }
 0x3e2   : > { %v2836_v62 = vsub.f32 %v2768_v38, %v1330_v21  ;;  %1380 = vadd.xlane.f32.xlu1 %v1361_v20 }
 0x3e3   : > { %v1305_v24 = vpop.xlane.xlu1 %1304 }
 0x3e4   : > { %v1331_v13 = vmul.f32 0.0078125, %v1305_v24  ;;  %v1362_v0 = vmul.f32 %v2836_v62, %v2836_v62 }
 0x3e6   : > { %v2841_v45 = vsub.f32 %v2772_v12, %v1331_v13  ;;  %1382 = vadd.xlane.f32.xlu0 %v1362_v0  ;;  %v2898_v13 = vld [vmem:[%s3029_s7] ss:$0 sm:$0xff] }
 0x3e7   : > { %v1307_v44 = vpop.xlane.xlu0 %1306 }
 0x3e8   : > { %v1332_v49 = vmul.f32 0.0078125, %v1307_v44  ;;  %v1363_v41 = vmul.f32 %v2841_v45, %v2841_v45 }
 0x3ea   : > { %v2846_v42 = vsub.f32 %v2776_v48, %v1332_v49  ;;  %1384 = vadd.xlane.f32.xlu1 %v1363_v41  ;;  %v2904_v49 = vld [vmem:[%s3030_s8] ss:$0 sm:$0xff] }
 0x3eb   : > { %v1309_v38 = vpop.xlane.xlu1 %1308 }
 0x3ec   : > { %v1333_v26 = vmul.f32 0.0078125, %v1309_v38  ;;  %v1364_v25 = vmul.f32 %v2846_v42, %v2846_v42 }
 0x3ee   : > { %v2851_v51 = vsub.f32 %v2780_v47, %v1333_v26  ;;  %1386 = vadd.xlane.f32.xlu0 %v1364_v25 }
 0x3ef   : > { %v1311_v12 = vpop.xlane.xlu0 %1310 }
 0x3f0   : > { %v1334_v50 = vmul.f32 0.0078125, %v1311_v12  ;;  %v1365_v56 = vmul.f32 %v2851_v51, %v2851_v51 }
 0x3f2   : > { %v2856_v57 = vsub.f32 %v2784_v6, %v1334_v50  ;;  %1388 = vadd.xlane.f32.xlu1 %v1365_v56 }
 0x3f3   : > { %v1313_v48 = vpop.xlane.xlu1 %1312 }
 0x3f4   : > { %v1335_v63 = vmul.f32 0.0078125, %v1313_v48  ;;  %v1366_v58 = vmul.f32 %v2856_v57, %v2856_v57 }
 0x3f6   : > { %v2861_v2 = vsub.f32 %v2788_v5, %v1335_v63  ;;  %1390 = vadd.xlane.f32.xlu0 %v1366_v58 }
 0x3f7   : > { %v1315_v47 = vpop.xlane.xlu0 %1314 }
 0x3f8   : > { %v1336_v3 = vmul.f32 0.0078125, %v1315_v47  ;;  %v1367_v55 = vmul.f32 %v2861_v2, %v2861_v2 }
 0x3fa   : > { %v2866_v22 = vsub.f32 %v2792_v8, %v1336_v3  ;;  %1392 = vadd.xlane.f32.xlu1 %v1367_v55 }
 0x3fb   : > { %v1317_v6 = vpop.xlane.xlu1 %1316 }
 0x3fc   : > { %v1337_v43 = vmul.f32 0.0078125, %v1317_v6  ;;  %v1368_v54 = vmul.f32 %v2866_v22, %v2866_v22 }
 0x3fe   : > { %v2871_v11 = vsub.f32 %v2796_v19, %v1337_v43  ;;  %1394 = vadd.xlane.f32.xlu0 %v1368_v54 }
 0x3ff   : > { %v1319_v5 = vpop.xlane.xlu0 %1318 }
 0x400   : > { %v1338_v31 = vmul.f32 0.0078125, %v1319_v5  ;;  %v1369_v30 = vmul.f32 %v2871_v11, %v2871_v11 }
 0x402   : > { %v2876_v14 = vsub.f32 %v2800_v9, %v1338_v31  ;;  %1396 = vadd.xlane.f32.xlu1 %v1369_v30 }
 0x403   : > { %v1321_v8 = vpop.xlane.xlu1 %1320 }
 0x404   : > { %v1339_v34 = vmul.f32 0.0078125, %v1321_v8  ;;  %v1370_v10 = vmul.f32 %v2876_v14, %v2876_v14 }
 0x406   : > { %v2881_v18 = vsub.f32 %v2804_v52, %v1339_v34  ;;  %1398 = vadd.xlane.f32.xlu0 %v1370_v10 }
 0x407   : > { %v1323_v19 = vpop.xlane.xlu0 %1322 }
 0x408   : > { %v1340_v39 = vmul.f32 0.0078125, %v1323_v19  ;;  %v1371_v23 = vmul.f32 %v2881_v18, %v2881_v18 }
 0x40a   : > { %v2886_v7 = vsub.f32 %v2808_v35, %v1340_v39  ;;  %1400 = vadd.xlane.f32.xlu1 %v1371_v23 }
 0x40b   : > { %v1325_v9 = vpop.xlane.xlu1 %1324 }
 0x40c   : > { %v1341_v17 = vmul.f32 0.0078125, %v1325_v9  ;;  %v1372_v33 = vmul.f32 %v2886_v7, %v2886_v7 }
 0x40e   : > { %v2891_v60 = vsub.f32 %v2812_v36, %v1341_v17  ;;  %1402 = vadd.xlane.f32.xlu0 %v1372_v33 }
 0x410   : > { %v1373_v52 = vmul.f32 %v2891_v60, %v2891_v60 }
 0x412   : > { %1404 = vadd.xlane.f32.xlu1 %v1373_v52 }
 0x45f   : > { %v1375_v53 = vpop.xlane.xlu0 %1374 }
 0x460   : > { %v1406_v59 = vmul.f32 0.0078125, %v1375_v53 }
 0x462   : > { %v1422_v40 = vadd.f32 1e-05, %v1406_v59 }
 0x463   : > { %v1377_v15 = vpop.xlane.xlu1 %1376 }
 0x464   : > { %1933 = vrsqrt.f32 %v1422_v40  ;;  %v1407_v35 = vmul.f32 0.0078125, %v1377_v15 }
 0x466   : > { %v1423_v32 = vadd.f32 1e-05, %v1407_v35 }
 0x467   : > { %v1379_v37 = vpop.xlane.xlu0 %1378 }
 0x468   : > { %1935 = vrsqrt.f32 %v1423_v32  ;;  %v1408_v46 = vmul.f32 0.0078125, %v1379_v37 }
 0x46a   : > { %v1424_v61 = vadd.f32 1e-05, %v1408_v46 }
 0x46b   : > { %v1381_v27 = vpop.xlane.xlu1 %1380 }
 0x46c   : > { %1937 = vrsqrt.f32 %v1424_v61  ;;  %v1409_v36 = vmul.f32 0.0078125, %v1381_v27 }
 0x46e   : > { %v1425_v16 = vadd.f32 1e-05, %v1409_v36 }
 0x46f   : > { %v1383_v21 = vpop.xlane.xlu0 %1382 }
 0x470   : > { %1939 = vrsqrt.f32 %v1425_v16  ;;  %v1410_v20 = vmul.f32 0.0078125, %v1383_v21 }
 0x471   : > { %v1934_v24 = vpop.eup %1933 }
 0x472   : > { %v1454_v0 = vmul.f32 %v1934_v24, %v2816_v4  ;;  %v1426_v44 = vadd.f32 1e-05, %v1410_v20 }
 0x473   : > { %v1385_v41 = vpop.xlane.xlu1 %1384 }
 0x474   : > { %v1476_v38 = vmul.f32 %v2898_v13, %v1454_v0  ;;  %1941 = vrsqrt.f32 %v1426_v44  ;;  %v1411_v26 = vmul.f32 0.0078125, %v1385_v41 }
 0x475   : > { %v1936_v25 = vpop.eup %1935 }
 0x476   : > { %v1498_v12 = vadd.f32 %v2904_v49, %v1476_v38  ;;  %v1455_v50 = vmul.f32 %v1936_v25, %v2821_v28  ;;  %v1427_v56 = vadd.f32 1e-05, %v1411_v26 }
 0x477   : > { %v1387_v48 = vpop.xlane.xlu0 %1386 }
 0x478   : > { %v1514_v4 = vmax.f32 %v1498_v12, 0.0  ;;  %v1477_v63 = vmul.f32 %v2898_v13, %v1455_v50  ;;  %1943 = vrsqrt.f32 %v1427_v56  ;;  %v1412_v58 = vmul.f32 0.0078125, %v1387_v48 }
 0x479   : > { %v1938_v47 = vpop.eup %1937 }
 0x47a   : > { %1530 = vst [vmem:[%s2911_s18] sm:$0xff] %v1514_v4  ;;  %v1499_v3 = vadd.f32 %v2904_v49, %v1477_v63  ;;  %v1456_v55 = vmul.f32 %v1938_v47, %v2826_v29  ;;  %v1428_v6 = vadd.f32 1e-05, %v1412_v58 }
 0x47b   : > { %v1389_v43 = vpop.xlane.xlu1 %1388 }
 0x47c   : > { %v1515_v28 = vmax.f32 %v1499_v3, 0.0  ;;  %v1478_v54 = vmul.f32 %v2898_v13, %v1456_v55  ;;  %1945 = vrsqrt.f32 %v1428_v6  ;;  %v1413_v5 = vmul.f32 0.0078125, %v1389_v43 }
 0x47d   : > { %v1940_v31 = vpop.eup %1939 }
 0x47e   : > { %1531 = vst [vmem:[%s2911_s18 + $0x8] sm:$0xff] %v1515_v28  ;;  %v1500_v30 = vadd.f32 %v2904_v49, %v1478_v54  ;;  %v1457_v8 = vmul.f32 %v1940_v31, %v2831_v1  ;;  %v1429_v34 = vadd.f32 1e-05, %v1413_v5 }
 0x47f   : > { %v1391_v10 = vpop.xlane.xlu0 %1390 }
 0x480   : > { %v1516_v19 = vmax.f32 %v1500_v30, 0.0  ;;  %v1479_v29 = vmul.f32 %v2898_v13, %v1457_v8  ;;  %1947 = vrsqrt.f32 %v1429_v34  ;;  %v1414_v39 = vmul.f32 0.0078125, %v1391_v10 }
 0x481   : > { %v1942_v23 = vpop.eup %1941 }
 0x482   : > { %1532 = vst [vmem:[%s2911_s18 + $0x10] sm:$0xff] %v1516_v19  ;;  %v1501_v9 = vadd.f32 %v2904_v49, %v1479_v29  ;;  %v1458_v17 = vmul.f32 %v1942_v23, %v2836_v62  ;;  %v1430_v33 = vadd.f32 1e-05, %v1414_v39 }
 0x483   : > { %v1393_v52 = vpop.xlane.xlu1 %1392 }
 0x484   : > { %v1517_v53 = vmax.f32 %v1501_v9, 0.0  ;;  %v1480_v1 = vmul.f32 %v2898_v13, %v1458_v17  ;;  %1949 = vrsqrt.f32 %v1430_v33  ;;  %v1415_v59 = vmul.f32 0.0078125, %v1393_v52 }
 0x485   : > { %v1944_v40 = vpop.eup %1943 }
 0x486   : > { %1533 = vst [vmem:[%s2911_s18 + $0x18] sm:$0xff] %v1517_v53  ;;  %v1502_v15 = vadd.f32 %v2904_v49, %v1480_v1  ;;  %v1459_v35 = vmul.f32 %v1944_v40, %v2841_v45  ;;  %v1431_v32 = vadd.f32 1e-05, %v1415_v59 }
 0x487   : > { %v1395_v37 = vpop.xlane.xlu0 %1394 }
 0x488   : > { %v1518_v46 = vmax.f32 %v1502_v15, 0.0  ;;  %v1481_v62 = vmul.f32 %v2898_v13, %v1459_v35  ;;  %1951 = vrsqrt.f32 %v1431_v32  ;;  %v1416_v61 = vmul.f32 0.0078125, %v1395_v37 }
 0x489   : > { %v1946_v27 = vpop.eup %1945 }
 0x48a   : > { %1534 = vst [vmem:[%s2911_s18 + $0x20] sm:$0xff] %v1518_v46  ;;  %v1503_v36 = vadd.f32 %v2904_v49, %v1481_v62  ;;  %v1460_v16 = vmul.f32 %v1946_v27, %v2846_v42  ;;  %v1432_v21 = vadd.f32 1e-05, %v1416_v61 }
 0x48b   : > { %v1397_v20 = vpop.xlane.xlu1 %1396 }
 0x48c   : > { %v1519_v24 = vmax.f32 %v1503_v36, 0.0  ;;  %v1482_v45 = vmul.f32 %v2898_v13, %v1460_v16  ;;  %1953 = vrsqrt.f32 %v1432_v21  ;;  %v1417_v0 = vmul.f32 0.0078125, %v1397_v20 }
 0x48d   : > { %v1948_v44 = vpop.eup %1947 }
 0x48e   : > { %1535 = vst [vmem:[%s2911_s18 + $0x28] sm:$0xff] %v1519_v24  ;;  %v1504_v41 = vadd.f32 %v2904_v49, %v1482_v45  ;;  %v1461_v38 = vmul.f32 %v1948_v44, %v2851_v51  ;;  %v1433_v26 = vadd.f32 1e-05, %v1417_v0 }
 0x48f   : > { %v1399_v25 = vpop.xlane.xlu0 %1398 }
 0x490   : > { %v1520_v12 = vmax.f32 %v1504_v41, 0.0  ;;  %v1483_v42 = vmul.f32 %v2898_v13, %v1461_v38  ;;  %1955 = vrsqrt.f32 %v1433_v26  ;;  %v1418_v50 = vmul.f32 0.0078125, %v1399_v25 }
 0x491   : > { %v1950_v56 = vpop.eup %1949 }
 0x492   : > { %1536 = vst [vmem:[%s2911_s18 + $0x30] sm:$0xff] %v1520_v12  ;;  %v1505_v48 = vadd.f32 %v2904_v49, %v1483_v42  ;;  %v1462_v4 = vmul.f32 %v1950_v56, %v2856_v57  ;;  %v1434_v63 = vadd.f32 1e-05, %v1418_v50 }
 0x493   : > { %v1401_v58 = vpop.xlane.xlu1 %1400 }
 0x494   : > { %v1521_v47 = vmax.f32 %v1505_v48, 0.0  ;;  %v1484_v51 = vmul.f32 %v2898_v13, %v1462_v4  ;;  %1957 = vrsqrt.f32 %v1434_v63  ;;  %v1419_v3 = vmul.f32 0.0078125, %v1401_v58 }
 0x495   : > { %v1952_v55 = vpop.eup %1951 }
 0x496   : > { %1537 = vst [vmem:[%s2911_s18 + $0x38] sm:$0xff] %v1521_v47  ;;  %v1506_v6 = vadd.f32 %v2904_v49, %v1484_v51  ;;  %v1463_v43 = vmul.f32 %v1952_v55, %v2861_v2  ;;  %v1435_v28 = vadd.f32 1e-05, %v1419_v3 }
 0x497   : > { %v1403_v54 = vpop.xlane.xlu0 %1402 }
 0x498   : > { %v1522_v5 = vmax.f32 %v1506_v6, 0.0  ;;  %v1485_v57 = vmul.f32 %v2898_v13, %v1463_v43  ;;  %1959 = vrsqrt.f32 %v1435_v28  ;;  %v1420_v31 = vmul.f32 0.0078125, %v1403_v54 }
 0x499   : > { %v1954_v30 = vpop.eup %1953 }
 0x49a   : > { %1538 = vst [vmem:[%s2911_s18 + $0x40] sm:$0xff] %v1522_v5  ;;  %v1507_v8 = vadd.f32 %v2904_v49, %v1485_v57  ;;  %v1464_v34 = vmul.f32 %v1954_v30, %v2866_v22  ;;  %v1436_v10 = vadd.f32 1e-05, %v1420_v31 }
 0x49b   : > { %v1405_v19 = vpop.xlane.xlu1 %1404 }
 0x49c   : > { %v1523_v29 = vmax.f32 %v1507_v8, 0.0  ;;  %v1486_v2 = vmul.f32 %v2898_v13, %v1464_v34  ;;  %1961 = vrsqrt.f32 %v1436_v10  ;;  %v1421_v39 = vmul.f32 0.0078125, %v1405_v19 }
 0x49d   : > { %v1956_v23 = vpop.eup %1955 }
 0x49e   : > { %1539 = vst [vmem:[%s2911_s18 + $0x48] sm:$0xff] %v1523_v29  ;;  %v1508_v9 = vadd.f32 %v2904_v49, %v1486_v2  ;;  %v1465_v17 = vmul.f32 %v1956_v23, %v2871_v11  ;;  %v1437_v33 = vadd.f32 1e-05, %v1421_v39 }
 0x4a0   : > { %v1524_v52 = vmax.f32 %v1508_v9, 0.0  ;;  %v1487_v22 = vmul.f32 %v2898_v13, %v1465_v17  ;;  %1963 = vrsqrt.f32 %v1437_v33 }
 0x4a1   : > { %v1958_v53 = vpop.eup %1957 }
 0x4a2   : > { %1540 = vst [vmem:[%s2911_s18 + $0x50] sm:$0xff] %v1524_v52  ;;  %v1509_v1 = vadd.f32 %v2904_v49, %v1487_v22  ;;  %v1466_v59 = vmul.f32 %v1958_v53, %v2876_v14 }
 0x4a4   : > { %v1525_v40 = vmax.f32 %v1509_v1, 0.0  ;;  %v1488_v15 = vmul.f32 %v2898_v13, %v1466_v59 }
 0x4a5   : > { %v1960_v35 = vpop.eup %1959 }
 0x4a6   : > { %1541 = vst [vmem:[%s2911_s18 + $0x58] sm:$0xff] %v1525_v40  ;;  %v1510_v11 = vadd.f32 %v2904_v49, %v1488_v15  ;;  %v1467_v32 = vmul.f32 %v1960_v35, %v2881_v18 }
 0x4a8   : > { %v1526_v37 = vmax.f32 %v1510_v11, 0.0  ;;  %v1489_v46 = vmul.f32 %v2898_v13, %v1467_v32 }
 0x4a9   : > { %v1962_v62 = vpop.eup %1961 }
 0x4aa   : > { %1542 = vst [vmem:[%s2911_s18 + $0x60] sm:$0xff] %v1526_v37  ;;  %v1511_v14 = vadd.f32 %v2904_v49, %v1489_v46  ;;  %v1468_v61 = vmul.f32 %v1962_v62, %v2886_v7 }
 0x4ac   : > { %v1527_v27 = vmax.f32 %v1511_v14, 0.0  ;;  %v1490_v36 = vmul.f32 %v2898_v13, %v1468_v61 }
 0x4ad   : > { %v1964_v16 = vpop.eup %1963 }
 0x4ae   : > { %1543 = vst [vmem:[%s2911_s18 + $0x68] sm:$0xff] %v1527_v27  ;;  %v1512_v18 = vadd.f32 %v2904_v49, %v1490_v36  ;;  %v1469_v21 = vmul.f32 %v1964_v16, %v2891_v60 }
 0x4b0   : > { %v1528_v20 = vmax.f32 %v1512_v18, 0.0  ;;  %v1491_v24 = vmul.f32 %v2898_v13, %v1469_v21 }
 0x4b2   : > { %1544 = vst [vmem:[%s2911_s18 + $0x70] sm:$0xff] %v1528_v20  ;;  %v1513_v7 = vadd.f32 %v2904_v49, %v1491_v24 }
 0x4b4   : > { %v1529_v45 = vmax.f32 %v1513_v7, 0.0 }
 0x4b6   : > { %1545 = vst [vmem:[%s2911_s18 + $0x78] sm:$0xff] %v1529_v45 }
 0x4b7   : > { %2058 = shalt.err (!%p2055_p9)
}
 0x4b8   : > { %s2059_s1 = scalar_lea.hbm %s2976_s19, 2048  ;;  %s2063_s27 = scalar_lea.hbm %s3031_s9, 4096 }
 0x4b9   : > { %p2060_p13 = scmp.ne.s32.totalorder %s2976_s19, %s2059_s1  ;;  %p2064_p4 = scmp.lt.s32.totalorder %s2976_s19, %s3031_s9 }
 0x4ba   : > { %p2065_p8 = scmp.lt.s32.totalorder %s2063_s27, %s2059_s1 }
 0x4bb   : > { %p2061_p5 = pnand %p2060_p13, %p3056_p10 }
 0x4bc   : > { %p2066_p7 = por %p2065_p8, %p2064_p4 }
 0x4bd   : > { %p2062_p0 = pneg %p2061_p5 }
 0x4bf   : > { %p2067_p11 = pnand %p2066_p7, %p2062_p0 }
 0x4c1   : > { %2070 = shalt.err (!%p2067_p11)
}
 0x4c2   : > { %s2124_s29 = smov 128   ;;  %s2125_s14 = smov 8  }
 0x4c3   : > { %1789 = dma.vmem_to_hbm [thread:$0]  (%p3056_p10), %s2978_s17, 2048, %s2976_s19, %s1547_s24, %s2124_s29, %s2124_s29, %s2125_s14  }
 0x4c4 PF: > { %s1575_s23 = sand.u32 1, %s2101_s30   ;;  %p3057_p1 = scmp.ne.s32.totalorder %s3041_s16, 0 }
 0x4c5   : > { %p3058_p2 = scmp.ge.s32.totalorder %s2113_s12, 2  ;;  %s1576_s13 = scalar_lea.sflag [#allocation4], %s1575_s23 }
 0x4c7   : > { %p1803_p6 = pnand %p3058_p2, %p3057_p1 }
 0x4c9   : > { %p1804_p12 = pneg %p1803_p6 }
 0x4cb   : > { %2096 = dma.done.wait (%p1804_p12), %s1576_s13, 2048  }
 0x4cc   : > { %2098 = vsyncadd (%p1804_p12), %s1576_s13, 4294965248  ;;  %s3059_s26 = sld [smem:[#allocation12_spill]]  ;;  %p23_p3 = scmp.ge.s32.totalorder %s2251_s21, 4  }
 0x4cd   : > { %s3060_s30 = smov %s2105_s10  ;;  %s3061_s10 = smov %s2109_s11 }
 0x4ce   : > { %s3063_s12 = smov %s2251_s21  ;;  %25 = sbr.rel (!%p23_p3) target bundleno = 9 (0x9), region = 109 }
 0x4d2   : > { %s3062_s11 = smov %s3059_s26 }
 0x4d3   :  { %1581 = vsyncpa [#allocation3], 1 }
 0x4d4   :  { %1583 = vsyncpa [#allocation3 + $0x1], 1 }
 0x4d5   :  { %1584 = vsyncpa [#allocation6], 1 }
 0x4d6   :  { %1585 = vsyncpa [#allocation4], 1 }
 0x4d7   :  { %1587 = vsyncpa [#allocation4 + $0x1], 1 }

</bundles_post_ra>
